<compile_context>
chip_gen: v5e
topology: v5e:2x2
jax: 0.10.0
libtpu: 0.0.40
codegen_flags: <defaults>
</compile_context>

<pallas_src>
import math

import jax
import jax.numpy as jnp
import numpy as np
from jax.experimental import pallas as pl
from jax.experimental.pallas import tpu as pltpu


# ---------------------------------------------------------------------------
# Operator tables (the `unary` / `binary` function tables of the original code).
# ---------------------------------------------------------------------------
def _pow2(z):
    return z * z


def _pow3(z):
    return z * (z * z)


def _pow4(z):
    s = z * z
    return s * s


UNARY = (
    lambda z: jnp.zeros_like(z),   # 0: constant 0
    lambda z: jnp.ones_like(z),    # 1: constant 1
    lambda z: z,                   # 2: x
    _pow2,                         # 3: x^2
    _pow3,                         # 4: x^3
    _pow4,                         # 5: x^4
    jnp.exp,                       # 6: exp
    jnp.sin,                       # 7: sin
    jnp.cos,                       # 8: cos
)
BINARY = (
    lambda a, b: a + b,            # 0: +
    lambda a, b: a * b,            # 1: *
    lambda a, b: a - b,            # 2: -
)
_CONST_UNARY = (0, 1)              # unary actions whose value is x-independent

# Tree description (inorder): node types and leaf indices.
STRUCTURE = ("unary_leaf", "binary", "unary_leaf", "unary")
LEAVES_INDEX = (0, 2)
NUM_LEAVES = 2


def _round_up(v, m):
    return ((v + m - 1) // m) * m


def _choose_tile(n, d, max_tile):
    """Lane tile (multiple of 128) + grid size with bounded padding waste."""
    # Keep each step's x payload around <= ~4 MiB regardless of dim.
    cap = max(128, (((4 << 20) // (4 * d)) // 128) * 128)
    max_tile = max(128, (min(int(max_tile), cap) // 128) * 128)
    steps = -(-n // max_tile)                      # minimal #steps under the cap
    if steps == 1 and n > 256:
        steps = 2                                  # v7x: keep both TensorCores busy
    tile = _round_up(-(-n // steps), 128)
    grid = -(-n // tile)
    return tile, grid


def _vmem_limit_bytes(tile, d):
    # natural-layout x block is lane-padded in VMEM (minor dim -> 128), double
    # buffered; plus in-kernel transposed copy / elementwise temps / outputs.
    d_pad = _round_up(d, 128)
    need = 2 * tile * d_pad * 4 + 4 * tile * d * 4 + 8 * tile * 4 + (4 << 20)
    return int(min(max(need, 32 << 20), 56 << 20))     # stay under v7x's 64 MiB


# ---------------------------------------------------------------------------
# Pallas kernel.
#   params_ref : SMEM (4,) = [bias0, bias1, a_root, b_root]
#   x_ref      : (TILE, d) natural-layout block        (natural_layout=True)
#                (d, TILE) pre-transposed block        (natural_layout=False)
#   wt_ref     : (d, 2) stacked leaf weights (col 0 -> leaf node 0, col 1 -> node 2)
#   o_ref      : (1, TILE) lane-dense output slab
# ---------------------------------------------------------------------------
def _make_tree_kernel(actions, natural_layout):
    a0, a1, a2, a3 = actions

    def kernel(params_ref, x_ref, wt_ref, o_ref):
        b0 = params_ref[0]
        b1 = params_ref[1]
        a_root = params_ref[2]
        b_root = params_ref[3]
        wt = wt_ref[...].astype(jnp.float32)           # (d, 2)
        tile = o_ref.shape[-1]

        xt = None
        if (a0 not in _CONST_UNARY) or (a2 not in _CONST_UNARY):
            xv = x_ref[...].astype(jnp.float32)
            # Lane-dense (d, TILE): batch on lanes, dim on sublanes.
            xt = jnp.transpose(xv) if natural_layout else xv

        # De-duplicate the leaf unary when both leaves use the same action.
        ux_cache = {}

        def u_of_x(a):
            if a not in ux_cache:
                ux_cache[a] = UNARY[a](xt)
            return ux_cache[a]

        def leaf(a, col, bias):
            if a == 0:                                  # u(x) == 0 -> Linear gives bias
                return jnp.zeros((1, tile), jnp.float32) + bias
            if a == 1:                                  # u(x) == 1 -> sum(w) + bias
                s = jnp.sum(wt[:, col:col + 1], axis=0, keepdims=True)   # (1, 1)
                return jnp.zeros((1, tile), jnp.float32) + (s + bias)
            w_col = wt[:, col:col + 1]                  # (d, 1), broadcast over lanes
            return jnp.sum(u_of_x(a) * w_col, axis=0, keepdims=True) + bias

        left = leaf(a0, 0, b0)                          # (1, TILE)
        right = leaf(a2, 1, b1)                         # (1, TILE)
        mid = BINARY[a1](left, right)                   # binary internal node
        out = a_root * UNARY[a3](mid) + b_root          # non-leaf unary root
        o_ref[...] = out.astype(o_ref.dtype)

    return kernel


def _forward_pallas(x, params, wt, actions, tile, grid, *, natural_layout):
    n, d = x.shape
    n_pad = tile * grid                                 # output padding only (cheap)
    kernel = _make_tree_kernel(actions, natural_layout)

    if natural_layout:
        x_in = x                                        # no wrapper-side relayout pass
        x_spec = pl.BlockSpec((tile, d), lambda i: (i, 0))
    else:
        # Fallback: one-time XLA transpose pass (extra HBM traffic), known-good layout.
        x_in = x.T
        x_spec = pl.BlockSpec((d, tile), lambda i: (0, i))

    out = pl.pallas_call(
        kernel,
        out_shape=jax.ShapeDtypeStruct((1, n_pad), x.dtype),
        grid=(grid,),
        in_specs=[
            pl.BlockSpec(memory_space=pltpu.MemorySpace.SMEM),   # scalar params
            x_spec,
            pl.BlockSpec((d, 2), lambda i: (0, 0)),              # stacked leaf weights
        ],
        out_specs=pl.BlockSpec((1, tile), lambda i: (0, i)),     # lane-dense output
        compiler_params=pltpu.CompilerParams(
            dimension_semantics=("parallel",),
            vmem_limit_bytes=_vmem_limit_bytes(tile, d),
        ),
    )(params, x_in, wt)
    return out.reshape(n_pad, 1)[:n]                    # back to (N, 1)


_NATURAL_LAYOUT_OK = None      # resolved by a one-time compile probe


def learnable_computation_tree_forward(x, params, w0, w1, bs_action, *, max_tile=16384):
    """Forward pass of learnable_computation_tree.

    x         : (N, dim)  float32 or bfloat16 (compute is f32 in-kernel)
    params    : (4,)      [bias0, bias1, a_root, b_root]
    w0, w1    : (1, dim)  leaf Linear(dim, 1) weights
    bs_action : static tuple of 4 ints (one per inorder tree node)
    """
    global _NATURAL_LAYOUT_OK
    a0, a1, a2, a3 = (int(a) for a in bs_action)
    n, d = x.shape

    # Static constant folding: x-independent trees skip the pallas_call entirely.
    if a3 in _CONST_UNARY or (a0 in _CONST_UNARY and a2 in _CONST_UNARY):
        b0, b1, a_root, b_root = params[0], params[1], params[2], params[3]
        if a3 in _CONST_UNARY:
            val = a_root * float(a3) + b_root
        else:
            left = b0 if a0 == 0 else jnp.sum(w0) + b0
            right = b1 if a2 == 0 else jnp.sum(w1) + b1
            val = a_root * UNARY[a3](BINARY[a1](left, right)) + b_root
        return jnp.broadcast_to(val.astype(x.dtype), (n, 1))

    tile, grid = _choose_tile(n, d, max_tile)
    wt = jnp.concatenate([w0, w1], axis=0).T            # (d, 2), tiny
    args = (x, params, wt, (a0, a1, a2, a3), tile, grid)

    if _NATURAL_LAYOUT_OK is None:
        try:
            out = jax.block_until_ready(_forward_pallas(*args, natural_layout=True))
            _NATURAL_LAYOUT_OK = True
            return out
        except Exception:
            _NATURAL_LAYOUT_OK = False                  # in-kernel transpose not lowerable
    if _NATURAL_LAYOUT_OK:
        return _forward_pallas(*args, natural_layout=True)
    return _forward_pallas(*args, natural_layout=False)


# ---------------------------------------------------------------------------
# Pure-JAX reference (mirrors compute_by_tree exactly) for correctness checks.
# ---------------------------------------------------------------------------
def reference_forward(x, params, w0, w1, bs_action):
    a0, a1, a2, a3 = bs_action
    xf = x.astype(jnp.float32)
    b0, b1, a_root, b_root = params[0], params[1], params[2], params[3]
    left = UNARY[a0](xf) @ w0.astype(jnp.float32).T + b0      # (N, 1)
    right = UNARY[a2](xf) @ w1.astype(jnp.float32).T + b1     # (N, 1)
    return a_root * UNARY[a3](BINARY[a1](left, right)) + b_root


if __name__ == "__main__":
    N, DIM = 300, 32       # deliberately NOT a multiple of 128 -> ragged tail blocks

    key = jax.random.PRNGKey(0)
    kx, kw0, kw1 = jax.random.split(key, 3)

    x = jax.random.normal(kx, (N, DIM), dtype=jnp.float32)
    # Parameters initialized exactly as the module's __init__:
    #   Linear weights ~ Normal(0, 1/sqrt(dim)); biases = 0; a = 1; b = 0.
    w0 = jax.random.normal(kw0, (1, DIM), dtype=jnp.float32) / math.sqrt(DIM)
    w1 = jax.random.normal(kw1, (1, DIM), dtype=jnp.float32) / math.sqrt(DIM)
    params = jnp.array([0.0, 0.0, 1.0, 0.0], dtype=jnp.float32)  # [b0, b1, a, b]

    configs = [
        ((7, 0, 8, 6), 16384),   # sin, +, cos, exp      -- default big-tile path
        ((7, 0, 8, 6), 128),     # same actions           -- multi-step grid + ragged tail
        ((7, 2, 7, 3), 16384),   # sin, -, sin, x^2       -- leaf-unary de-dup (a0 == a2)
        ((1, 0, 5, 2), 16384),   # 1, +, x^4, identity    -- one constant leaf folded
        ((0, 1, 1, 6), 16384),   # 0, *, 1, exp           -- fully constant: kernel skipped
    ]
    for bs_action, mt in configs:
        ref = reference_forward(x, params, w0, w1, bs_action)
        out = learnable_computation_tree_forward(x, params, w0, w1, bs_action, max_tile=mt)
        out = jax.block_until_ready(out)
        assert out.shape == (N, 1)
        np.testing.assert_allclose(np.asarray(out), np.asarray(ref), rtol=1e-5, atol=1e-5)

    # bf16 input (halves HBM bytes on a memory-bound kernel); compute stays f32.
    xb = x.astype(jnp.bfloat16)
    out_b = jax.block_until_ready(
        learnable_computation_tree_forward(xb, params, w0, w1, (7, 0, 8, 6)))
    ref_b = reference_forward(xb, params, w0, w1, (7, 0, 8, 6))
    np.testing.assert_allclose(np.asarray(out_b.astype(jnp.float32)), np.asarray(ref_b),
                               rtol=2e-2, atol=2e-2)

    print("KERNEL_OK")
</pallas_src>

<mosaic_0001>
module attributes {stable_mosaic.version = 11 : i64} {
  func.func @kernel(%arg0: i32, %arg1: memref<4xf32, #tpu.memory_space<smem>>, %arg2: memref<256x32xf32, #tpu.memory_space<vmem>>, %arg3: memref<32x2xf32, #tpu.memory_space<vmem>>, %arg4: memref<1x256xf32, #tpu.memory_space<vmem>>) attributes {dimension_semantics = [#tpu.dimension_semantics<parallel>], iteration_bounds = array<i64: 2>, scalar_prefetch = 0 : i64, scratch_operands = 0 : i64, tpu.core_type = #tpu.core_type<tc>, window_params = [{transform_indices = @transform_0, window_bounds = array<i64: 4>}, {transform_indices = @transform_1, window_bounds = array<i64: 256, 32>}, {pipeline_mode = #tpu.pipeline_mode<synchronous>, transform_indices = @transform_2, window_bounds = array<i64: 32, 2>}, {transform_indices = @transform_3, window_bounds = array<i64: 1, 256>}]} {
    %c0 = arith.constant 0 : index
    %0 = memref.load %arg1[%c0] : memref<4xf32, #tpu.memory_space<smem>>
    %c1 = arith.constant 1 : index
    %1 = memref.load %arg1[%c1] : memref<4xf32, #tpu.memory_space<smem>>
    %c2 = arith.constant 2 : index
    %2 = memref.load %arg1[%c2] : memref<4xf32, #tpu.memory_space<smem>>
    %c3 = arith.constant 3 : index
    %3 = memref.load %arg1[%c3] : memref<4xf32, #tpu.memory_space<smem>>
    %c0_0 = arith.constant 0 : index
    %c0_1 = arith.constant 0 : index
    %4 = vector.load %arg3[%c0_0, %c0_1] : memref<32x2xf32, #tpu.memory_space<vmem>>, vector<32x2xf32>
    %c0_2 = arith.constant 0 : index
    %c0_3 = arith.constant 0 : index
    %5 = vector.load %arg2[%c0_2, %c0_3] : memref<256x32xf32, #tpu.memory_space<vmem>>, vector<256x32xf32>
    %6 = tpu.transpose %5, [1, 0] : vector<256x32xf32> -> vector<32x256xf32>
    %7 = vector.extract_strided_slice %4 {offsets = [0, 0], sizes = [32, 1], strides = [1, 1]} : vector<32x2xf32> to vector<32x1xf32>
    %8 = math.sin %6 : vector<32x256xf32>
    %9 = vector.broadcast %7 : vector<32x1xf32> to vector<32x256xf32>
    %10 = arith.mulf %8, %9 : vector<32x256xf32>
    %cst = arith.constant dense<0.000000e+00> : vector<256xf32>
    %11 = vector.multi_reduction <add>, %10, %cst [0] : vector<32x256xf32> to vector<256xf32>
    %12 = vector.shape_cast %11 : vector<256xf32> to vector<1x256xf32>
    %13 = vector.broadcast %0 : f32 to vector<1x256xf32>
    %14 = arith.addf %12, %13 : vector<1x256xf32>
    %15 = vector.extract_strided_slice %4 {offsets = [0, 1], sizes = [32, 1], strides = [1, 1]} : vector<32x2xf32> to vector<32x1xf32>
    %16 = math.cos %6 : vector<32x256xf32>
    %17 = vector.broadcast %15 : vector<32x1xf32> to vector<32x256xf32>
    %18 = arith.mulf %16, %17 : vector<32x256xf32>
    %cst_4 = arith.constant dense<0.000000e+00> : vector<256xf32>
    %19 = vector.multi_reduction <add>, %18, %cst_4 [0] : vector<32x256xf32> to vector<256xf32>
    %20 = vector.shape_cast %19 : vector<256xf32> to vector<1x256xf32>
    %21 = vector.broadcast %1 : f32 to vector<1x256xf32>
    %22 = arith.addf %20, %21 : vector<1x256xf32>
    %23 = arith.addf %14, %22 : vector<1x256xf32>
    %24 = math.exp %23 : vector<1x256xf32>
    %25 = vector.broadcast %2 : f32 to vector<1x256xf32>
    %26 = arith.mulf %25, %24 : vector<1x256xf32>
    %27 = vector.broadcast %3 : f32 to vector<1x256xf32>
    %28 = arith.addf %26, %27 : vector<1x256xf32>
    %c0_5 = arith.constant 0 : index
    %c0_6 = arith.constant 0 : index
    %29 = vector.load %arg4[%c0_5, %c0_6] : memref<1x256xf32, #tpu.memory_space<vmem>>, vector<1x256xf32>
    tpu.vector_store %arg4[%c0_5, %c0_6], %28 {strides = array<i32>} : memref<1x256xf32, #tpu.memory_space<vmem>>, vector<1x256xf32>,
    return
  }
  func.func @transform_0(%arg0: i32) -> i32 {
    %c0_i32 = arith.constant 0 : i32
    %c0_i32_0 = arith.constant 0 : i32
    return %c0_i32 : i32
  }
  func.func @transform_1(%arg0: i32) -> (i32, i32) {
    %c0_i32 = arith.constant 0 : i32
    %c0_i32_0 = arith.constant 0 : i32
    return %arg0, %c0_i32 : i32, i32
  }
  func.func @transform_2(%arg0: i32) -> (i32, i32) {
    %c0_i32 = arith.constant 0 : i32
    %c0_i32_0 = arith.constant 0 : i32
    %c0_i32_1 = arith.constant 0 : i32
    return %c0_i32, %c0_i32_0 : i32, i32
  }
  func.func @transform_3(%arg0: i32) -> (i32, i32) {
    %c0_i32 = arith.constant 0 : i32
    %c0_i32_0 = arith.constant 0 : i32
    return %c0_i32, %arg0 : i32, i32
  }
}

module attributes {stable_mosaic.version = 11 : i64} {
  func.func @kernel(%arg0: i32, %arg1: memref<4xf32, #tpu.memory_space<smem>>, %arg2: memref<32x256xf32, #tpu.memory_space<vmem>>, %arg3: memref<32x2xf32, #tpu.memory_space<vmem>>, %arg4: memref<1x256xf32, #tpu.memory_space<vmem>>) attributes {dimension_semantics = [#tpu.dimension_semantics<parallel>], iteration_bounds = array<i64: 2>, scalar_prefetch = 0 : i64, scratch_operands = 0 : i64, tpu.core_type = #tpu.core_type<tc>, window_params = [{transform_indices = @transform_0, window_bounds = array<i64: 4>}, {transform_indices = @transform_1, window_bounds = array<i64: 32, 256>}, {pipeline_mode = #tpu.pipeline_mode<synchronous>, transform_indices = @transform_2, window_bounds = array<i64: 32, 2>}, {transform_indices = @transform_3, window_bounds = array<i64: 1, 256>}]} {
    %c0 = arith.constant 0 : index
    %0 = memref.load %arg1[%c0] : memref<4xf32, #tpu.memory_space<smem>>
    %c1 = arith.constant 1 : index
    %1 = memref.load %arg1[%c1] : memref<4xf32, #tpu.memory_space<smem>>
    %c2 = arith.constant 2 : index
    %2 = memref.load %arg1[%c2] : memref<4xf32, #tpu.memory_space<smem>>
    %c3 = arith.constant 3 : index
    %3 = memref.load %arg1[%c3] : memref<4xf32, #tpu.memory_space<smem>>
    %c0_0 = arith.constant 0 : index
    %c0_1 = arith.constant 0 : index
    %4 = vector.load %arg3[%c0_0, %c0_1] : memref<32x2xf32, #tpu.memory_space<vmem>>, vector<32x2xf32>
    %c0_2 = arith.constant 0 : index
    %c0_3 = arith.constant 0 : index
    %5 = vector.load %arg2[%c0_2, %c0_3] : memref<32x256xf32, #tpu.memory_space<vmem>>, vector<32x256xf32>
    %6 = vector.extract_strided_slice %4 {offsets = [0, 0], sizes = [32, 1], strides = [1, 1]} : vector<32x2xf32> to vector<32x1xf32>
    %7 = math.sin %5 : vector<32x256xf32>
    %8 = vector.broadcast %6 : vector<32x1xf32> to vector<32x256xf32>
    %9 = arith.mulf %7, %8 : vector<32x256xf32>
    %cst = arith.constant dense<0.000000e+00> : vector<256xf32>
    %10 = vector.multi_reduction <add>, %9, %cst [0] : vector<32x256xf32> to vector<256xf32>
    %11 = vector.shape_cast %10 : vector<256xf32> to vector<1x256xf32>
    %12 = vector.broadcast %0 : f32 to vector<1x256xf32>
    %13 = arith.addf %11, %12 : vector<1x256xf32>
    %14 = vector.extract_strided_slice %4 {offsets = [0, 1], sizes = [32, 1], strides = [1, 1]} : vector<32x2xf32> to vector<32x1xf32>
    %15 = math.cos %5 : vector<32x256xf32>
    %16 = vector.broadcast %14 : vector<32x1xf32> to vector<32x256xf32>
    %17 = arith.mulf %15, %16 : vector<32x256xf32>
    %cst_4 = arith.constant dense<0.000000e+00> : vector<256xf32>
    %18 = vector.multi_reduction <add>, %17, %cst_4 [0] : vector<32x256xf32> to vector<256xf32>
    %19 = vector.shape_cast %18 : vector<256xf32> to vector<1x256xf32>
    %20 = vector.broadcast %1 : f32 to vector<1x256xf32>
    %21 = arith.addf %19, %20 : vector<1x256xf32>
    %22 = arith.addf %13, %21 : vector<1x256xf32>
    %23 = math.exp %22 : vector<1x256xf32>
    %24 = vector.broadcast %2 : f32 to vector<1x256xf32>
    %25 = arith.mulf %24, %23 : vector<1x256xf32>
    %26 = vector.broadcast %3 : f32 to vector<1x256xf32>
    %27 = arith.addf %25, %26 : vector<1x256xf32>
    %c0_5 = arith.constant 0 : index
    %c0_6 = arith.constant 0 : index
    %28 = vector.load %arg4[%c0_5, %c0_6] : memref<1x256xf32, #tpu.memory_space<vmem>>, vector<1x256xf32>
    tpu.vector_store %arg4[%c0_5, %c0_6], %27 {strides = array<i32>} : memref<1x256xf32, #tpu.memory_space<vmem>>, vector<1x256xf32>,
    return
  }
  func.func @transform_0(%arg0: i32) -> i32 {
    %c0_i32 = arith.constant 0 : i32
    %c0_i32_0 = arith.constant 0 : i32
    return %c0_i32 : i32
  }
  func.func @transform_1(%arg0: i32) -> (i32, i32) {
    %c0_i32 = arith.constant 0 : i32
    %c0_i32_0 = arith.constant 0 : i32
    return %c0_i32, %arg0 : i32, i32
  }
  func.func @transform_2(%arg0: i32) -> (i32, i32) {
    %c0_i32 = arith.constant 0 : i32
    %c0_i32_0 = arith.constant 0 : i32
    %c0_i32_1 = arith.constant 0 : i32
    return %c0_i32, %c0_i32_0 : i32, i32
  }
  func.func @transform_3(%arg0: i32) -> (i32, i32) {
    %c0_i32 = arith.constant 0 : i32
    %c0_i32_0 = arith.constant 0 : i32
    return %c0_i32, %arg0 : i32, i32
  }
}

</mosaic_0001>

<bundles_post_ra>
// kernel: tpu_custom_call.1
= control target key start
LH: loop header
LB: loop body
LE: loop exit
PB: predicated region body
PF: predicated region fallthrough
CT: control target
= control target key end

     0   :  { %8 = vsyncpa [#allocation4], 0  ;;  %s4483_s0 = inlined_call_operand.vmem [shape: f32[4], index: 0, kind: input, shape index: {}]   ;;  %s4484_s1 = inlined_call_operand.vmem [shape: f32[300,32], index: 1, kind: input, shape index: {}]   ;;  %s4485_s2 = inlined_call_operand.vmem [shape: f32[32,2], index: 2, kind: input, shape index: {}]   ;;  %s4486_s3 = inlined_call_operand.hbm [shape: f32[1,512], index: 3, kind: output, shape index: {}]  }
   0x1   :  { %9 = vsyncpa [#allocation3], 0 }
   0x2   :  { %11 = vsyncpa [#allocation3 + $0x1], 0  ;;  %s3231_s12 = smov 0   ;;  %s3233_s13 = smov 0  }
   0x3   :  { %s3235_s14 = smov 0   ;;  %s3237_s15 = smov 0  }
   0x4 LB: > { %s3252_s16 = sadd.s32 4294967295, %s3200_s15   ;;  %s2986_s17 = sadd.s32 4294967294, %s3200_s15   ;;  %s3200_s15 = sphi %s3237_s15, %s4543_s15   ;;  %s3196_s14 = sphi %s3235_s14, %s4542_s14   ;;  %s3192_s13 = sphi %s3233_s13, %s4541_s13   ;;  %s3188_s12 = sphi %s3231_s12, %s4540_s12  }
   0x5   : > { %s3256_s18 = sadd.s32 1, %s3200_s15   ;;  %s92_s19 = sadd.s32 1, %s3196_s14 }
   0x6   : > { %s89_s20 = ssub.s32 %s3200_s15, %s3256_s18  ;;  %p102_p0 = scmp.ne.s32.totalorder %s3196_s14, %s3192_s13 }
   0x7   : > { %p90_p1 = scmp.eq.s32.totalorder %s89_s20, 0  ;;  %p103_p2 = scmp.eq.s32.totalorder %s3252_s16, 1 }
   0x8   : > { %p108_p3 = scmp.ne.s32.totalorder %s3192_s13, %s3188_s12  ;;  %p109_p4 = scmp.eq.s32.totalorder %s2986_s17, 1 }
   0x9   : > { %s3267_s21 = scalar_select %p90_p1, %s3196_s14, %s92_s19  }
   0xa   : > { %p3269_p5 = por %p103_p2, %p102_p0  ;;  %p3273_p6 = por %p109_p4, %p108_p3 }
   0xb   : > { %p2987_p7 = scmp.ge.s32.totalorder %s3200_s15, 1  ;;  %p116_p8 = scmp.lt.s32.totalorder %s3200_s15, 3 }
   0xc   : > { %p3064_p9 = scmp.eq.s32.totalorder %s3252_s16, 0  ;;  %s128_s26 = sshll.u32 %s4483_s0, 4  ;;  %s129_s26 = int_to_ptr.vmem [resolvable:$true] %s128_s26 }
   0xd   : > { %p117_p10 = pnand %p2987_p7, %p116_p8  ;;  %s3202_s27 = smov [#allocation2]  }
   0xf   : > { %p3056_p11 = pneg %p117_p10  ;;  %161 = sbr.rel (%p117_p10) target bundleno = 562 (0x232), region = 32 }
  0x11   : > { %p3057_p12 = pnand %p3064_p9, %p3056_p11 }
  0x13   : > { %3059 = dma.vmem_to_smem (!%p3057_p12), %s129_s26, 16, %s3202_s27, [#allocation4]  }
  0x14   : > { %3179 = dma.done.wait (%p3064_p9), [#allocation4], 16  }
  0x15   : > { %3181 = vsyncadd (%p3064_p9), [#allocation4], 4294967280 }
  0x16   : > { %168 = sfence }
  0x17   : > { %s2993_s28 = sshll.u32 %s3252_s16, 5  ;;  %v210_v24 = vld [vmem:[%s4485_s2] sm:$0xff]  ;;  %v4503_v25 = vmov 0   ;;  %v211_v28 = vld [vmem:[%s4485_s2 + $0x8] sm:$0xff]  ;;  %v3204_v31 = vmov 1   ;;  %v212_v36 = vld [vmem:[%s4485_s2 + $0x10] sm:$0xff] }
  0x18   : > { %p196_p13 = scmp.lt.s32.totalorder %s2993_s28, 37  ;;  %3108 = vset.pattern.permute.xlu2 %v4503_v25  ;;  %v4495_v63 = vmov 683565275   ;;  %s4436_s20 = sld [smem:[#allocation2]] }
  0x19   : > { %1552 = vperm.xlu2 %3108, %v210_v24   ;;  %s4441_s24 = sld [smem:[#allocation2 + $0x1]]  ;;  %s188_s27 = sand.u32 1, %s3192_s13  }
  0x1a   : > { %s4545_s28 = smov (!%p196_p13, %s2993_s28), 37  ;;  %s2996_s25 = sld [smem:[#allocation2 + $0x2]] }
  0x1b   : > { %s2994_s29 = sshll.u32 %s4545_s28, 3  ;;  %s2997_s26 = sld [smem:[#allocation2 + $0x3]] }
  0x1c   : > { %s3287_s5 = scalar_lea.vmem %s4484_s1, %s2994_s29  ;;  %s2992_s28 = sshll.u32 %s188_s27, 1 }
  0x1d   : > { %v230_v0 = vld [vmem:[%s3287_s5 + $0x80] sm:$0xff]  ;;  %v231_v2 = vld [vmem:[%s3287_s5 + $0x88] sm:$0xff]  ;;  %v232_v4 = vld [vmem:[%s3287_s5 + $0x90] sm:$0xff]  ;;  %s3047_s29 = sshll.u32 %s3252_s16, 1  ;;  %s190_s6 = scalar_lea.vmem [#allocation5], %s2992_s28 }
  0x1e   : > { %v214_v1 = vld [vmem:[%s3287_s5] sm:$0xff]  ;;  %278 = vxpose.xlu1.b32.start [1/16] (narrow) %v230_v0, 32  ;;  %v215_v3 = vld [vmem:[%s3287_s5 + $0x8] sm:$0xff]  ;;  %v216_v5 = vld [vmem:[%s3287_s5 + $0x10] sm:$0xff]  ;;  %s2912_s7 = sshll.u32 %s190_s6, 4  ;;  %s2900_s16 = scalar_lea.sflag [#allocation3], %s188_s27  ;;  %s2913_s7 = int_to_ptr.vmem [resolvable:$true] %s2912_s7 }
  0x1f   : > { %246 = vxpose.xlu0.b32.start [1/16] (narrow) %v214_v1, 32  ;;  %v233_v6 = vld [vmem:[%s3287_s5 + $0x98] sm:$0xff]  ;;  %v234_v8 = vld [vmem:[%s3287_s5 + $0xa0] sm:$0xff]  ;;  %v235_v10 = vld [vmem:[%s3287_s5 + $0xa8] sm:$0xff]  ;;  %v4501_v1 = vmov 2475754826  }
  0x20   : > { %v217_v7 = vld [vmem:[%s3287_s5 + $0x18] sm:$0xff]  ;;  %v218_v9 = vld [vmem:[%s3287_s5 + $0x20] sm:$0xff]  ;;  %v219_v11 = vld [vmem:[%s3287_s5 + $0x28] sm:$0xff]  ;;  %s3154_s19 = scalar_lea.hbm %s4486_s3, 4 }
  0x21   : > { %v236_v12 = vld [vmem:[%s3287_s5 + $0xb0] sm:$0xff]  ;;  %v237_v14 = vld [vmem:[%s3287_s5 + $0xb8] sm:$0xff]  ;;  %v238_v16 = vld [vmem:[%s3287_s5 + $0xc0] sm:$0xff]  ;;  %1557 = vperm.xlu2 %3108, %v211_v28  }
  0x22   : > { %v220_v13 = vld [vmem:[%s3287_s5 + $0x30] sm:$0xff]  ;;  %v221_v15 = vld [vmem:[%s3287_s5 + $0x38] sm:$0xff]  ;;  %v222_v17 = vld [vmem:[%s3287_s5 + $0x40] sm:$0xff] }
  0x23   : > { %v239_v18 = vld [vmem:[%s3287_s5 + $0xc8] sm:$0xff]  ;;  %v240_v20 = vld [vmem:[%s3287_s5 + $0xd0] sm:$0xff]  ;;  %v241_v22 = vld [vmem:[%s3287_s5 + $0xd8] sm:$0xff] }
  0x24   : > { %v223_v19 = vld [vmem:[%s3287_s5 + $0x48] sm:$0xff]  ;;  %v224_v21 = vld [vmem:[%s3287_s5 + $0x50] sm:$0xff]  ;;  %v225_v23 = vld [vmem:[%s3287_s5 + $0x58] sm:$0xff] }
  0x25   : > { %v242_v26 = vld [vmem:[%s3287_s5 + $0xe0] sm:$0xff]  ;;  %v243_v29 = vld [vmem:[%s3287_s5 + $0xe8] sm:$0xff]  ;;  %v244_v32 = vld [vmem:[%s3287_s5 + $0xf0] sm:$0xff] }
  0x26   : > { %279 = vxpose.xlu1.b32.cont [2/16] (narrow) %v231_v2, 32  ;;  %v226_v27 = vld [vmem:[%s3287_s5 + $0x60] sm:$0xff]  ;;  %v227_v30 = vld [vmem:[%s3287_s5 + $0x68] sm:$0xff]  ;;  %v228_v33 = vld [vmem:[%s3287_s5 + $0x70] sm:$0xff] }
  0x27   : > { %247 = vxpose.xlu0.b32.cont [2/16] (narrow) %v215_v3, 32  ;;  %v245_v34 = vld [vmem:[%s3287_s5 + $0xf8] sm:$0xff] }
  0x28   : > { %v229_v35 = vld [vmem:[%s3287_s5 + $0x78] sm:$0xff]  ;;  %s2910_s5 = scalar_lea.hbm %s4486_s3, %s3047_s29 }
  0x29   : > { %3109 = vset.pattern.permute.xlu2 %v3204_v31  ;;  %s2914_s8 = sshll.u32 %s2910_s5, 4  ;;  %s2915_s8 = int_to_ptr.hbm [resolvable:$true] %s2914_s8 }
  0x2a   : > { %2832 = vperm.xlu2 %3109, %v210_v24   ;;  %s3148_s9 = sshra.s32 %s2915_s8, 4  ;;  %s3149_s9 = int_to_ptr.hbm [resolvable:$true] %s3148_s9 }
  0x2b   : > { %s3150_s10 = scalar_lea.hbm %s3149_s9, 2  ;;  %p3155_p3 = scmp.lt.s32.totalorder %s3149_s9, %s4486_s3 }
  0x2c   : > { %p3151_p0 = scmp.ne.s32.totalorder %s3149_s9, %s3150_s10  ;;  %p3156_p4 = scmp.lt.s32.totalorder %s3154_s19, %s3150_s10 }
  0x2e   : > { %280 = vxpose.xlu1.b32.cont [3/16] (narrow) %v232_v4, 32  ;;  %p3152_p1 = pnand %p3151_p0, %p3269_p5  ;;  %p3157_p7 = por %p3156_p4, %p3155_p3 }
  0x2f   : > { %248 = vxpose.xlu0.b32.cont [3/16] (narrow) %v216_v5, 32  ;;  %v4499_v5 = vmov 2131351028  }
  0x30   : > { %p3153_p2 = pneg %p3152_p1 }
  0x32   : > { %2836 = vperm.xlu2 %3109, %v211_v28   ;;  %p3158_p8 = pnand %p3157_p7, %p3153_p2 }
  0x36   : > { %281 = vxpose.xlu1.b32.cont [4/16] (narrow) %v233_v6, 32 }
  0x37   : > { %249 = vxpose.xlu0.b32.cont [4/16] (narrow) %v217_v7, 32 }
  0x3a   : > { %3110 = vset.pattern.permute.xlu2 %v4503_v25 }
  0x3b   : > { %1562 = vperm.xlu2 %3110, %v212_v36  }
  0x3e   : > { %282 = vxpose.xlu1.b32.cont [5/16] (narrow) %v234_v8, 32  ;;  %v4493_v8 = vmov 2102212464  }
  0x3f   : > { %250 = vxpose.xlu0.b32.cont [5/16] (narrow) %v218_v9, 32 }
  0x43   : > { %3111 = vset.pattern.permute.xlu2 %v3204_v31 }
  0x44   : > { %2840 = vperm.xlu2 %3111, %v212_v36  }
  0x46   : > { %283 = vxpose.xlu1.b32.cont [6/16] (narrow) %v235_v10, 32 }
  0x47   : > { %251 = vxpose.xlu0.b32.cont [6/16] (narrow) %v219_v11, 32  ;;  %v4491_v11 = vmov 920167782  }
  0x4c   : > { %3112 = vset.pattern.permute.xlu2 %v4503_v25 }
  0x4e   : > { %284 = vxpose.xlu1.b32.cont [7/16] (narrow) %v236_v12, 32 }
  0x4f   : > { %252 = vxpose.xlu0.b32.cont [7/16] (narrow) %v220_v13, 32 }
  0x56   : > { %285 = vxpose.xlu1.b32.cont [8/16] (narrow) %v237_v14, 32  ;;  %v4489_v14 = vmov 1326507024  }
  0x57   : > { %253 = vxpose.xlu0.b32.cont [8/16] (narrow) %v221_v15, 32 }
  0x5e   : > { %286 = vxpose.xlu1.b32.cont [9/16] (narrow) %v238_v16, 32 }
  0x5f   : > { %254 = vxpose.xlu0.b32.cont [9/16] (narrow) %v222_v17, 32 }
  0x66   : > { %287 = vxpose.xlu1.b32.cont [10/16] (narrow) %v239_v18, 32 }
  0x67   : > { %255 = vxpose.xlu0.b32.cont [10/16] (narrow) %v223_v19, 32 }
  0x6e   : > { %288 = vxpose.xlu1.b32.cont [11/16] (narrow) %v240_v20, 32 }
  0x6f   : > { %256 = vxpose.xlu0.b32.cont [11/16] (narrow) %v224_v21, 32 }
  0x76   : > { %289 = vxpose.xlu1.b32.cont [12/16] (narrow) %v241_v22, 32 }
  0x77   : > { %257 = vxpose.xlu0.b32.cont [12/16] (narrow) %v225_v23, 32 }
  0x7e   : > { %290 = vxpose.xlu1.b32.cont [13/16] (narrow) %v242_v26, 32 }
  0x7f   : > { %258 = vxpose.xlu0.b32.cont [13/16] (narrow) %v226_v27, 32 }
  0x86   : > { %291 = vxpose.xlu1.b32.cont [14/16] (narrow) %v243_v29, 32 }
  0x87   : > { %259 = vxpose.xlu0.b32.cont [14/16] (narrow) %v227_v30, 32 }
  0x8e   : > { %292 = vxpose.xlu1.b32.cont [15/16] (narrow) %v244_v32, 32 }
  0x8f   : > { %260 = vxpose.xlu0.b32.cont [15/16] (narrow) %v228_v33, 32 }
  0x96   : > { %293 = vxpose.xlu1.b32.end [16/16] (narrow) %v245_v34, 32 }
  0x97   : > { %261 = vxpose.xlu0.b32.end [16/16] (narrow) %v229_v35, 32 }
  0xc2   : > { %v3333_v37 = vpop.trf.xlu1 }
  0xc3   : > { %v3335_v38 = vpop.trf.xlu0  ;;  %v465_v39 = vand.u32 2147483647, %v3333_v37  ;;  %v468_v40 = vand.u32 2139095040, %v3333_v37 }
  0xc4   : > { %v310_v41 = vand.u32 2147483647, %v3335_v38  ;;  %v313_v42 = vand.u32 2139095040, %v3335_v38 }
  0xc5   : > { %v469_v43 = vshrl.u32 %v468_v40, 23  ;;  %v472_v44 = vand.u32 8388607, %v465_v39 }
  0xc6   : > { %v314_v45 = vshrl.u32 %v313_v42, 23  ;;  %v317_v46 = vand.u32 8388607, %v310_v41 }
  0xc7   : > { %v3001_v47 = vadd.s32 4294967169, %v469_v43  ;;  %v473_v48 = vor.u32 8388608, %v472_v44 }
  0xc8   : > { %v2998_v49 = vadd.s32 4294967169, %v314_v45  ;;  %v318_v50 = vor.u32 8388608, %v317_v46 }
  0xc9   : > { %v475_v51 = vadd.s32 1, %v3001_v47  ;;  %v3346_v53 = vshll.u32 %v473_v48, 8 }
  0xca   : > { %v320_v52 = vadd.s32 1, %v2998_v49  ;;  %v3349_v55 = vshll.u32 %v318_v50, 8 }
  0xcb   : > { %vm476_vm0 = vcmp.gt.s32.totalorder %v475_v51, 0  ;;  %v3352_v59 = vand.u32 65535, %v3346_v53  ;;  %v3355_v60 = vshrl.u32 %v3346_v53, 16 }
  0xcc   : > { %v477_v54 = vsel %vm476_vm0, %v475_v51, 0  ;;  %vm321_vm1 = vcmp.gt.s32.totalorder %v320_v52, 0  ;;  %v3364_v3 = vand.u32 65535, %v3349_v55 }
  0xcd   : > { %v479_v56 = vand.u32 31, %v477_v54  ;;  %v322_v57 = vsel %vm321_vm1, %v320_v52, 0  ;;  %v3359_v62 = vshrl.u32 %v477_v54, 5 }
  0xce   : > { %v3357_v61 = vand.u32 31, %v322_v57  ;;  %v3406_v48 = vshrl.u32 %v322_v57, 5 }
  0xcf   : > { %v480_v58 = vsub.s32 32, %v479_v56  ;;  %v482_v0 = vshll.u32 %v4495_v63, %v479_v56  ;;  %v485_v2 = vshll.u32 %v4501_v1, %v479_v56  ;;  %v488_v7 = vshll.u32 %v4499_v5, %v479_v56 }
  0xd0   : > { %v491_v10 = vshll.u32 %v4493_v8, %v479_v56  ;;  %v494_v13 = vshll.u32 %v4491_v11, %v479_v56  ;;  %v3375_v19 = vsub.s32 32, %v3357_v61  ;;  %vm497_vm2 = vcmp.lt.s32.totalorder %v3359_v62, 1 }
  0xd1   : > { %v483_v4 = vshrl.u32 %v4501_v1, %v480_v58  ;;  %v486_v6 = vshrl.u32 %v4499_v5, %v480_v58  ;;  %v489_v9 = vshrl.u32 %v4493_v8, %v480_v58  ;;  %v492_v12 = vshrl.u32 %v4491_v11, %v480_v58 }
  0xd2   : > { %v495_v15 = vshrl.u32 %v4489_v14, %v480_v58  ;;  %vm498_vm3 = vcmp.lt.s32.totalorder %v3359_v62, 2  ;;  %vm499_vm4 = vcmp.lt.s32.totalorder %v3359_v62, 3  ;;  %vm500_vm5 = vcmp.lt.s32.totalorder %v3359_v62, 4 }
  0xd3   : > { %v484_v16 = vor.u32 %v483_v4, %v482_v0  ;;  %v487_v17 = vor.u32 %v486_v6, %v485_v2  ;;  %v490_v18 = vor.u32 %v489_v9, %v488_v7  ;;  %v493_v20 = vor.u32 %v492_v12, %v491_v10 }
  0xd4   : > { %v496_v21 = vor.u32 %v495_v15, %v494_v13  ;;  %v327_v27 = vshll.u32 %v4495_v63, %v3357_v61  ;;  %v330_v28 = vshll.u32 %v4501_v1, %v3357_v61  ;;  %v328_v33 = vshrl.u32 %v4501_v1, %v3375_v19 }
  0xd5   : > { %v505_v22 = vsel %vm497_vm2, %v484_v16, %v487_v17  ;;  %v509_v23 = vsel %vm497_vm2, %v487_v17, %v490_v18  ;;  %v506_v24 = vsel %vm500_vm5, %v493_v20, 920167782  ;;  %v502_v29 = vsel %vm500_vm5, %v490_v18, 2102212464 }
  0xd6   : > { %v510_v26 = vsel %vm500_vm5, %v496_v21, 1326507024  ;;  %v507_v30 = vsel %vm499_vm4, %v490_v18, %v506_v24  ;;  %v481_v34 = vshrl.u32 %v4495_v63, %v480_v58  ;;  %v331_v40 = vshrl.u32 %v4499_v5, %v3375_v19 }
  0xd7   : > { %v511_v32 = vsel %vm499_vm4, %v493_v20, %v510_v26  ;;  %v508_v35 = vsel %vm498_vm3, %v505_v22, %v507_v30  ;;  %v503_v47 = vsel %vm499_vm4, %v487_v17, %v502_v29  ;;  %v3408_v49 = vor.u32 %v328_v33, %v327_v27 }
  0xd8   : > { %v512_v36 = vsel %vm498_vm3, %v509_v23, %v511_v32  ;;  %v538_v44 = vand.u32 65535, %v508_v35  ;;  %v539_v45 = vshrl.u32 %v508_v35, 16  ;;  %v501_v46 = vsel %vm497_vm2, %v481_v34, %v484_v16 }
  0xd9   : > { %v516_v42 = vand.u32 65535, %v512_v36  ;;  %v517_v43 = vshrl.u32 %v512_v36, 16  ;;  %v3412_v52 = vor.u32 %v331_v40, %v330_v28  ;;  %v333_v54 = vshll.u32 %v4499_v5, %v3357_v61 }
  0xda   : > { %v541_v58 = vmul.u32 %v539_v45, %v3352_v59  ;;  %v542_v0 = vmul.u32 %v538_v44, %v3355_v60  ;;  %v334_v57 = vshrl.u32 %v4493_v8, %v3375_v19  ;;  %v540_v6 = vmul.u32 %v538_v44, %v3352_v59 }
  0xdb   : > { %v519_v50 = vmul.u32 %v517_v43, %v3352_v59  ;;  %v520_v51 = vmul.u32 %v516_v42, %v3355_v60  ;;  %v518_v56 = vmul.u32 %v516_v42, %v3352_v59  ;;  %v521_v2 = vmul.u32 %v517_v43, %v3355_v60 }
  0xdc   : > { %v543_v7 = vmul.u32 %v539_v45, %v3355_v60  ;;  %v544_v13 = vshll.u32 %v541_v58, 16  ;;  %v546_v16 = vshll.u32 %v542_v0, 16  ;;  %v336_v17 = vshll.u32 %v4493_v8, %v3357_v61 }
  0xdd   : > { %v522_v4 = vshll.u32 %v519_v50, 16  ;;  %v523_v9 = vshrl.u32 %v519_v50, 16  ;;  %v524_v10 = vshll.u32 %v520_v51, 16  ;;  %v525_v12 = vshrl.u32 %v520_v51, 16  ;;  %v3455_v51 = vpop.trf.xlu1 }
  0xde   : > { %vm548_vm7 = vc.u32 %v540_v6, %v544_v13  ;;  %v550_v20 = vadd.s32 %v544_v13, %v540_v6  ;;  %v337_v21 = vshrl.u32 %v4491_v11, %v3375_v19  ;;  %v339_v22 = vshll.u32 %v4491_v11, %v3357_v61 }
  0xdf   : > { %vm526_vm6 = vc.u32 %v518_v56, %v522_v4  ;;  %v528_v15 = vadd.s32 %v522_v4, %v518_v56  ;;  %v549_v60 = vsel %vm548_vm7, 1, %v4503_v25  ;;  %v335_v26 = vor.u32 %v334_v57, %v333_v54 }
  0xe0   : > { %v527_v18 = vsel %vm526_vm6, 1, %v4503_v25  ;;  %v551_v24 = vadd.s32 %v549_v60, %v543_v7  ;;  %vm552_vm9 = vc.u32 %v550_v20, %v546_v16  ;;  %v338_v29 = vor.u32 %v337_v21, %v336_v17 }
  0xe1   : > { %v529_v59 = vadd.s32 %v527_v18, %v521_v2  ;;  %vm530_vm8 = vc.u32 %v528_v15, %v524_v10  ;;  %v553_v28 = vsel %vm552_vm9, 1, %v4503_v25  ;;  %v340_v30 = vshrl.u32 %v4489_v14, %v3375_v19 }
  0xe2   : > { %v531_v23 = vsel %vm530_vm8, 1, %v4503_v25  ;;  %v545_v32 = vshrl.u32 %v541_v58, 16  ;;  %v547_v33 = vshrl.u32 %v542_v0, 16  ;;  %v3436_v34 = vadd.s32 %v550_v20, %v546_v16 }
  0xe3   : > { %v533_v27 = vadd.s32 %v531_v23, %v529_v59  ;;  %v555_v35 = vadd.s32 %v553_v28, %v551_v24  ;;  %v341_v40 = vor.u32 %v340_v30, %v339_v22  ;;  %vm342_vm10 = vcmp.lt.s32.totalorder %v3406_v48, 1 }
  0xe4   : > { %vm345_vm11 = vcmp.lt.s32.totalorder %v3406_v48, 4  ;;  %vm344_vm12 = vcmp.lt.s32.totalorder %v3406_v48, 3  ;;  %v350_v42 = vsel %vm342_vm10, %v3408_v49, %v3412_v52  ;;  %vm343_vm13 = vcmp.lt.s32.totalorder %v3406_v48, 2 }
  0xe5   : > { %v534_v36 = vadd.s32 %v533_v27, %v523_v9  ;;  %v556_v61 = vadd.s32 %v555_v35, %v545_v32  ;;  %v351_v43 = vsel %vm345_vm11, %v338_v29, 920167782  ;;  %v354_v50 = vsel %vm342_vm10, %v3412_v52, %v335_v26 }
  0xe6   : > { %v352_v45 = vsel %vm344_vm12, %v335_v26, %v351_v43  ;;  %v504_v54 = vsel %vm498_vm3, %v501_v46, %v503_v47  ;;  %v355_v0 = vsel %vm345_vm11, %v341_v40, 1326507024  ;;  %v360_v2 = vshrl.u32 %v3349_v55, 16 }
  0xe7   : > { %v3447_v44 = vadd.s32 %v534_v36, %v525_v12  ;;  %v557_v56 = vadd.s32 %v556_v61, %v547_v33  ;;  %v353_v58 = vsel %vm343_vm13, %v350_v42, %v352_v45  ;;  %v356_v57 = vsel %vm344_vm12, %v338_v29, %v355_v0 }
  0xe8   : > { %v383_v4 = vand.u32 65535, %v353_v58  ;;  %v357_v62 = vsel %vm343_vm13, %v354_v50, %v356_v57  ;;  %v384_v46 = vshrl.u32 %v353_v58, 16  ;;  %v778_v47 = vand.u32 2139095040, %v3455_v51 }
  0xe9   : > { %vm560_vm14 = vc.u32 %v3447_v44, %v3436_v34  ;;  %v561_v6 = vadd.s32 1, %v557_v56  ;;  %v558_v7 = vmul.u32 %v3346_v53, %v504_v54  ;;  %v361_v9 = vand.u32 65535, %v357_v62 }
  0xea   : > { %v362_v10 = vshrl.u32 %v357_v62, 16  ;;  %v326_v13 = vshrl.u32 %v4495_v63, %v3375_v19  ;;  %v386_v15 = vmul.u32 %v384_v46, %v3364_v3  ;;  %v387_v16 = vmul.u32 %v383_v4, %v360_v2 }
  0xeb   : > { %v562_v12 = vsel %vm560_vm14, %v561_v6, %v557_v56  ;;  %v347_v18 = vsel %vm345_vm11, %v335_v26, 2102212464  ;;  %v365_v21 = vmul.u32 %v361_v9, %v360_v2  ;;  %v385_v59 = vmul.u32 %v383_v4, %v3364_v3 }
  0xec   : > { %v563_v17 = vadd.s32 %v562_v12, %v558_v7  ;;  %v364_v20 = vmul.u32 %v362_v10, %v3364_v3  ;;  %v388_v60 = vmul.u32 %v384_v46, %v360_v2  ;;  %v389_v53 = vshll.u32 %v386_v15, 16 }
  0xed   : > { %v779_v22 = vshrl.u32 %v778_v47, 23  ;;  %v363_v24 = vmul.u32 %v361_v9, %v3364_v3  ;;  %v366_v27 = vmul.u32 %v362_v10, %v360_v2  ;;  %v369_v28 = vshll.u32 %v365_v21, 16 }
  0xee   : > { %v564_v23 = vadd.s32 536870912, %v563_v17  ;;  %v367_v19 = vshll.u32 %v364_v20, 16  ;;  %v391_v29 = vshll.u32 %v387_v16, 16  ;;  %vm393_vm15 = vc.u32 %v385_v59, %v389_v53 }
  0xef   : > { %v395_v30 = vadd.s32 %v389_v53, %v385_v59  ;;  %v394_v33 = vsel %vm393_vm15, 1, %v4503_v25  ;;  %v346_v35 = vsel %vm342_vm10, %v326_v13, %v3408_v49  ;;  %v348_v61 = vsel %vm344_vm12, %v3412_v52, %v347_v18 }
  0xf0   : > { %v3480_v32 = vshrl.u32 %v564_v23, 30  ;;  %vm371_vm0 = vc.u32 %v363_v24, %v367_v19  ;;  %v373_v26 = vadd.s32 %v367_v19, %v363_v24  ;;  %v396_v40 = vadd.s32 %v394_v33, %v388_v60 }
  0xf1   : > { %v372_v36 = vsel %vm371_vm0, 1, %v4503_v25  ;;  %vm397_vm1 = vc.u32 %v395_v30, %v391_v29  ;;  %v390_v45 = vshrl.u32 %v386_v15, 16  ;;  %v3007_v54 = vadd.s32 4294967169, %v779_v22 }
  0xf2   : > { %v566_v3 = vshll.u32 %v3480_v32, 30  ;;  %v374_v42 = vadd.s32 %v372_v36, %v366_v27  ;;  %vm375_vm2 = vc.u32 %v373_v26, %v369_v28  ;;  %v398_v50 = vsel %vm397_vm1, 1, %v4503_v25 }
  0xf3   : > { %v376_v43 = vsel %vm375_vm2, 1, %v4503_v25  ;;  %v368_v49 = vshrl.u32 %v364_v20, 16  ;;  %v400_v0 = vadd.s32 %v398_v50, %v396_v40  ;;  %v370_v57 = vshrl.u32 %v365_v21, 16 }
  0xf4   : > { %v3493_v56 = vsub.s32 %v563_v17, %v566_v3  ;;  %v378_v58 = vadd.s32 %v376_v43, %v374_v42  ;;  %v392_v2 = vshrl.u32 %v387_v16, 16  ;;  %v775_v4 = vand.u32 2147483647, %v3455_v51 }
  0xf5   : > { %v785_v6 = vadd.s32 1, %v3007_v54  ;;  %v401_v46 = vadd.s32 %v400_v0, %v390_v45  ;;  %v349_v47 = vsel %vm343_vm13, %v346_v35, %v348_v61  ;;  %v3500_v7 = vadd.s32 %v395_v30, %v391_v29 }
  0xf6   : > { %vm568_vm3 = vcmp.lt.s32.totalorder %v3493_v56, 0  ;;  %v569_v52 = vsub.s32 0, %v3493_v56  ;;  %v379_v62 = vadd.s32 %v378_v58, %v368_v49  ;;  %v782_v16 = vand.u32 8388607, %v775_v4 }
  0xf7   : > { %vm786_vm4 = vcmp.gt.s32.totalorder %v785_v6, 0  ;;  %v402_v12 = vadd.s32 %v401_v46, %v392_v2  ;;  %v403_v20 = vmul.u32 %v3349_v55, %v349_v47  ;;  %v559_v58 = vadd.s32 %v3436_v34, %v3447_v44 }
  0xf8   : > { %v570_v9 = vsel %vm568_vm3, %v569_v52, %v3493_v56  ;;  %v3503_v10 = vadd.s32 %v379_v62, %v370_v57  ;;  %v787_v13 = vsel %vm786_vm4, %v785_v6, 0  ;;  %v783_v53 = vor.u32 8388608, %v782_v16 }
  0xf9   : > { %v571_v15 = vclz %v570_v9  ;;  %v789_v17 = vand.u32 31, %v787_v13  ;;  %v406_v18 = vadd.s32 1, %v402_v12  ;;  %v3519_v28 = vshrl.u32 %v787_v13, 5 }
  0xfa   : > { %vm405_vm5 = vc.u32 %v3503_v10, %v3500_v7  ;;  %v3543_v6 = vshll.u32 %v783_v53, 8  ;;  %vm467_vm13 = vcmp.lt.s32.totalorder %v3333_v37, 0  ;;  %vm3599_vm2 = vcmp.le.f32.partialorder %v465_v39, 0.7853982 }
  0xfb   : > { %v3002_v48 = vadd.s32 4294967294, %v571_v15  ;;  %v3510_v21 = vsub.s32 32, %v789_v17  ;;  %v407_v59 = vsel %vm405_vm5, %v406_v18, %v402_v12  ;;  %v792_v30 = vshll.u32 %v4495_v63, %v789_v17 }
  0xfc   : > { %v408_v60 = vadd.s32 %v407_v59, %v403_v20  ;;  %v795_v26 = vshll.u32 %v4501_v1, %v789_v17  ;;  %v798_v33 = vshll.u32 %v4499_v5, %v789_v17  ;;  %v801_v35 = vshll.u32 %v4493_v8, %v789_v17 }
  0xfd   : > { %vm3003_vm6 = vcmp.lt.s32.totalorder %v3002_v48, 0  ;;  %v793_v23 = vshrl.u32 %v4501_v1, %v3510_v21  ;;  %v796_v24 = vshrl.u32 %v4499_v5, %v3510_v21  ;;  %v802_v27 = vshrl.u32 %v4491_v11, %v3510_v21 }
  0xfe   : > { %3114 = vset.pattern.permute.xlu0 %v3204_v31  ;;  %v574_v22 = vsel %vm3003_vm6, 0, %v3002_v48  ;;  %v409_v55 = vadd.s32 536870912, %v408_v60  ;;  %v799_v29 = vshrl.u32 %v4493_v8, %v3510_v21  ;;  %v804_v3 = vshll.u32 %v4491_v11, %v789_v17 }
  0xff   : > { %v579_v19 = vsub.s32 4294967266, %v574_v22  ;;  %v805_v61 = vshrl.u32 %v4489_v14, %v3510_v21  ;;  %v575_v42 = vsub.s32 32, %v574_v22  ;;  %v794_v43 = vor.u32 %v793_v23, %v792_v30 }
 0x100   : > { %v3527_v40 = vshrl.u32 %v409_v55, 30  ;;  %v3532_v45 = vor.u32 %v796_v24, %v795_v26  ;;  %v803_v50 = vor.u32 %v802_v27, %v801_v35  ;;  %v3535_v49 = vor.u32 %v799_v29, %v798_v33 }
 0x101   : > { %v580_v36 = vadd.s32 127, %v579_v19  ;;  %v806_v57 = vor.u32 %v805_v61, %v804_v3  ;;  %vm807_vm7 = vcmp.lt.s32.totalorder %v3519_v28, 1  ;;  %vm810_vm8 = vcmp.lt.s32.totalorder %v3519_v28, 4  ;;  %v3573_v19 = vpop.trf.xlu0 }
 0x102   : > { %v411_v54 = vshll.u32 %v3527_v40, 30  ;;  %v576_v52 = vshll.u32 %v3493_v56, %v574_v22  ;;  %v577_v62 = vshrl.u32 %v559_v58, %v575_v42  ;;  %v815_v46 = vsel %vm807_vm7, %v794_v43, %v3532_v45 }
 0x103   : > { %v581_v0 = vshll.u32 %v580_v36, 23  ;;  %v816_v34 = vsel %vm810_vm8, %v803_v50, 920167782  ;;  %vm809_vm10 = vcmp.lt.s32.totalorder %v3519_v28, 3  ;;  %v819_v47 = vsel %vm807_vm7, %v3532_v45, %v3535_v49 }
 0x104   : > { %v3539_v2 = vsub.s32 %v408_v60, %v411_v54  ;;  %vm808_vm11 = vcmp.lt.s32.totalorder %v3519_v28, 2  ;;  %v817_v9 = vsel %vm809_vm10, %v3535_v49, %v816_v34  ;;  %v820_v12 = vsel %vm810_vm8, %v806_v57, 1326507024 }
 0x105   : > { %v582_v56 = vor.u32 4788187, %v581_v0  ;;  %v818_v15 = vsel %vm808_vm11, %v815_v46, %v817_v9  ;;  %v821_v16 = vsel %vm809_vm10, %v803_v50, %v820_v12  ;;  %v578_v17 = vor.u32 %v577_v62, %v576_v52 }
 0x106   : > { %vm413_vm9 = vcmp.lt.s32.totalorder %v3539_v2, 0  ;;  %v414_v44 = vsub.s32 0, %v3539_v2  ;;  %v822_v48 = vsel %vm808_vm11, %v819_v47, %v821_v16  ;;  %v849_v20 = vshrl.u32 %v818_v15, 16 }
 0x107   : > { %v824_v59 = vand.u32 65535, %v3543_v6  ;;  %v825_v60 = vshrl.u32 %v3543_v6, 16  ;;  %v826_v53 = vand.u32 65535, %v822_v48  ;;  %v827_v22 = vshrl.u32 %v822_v48, 16 }
 0x108   : > { %v415_v13 = vsel %vm413_vm9, %v414_v44, %v3539_v2  ;;  %v583_v23 = vand.u32 2147483647, %v582_v56  ;;  %v848_v27 = vand.u32 65535, %v818_v15  ;;  %v404_v55 = vadd.s32 %v3500_v7, %v3503_v10 }
 0x109   : > { %v416_v18 = vclz %v415_v13  ;;  %v829_v29 = vmul.u32 %v827_v22, %v824_v59  ;;  %v830_v30 = vmul.u32 %v826_v53, %v825_v60  ;;  %v585_v26 = vcvt.s32.f32 %v578_v17 }
 0x10a   : > { %v791_v33 = vshrl.u32 %v4495_v63, %v3510_v21  ;;  %v851_v35 = vmul.u32 %v849_v20, %v824_v59  ;;  %v828_v3 = vmul.u32 %v826_v53, %v824_v59  ;;  %v623_v42 = vand.u32 2139095040, %v3573_v19 }
 0x10b   : > { %v2999_v24 = vadd.s32 4294967294, %v416_v18  ;;  %v832_v61 = vshll.u32 %v829_v29, 16  ;;  %v586_v50 = vmul.f32 %v585_v26, %v583_v23  ;;  %v852_v10 = vmul.u32 %v848_v27, %v825_v60 }
 0x10c   : > { %v811_v7 = vsel %vm807_vm7, %v791_v33, %v794_v43  ;;  %v831_v58 = vmul.u32 %v827_v22, %v825_v60  ;;  %v834_v0 = vshll.u32 %v830_v30, 16  ;;  %v854_v46 = vshll.u32 %v851_v35, 16 }
 0x10d   : > { %vm3000_vm12 = vcmp.lt.s32.totalorder %v2999_v24, 0  ;;  %vm836_vm14 = vc.u32 %v828_v3, %v832_v61  ;;  %v838_v57 = vadd.s32 %v832_v61, %v828_v3  ;;  %v850_v44 = vmul.u32 %v848_v27, %v824_v59 }
 0x10e   : > { %v419_v36 = vsel %vm3000_vm12, 0, %v2999_v24  ;;  %v837_v62 = vsel %vm836_vm14, 1, %v4503_v25  ;;  %v624_v47 = vshrl.u32 %v623_v42, 23  ;;  %v587_v56 = vxor.u32 2147483648, %v586_v50 }
 0x10f   : > { %v424_v54 = vsub.s32 4294967266, %v419_v36  ;;  %v420_v52 = vsub.s32 32, %v419_v36  ;;  %v839_v34 = vadd.s32 %v837_v62, %v831_v58  ;;  %vm840_vm15 = vc.u32 %v838_v57, %v834_v0 }
 0x110   : > { %v812_v43 = vsel %vm810_vm8, %v3535_v49, 2102212464  ;;  %v841_v12 = vsel %vm840_vm15, 1, %v4503_v25  ;;  %v833_v13 = vshrl.u32 %v829_v29, 16  ;;  %v853_v16 = vmul.u32 %v849_v20, %v825_v60 }
 0x111   : > { %v425_v21 = vadd.s32 127, %v424_v54  ;;  %v843_v15 = vadd.s32 %v841_v12, %v839_v34  ;;  %vm858_vm0 = vc.u32 %v850_v44, %v854_v46  ;;  %v422_v17 = vshrl.u32 %v404_v55, %v420_v52 }
 0x112   : > { %v856_v18 = vshll.u32 %v852_v10, 16  ;;  %v859_v48 = vsel %vm858_vm0, 1, %v4503_v25  ;;  %v860_v53 = vadd.s32 %v854_v46, %v850_v44  ;;  %v813_v59 = vsel %vm809_vm10, %v3532_v45, %v812_v43 }
 0x113   : > { %v426_v9 = vshll.u32 %v425_v21, 23  ;;  %v844_v22 = vadd.s32 %v843_v15, %v833_v13  ;;  %v861_v23 = vadd.s32 %v859_v48, %v853_v16  ;;  %v3004_v24 = vadd.s32 4294967169, %v624_v47 }
 0x114   : > { %v588_v49 = vsel %vm467_vm13, %v587_v56, %v586_v50  ;;  %v421_v27 = vshll.u32 %v3539_v2, %v419_v36  ;;  %vm862_vm1 = vc.u32 %v860_v53, %v856_v18  ;;  %v835_v20 = vshrl.u32 %v830_v30, 16 }
 0x115   : > { %v427_v29 = vor.u32 4788187, %v426_v9  ;;  %v863_v60 = vsel %vm862_vm1, 1, %v4503_v25  ;;  %v620_v55 = vand.u32 2147483647, %v3573_v19  ;;  %v630_v26 = vadd.s32 1, %v3004_v24 }
 0x116   : > { %v423_v33 = vor.u32 %v422_v17, %v421_v27  ;;  %v855_v3 = vshrl.u32 %v851_v35, 16  ;;  %v865_v61 = vadd.s32 %v863_v60, %v861_v23  ;;  %v3606_v2 = vsel %vm3599_vm2, %v3333_v37, %v588_v49 }
 0x117   : > { %v814_v30 = vsel %vm808_vm11, %v811_v7, %v813_v59  ;;  %v3610_v36 = vadd.s32 %v844_v22, %v835_v20  ;;  %vm631_vm3 = vcmp.gt.s32.totalorder %v630_v26, 0  ;;  %v428_v42 = vand.u32 2147483647, %v427_v29 }
 0x118   : > { %v857_v50 = vshrl.u32 %v852_v10, 16  ;;  %v866_v39 = vadd.s32 %v865_v61, %v855_v3  ;;  %v632_v54 = vsel %vm631_vm3, %v630_v26, 0  ;;  %v3612_v58 = vadd.s32 %v860_v53, %v856_v18 }
 0x119   : > { %v627_v35 = vand.u32 8388607, %v620_v55  ;;  %v634_v0 = vand.u32 31, %v632_v54  ;;  %v3618_v57 = vmul.f32 %v3606_v2, %v3606_v2  ;;  %v430_v52 = vcvt.s32.f32 %v423_v33 }
 0x11a   : > { %v867_v28 = vadd.s32 %v866_v39, %v857_v50  ;;  %v868_v7 = vmul.u32 %v3543_v6, %v814_v30  ;;  %vm870_vm4 = vc.u32 %v3610_v36, %v3612_v58  ;;  %v3635_v13 = vshrl.u32 %v632_v54, 5 }
 0x11b   : > { %v3623_v10 = vsub.s32 32, %v634_v0  ;;  %v637_v21 = vshll.u32 %v4495_v63, %v634_v0  ;;  %v640_v62 = vshll.u32 %v4501_v1, %v634_v0  ;;  %v431_v46 = vmul.f32 %v430_v52, %v428_v42 }
 0x11c   : > { %v871_v34 = vadd.s32 1, %v867_v28  ;;  %v643_v44 = vshll.u32 %v4499_v5, %v634_v0  ;;  %v646_v47 = vshll.u32 %v4493_v8, %v634_v0  ;;  %v628_v56 = vor.u32 8388608, %v627_v35 }
 0x11d   : > { %v638_v9 = vshrl.u32 %v4501_v1, %v3623_v10  ;;  %v641_v6 = vshrl.u32 %v4499_v5, %v3623_v10  ;;  %v644_v43 = vshrl.u32 %v4493_v8, %v3623_v10  ;;  %v647_v15 = vshrl.u32 %v4491_v11, %v3623_v10 }
 0x11e   : > { %v872_v12 = vsel %vm870_vm4, %v871_v34, %v867_v28  ;;  %v649_v16 = vshll.u32 %v4491_v11, %v634_v0  ;;  %v432_v53 = vxor.u32 2147483648, %v431_v46  ;;  %v650_v23 = vshrl.u32 %v4489_v14, %v3623_v10 }
 0x11f   : > { %v873_v17 = vadd.s32 %v872_v12, %v868_v7  ;;  %v3640_v18 = vor.u32 %v638_v9, %v637_v21  ;;  %v3642_v48 = vor.u32 %v641_v6, %v640_v62  ;;  %v645_v59 = vor.u32 %v644_v43, %v643_v44 }
 0x120   : > { %v648_v22 = vor.u32 %v647_v15, %v646_v47  ;;  %v601_v24 = vmul.f32 -0.00019511016, %v3618_v57  ;;  %vm3649_vm5 = vcmp.le.f32.partialorder %v310_v41, 0.7853982  ;;  %vm312_vm6 = vcmp.lt.s32.totalorder %v3335_v38, 0 }
 0x121   : > { %v874_v27 = vadd.s32 536870912, %v873_v17  ;;  %v651_v29 = vor.u32 %v650_v23, %v649_v16  ;;  %vm652_vm7 = vcmp.lt.s32.totalorder %v3635_v13, 1  ;;  %vm655_vm8 = vcmp.lt.s32.totalorder %v3635_v13, 4 }
 0x122   : > { %v3656_v20 = vshll.u32 %v628_v56, 8  ;;  %vm654_vm9 = vcmp.lt.s32.totalorder %v3635_v13, 3  ;;  %v660_v41 = vsel %vm652_vm7, %v3640_v18, %v3642_v48  ;;  %v661_v26 = vsel %vm655_vm8, %v648_v22, 920167782 }
 0x123   : > { %v3658_v60 = vshrl.u32 %v874_v27, 30  ;;  %v433_v33 = vsel %vm312_vm6, %v432_v53, %v431_v46  ;;  %vm653_vm10 = vcmp.lt.s32.totalorder %v3635_v13, 2  ;;  %v662_v3 = vsel %vm654_vm9, %v645_v59, %v661_v26 }
 0x124   : > { %v664_v61 = vsel %vm652_vm7, %v3642_v48, %v645_v59  ;;  %v602_v30 = vadd.f32 0.008332121, %v601_v24  ;;  %v663_v50 = vsel %vm653_vm10, %v660_v41, %v662_v3  ;;  %v665_v39 = vsel %vm655_vm8, %v651_v29, 1326507024 }
 0x125   : > { %v876_v42 = vshll.u32 %v3658_v60, 30  ;;  %v589_v54 = vsub.s32 4, %v3480_v32  ;;  %v666_v35 = vsel %vm654_vm9, %v648_v22, %v665_v39  ;;  %v669_v0 = vand.u32 65535, %v3656_v20 }
 0x126   : > { %v694_v52 = vshrl.u32 %v663_v50, 16  ;;  %v3687_v28 = vsel %vm3649_vm5, %v3335_v38, %v433_v33  ;;  %v667_v21 = vsel %vm653_vm10, %v664_v61, %v666_v35  ;;  %v693_v62 = vand.u32 65535, %v663_v50  ;;  %v3708_v35 = vpop.trf.xlu1 }
 0x127   : > { %v877_v7 = vsub.s32 %v873_v17, %v876_v42  ;;  %v434_v46 = vsub.s32 4, %v3527_v40  ;;  %v670_v34 = vshrl.u32 %v3656_v20, 16  ;;  %v671_v44 = vand.u32 65535, %v667_v21  ;;  %4514 = vst [vmem:[#allocation8_spill] sm:$0xff] %v3708_v35 }
 0x128   : > { %v672_v47 = vshrl.u32 %v667_v21, 16  ;;  %v3694_v56 = vmul.f32 %v602_v30, %v3618_v57  ;;  %v696_v6 = vmul.u32 %v694_v52, %v669_v0  ;;  %v3698_v43 = vmul.f32 %v3687_v28, %v3687_v28 }
 0x129   : > { %vm878_vm11 = vcmp.lt.s32.totalorder %v877_v7, 0  ;;  %v879_v9 = vsub.s32 0, %v877_v7  ;;  %v869_v12 = vadd.s32 %v3612_v58, %v3610_v36  ;;  %v675_v16 = vmul.u32 %v671_v44, %v670_v34 }
 0x12a   : > { %v674_v15 = vmul.u32 %v672_v47, %v669_v0  ;;  %v636_v53 = vshrl.u32 %v4495_v63, %v3623_v10  ;;  %v657_v22 = vsel %vm655_vm8, %v645_v59, 2102212464  ;;  %v697_v23 = vmul.u32 %v693_v62, %v670_v34 }
 0x12b   : > { %v880_v17 = vsel %vm878_vm11, %v879_v9, %v877_v7  ;;  %v673_v27 = vmul.u32 %v671_v44, %v669_v0  ;;  %v695_v41 = vmul.u32 %v693_v62, %v669_v0  ;;  %v676_v26 = vmul.u32 %v672_v47, %v670_v34 }
 0x12c   : > { %v881_v24 = vclz %v880_v17  ;;  %v677_v29 = vshll.u32 %v674_v15, 16  ;;  %v678_v33 = vshrl.u32 %v674_v15, 16  ;;  %v698_v3 = vmul.u32 %v694_v52, %v670_v34 }
 0x12d   : > { %v699_v61 = vshll.u32 %v696_v6, 16  ;;  %v679_v36 = vshll.u32 %v675_v16, 16  ;;  %v701_v50 = vshll.u32 %v697_v23, 16  ;;  %v680_v44 = vshrl.u32 %v675_v16, 16 }
 0x12e   : > { %v3008_v30 = vadd.s32 4294967294, %v881_v24  ;;  %vm681_vm12 = vc.u32 %v673_v27, %v677_v29  ;;  %v683_v58 = vadd.s32 %v677_v29, %v673_v27  ;;  %v700_v15 = vshrl.u32 %v696_v6, 16 }
 0x12f   : > { %v682_v42 = vsel %vm681_vm12, 1, %v4503_v25  ;;  %vm703_vm14 = vc.u32 %v695_v41, %v699_v61  ;;  %v705_v10 = vadd.s32 %v699_v61, %v695_v41  ;;  %v1088_v24 = vand.u32 2139095040, %v3708_v35 }
 0x130   : > { %vm3009_vm15 = vcmp.lt.s32.totalorder %v3008_v30, 0  ;;  %v684_v59 = vadd.s32 %v682_v42, %v676_v26  ;;  %vm685_vm0 = vc.u32 %v683_v58, %v679_v36  ;;  %v704_v39 = vsel %vm703_vm14, 1, %v4503_v25 }
 0x131   : > { %v884_v0 = vsel %vm3009_vm15, 0, %v3008_v30  ;;  %v686_v52 = vsel %vm685_vm0, 1, %v4503_v25  ;;  %v706_v21 = vadd.s32 %v704_v39, %v698_v3  ;;  %vm707_vm1 = vc.u32 %v705_v10, %v701_v50 }
 0x132   : > { %v885_v62 = vsub.s32 32, %v884_v0  ;;  %v889_v34 = vsub.s32 4294967266, %v884_v0  ;;  %v688_v47 = vadd.s32 %v686_v52, %v684_v59  ;;  %v886_v9 = vshll.u32 %v877_v7, %v884_v0 }
 0x133   : > { %v708_v17 = vsel %vm707_vm1, 1, %v4503_v25  ;;  %v656_v61 = vsel %vm652_vm7, %v636_v53, %v3640_v18  ;;  %v658_v3 = vsel %vm654_vm9, %v3642_v48, %v657_v22  ;;  %v702_v16 = vshrl.u32 %v697_v23, 16 }
 0x134   : > { %v887_v27 = vshrl.u32 %v869_v12, %v885_v62  ;;  %v890_v29 = vadd.s32 127, %v889_v34  ;;  %v689_v41 = vadd.s32 %v688_v47, %v678_v33  ;;  %v710_v26 = vadd.s32 %v708_v17, %v706_v21 }
 0x135   : > { %v1089_v30 = vshrl.u32 %v1088_v24, 23  ;;  %v446_v42 = vmul.f32 -0.00019511016, %v3698_v43  ;;  %v709_v12 = vadd.s32 %v705_v10, %v701_v50  ;;  %v4488_v33 = vand.u32 2147483647, %v3708_v35  ;;  %v3733_v50 = vpop.trf.xlu0 }
 0x136   : > { %v888_v7 = vor.u32 %v887_v27, %v886_v9  ;;  %v891_v6 = vshll.u32 %v890_v29, 23  ;;  %v690_v36 = vadd.s32 %v689_v41, %v680_v44  ;;  %v711_v58 = vadd.s32 %v710_v26, %v700_v15 }
 0x137   : > { %v3013_v59 = vadd.s32 4294967169, %v1089_v30  ;;  %v659_v18 = vsel %vm653_vm10, %v656_v61, %v658_v3  ;;  %v590_v48 = vsel %vm467_vm13, %v589_v54, %v3480_v32  ;;  %v435_v22 = vsel %vm312_vm6, %v434_v46, %v3527_v40 }
 0x138   : > { %v892_v39 = vor.u32 4788187, %v891_v6  ;;  %v712_v53 = vadd.s32 %v711_v58, %v702_v16  ;;  %vm715_vm3 = vc.u32 %v690_v36, %v709_v12  ;;  %v604_v13 = vadd.f32 -0.16666654, %v3694_v56 }
 0x139   : > { %v1095_v23 = vadd.s32 1, %v3013_v59  ;;  %v895_v0 = vcvt.s32.f32 %v888_v7  ;;  %v447_v21 = vadd.f32 0.008332121, %v446_v42  ;;  %v713_v62 = vmul.u32 %v3656_v20, %v659_v18 }
 0x13a   : > { %v893_v10 = vand.u32 2147483647, %v892_v39  ;;  %v716_v52 = vadd.s32 1, %v712_v53  ;;  %v1092_v32 = vand.u32 8388607, %v4488_v33  ;;  %v933_v40 = vand.u32 2139095040, %v3733_v50 }
 0x13b   : > { %vm1096_vm13 = vcmp.gt.s32.totalorder %v1095_v23, 0  ;;  %v3742_v56 = vsel %vm3599_vm2, 0, %v590_v48  ;;  %vm777_vm4 = vcmp.lt.s32.totalorder %v3455_v51, 0  ;;  %v3746_v9 = vmul.f32 %v604_v13, %v3618_v57 }
 0x13c   : > { %v896_v54 = vmul.f32 %v895_v0, %v893_v10  ;;  %v717_v34 = vsel %vm715_vm3, %v716_v52, %v712_v53  ;;  %v1097_v44 = vsel %vm1096_vm13, %v1095_v23, 0  ;;  %v3750_v20 = vsel %vm3649_vm5, 0, %v435_v22 }
 0x13d   : > { %v718_v46 = vadd.s32 %v717_v34, %v713_v62  ;;  %v1099_v47 = vand.u32 31, %v1097_v44  ;;  %vm3754_vm6 = vcmp.le.f32.partialorder %v775_v4, 0.7853982  ;;  %v3759_v45 = vmul.f32 %v447_v21, %v3698_v43  ;;  %v213_v4 = vld [vmem:[%s4485_s2 + $0x18] sm:$0xff] }
 0x13e   : > { %v897_v27 = vxor.u32 2147483648, %v896_v54  ;;  %v1093_v29 = vor.u32 8388608, %v1092_v32  ;;  %v934_v41 = vshrl.u32 %v933_v40, 23  ;;  %1567 = vperm.xlu2 %3112, %v213_v4   ;;  %v3774_v42 = vshrl.u32 %v1097_v44, 5 }
 0x13f   : > { %v719_v17 = vadd.s32 536870912, %v718_v46  ;;  %v1100_v24 = vsub.s32 32, %v1099_v47  ;;  %v1102_v49 = vshll.u32 %v4495_v63, %v1099_v47  ;;  %v1105_v3 = vshll.u32 %v4501_v1, %v1099_v47 }
 0x140   : > { %v1111_v7 = vshll.u32 %v4493_v8, %v1099_v47  ;;  %v1108_v59 = vshll.u32 %v4499_v5, %v1099_v47  ;;  %v1114_v22 = vshll.u32 %v4491_v11, %v1099_v47  ;;  %v898_v23 = vsel %vm777_vm4, %v897_v27, %v896_v54 }
 0x141   : > { %v3761_v26 = vshrl.u32 %v719_v17, 30  ;;  %v1103_v61 = vshrl.u32 %v4501_v1, %v1100_v24  ;;  %v1106_v16 = vshrl.u32 %v4499_v5, %v1100_v24  ;;  %v1109_v30 = vshrl.u32 %v4493_v8, %v1100_v24 }
 0x142   : > { %v1112_v6 = vshrl.u32 %v4491_v11, %v1100_v24  ;;  %v1115_v39 = vshrl.u32 %v4489_v14, %v1100_v24  ;;  %v3781_v0 = vshll.u32 %v1093_v29, 8  ;;  %v714_v52 = vadd.s32 %v709_v12, %v690_v36 }
 0x143   : > { %v721_v58 = vshll.u32 %v3761_v26, 30  ;;  %v1104_v18 = vor.u32 %v1103_v61, %v1102_v49  ;;  %v1107_v53 = vor.u32 %v1106_v16, %v1105_v3  ;;  %v1110_v10 = vor.u32 %v1109_v30, %v1108_v59 }
 0x144   : > { %v1113_v48 = vor.u32 %v1112_v6, %v1111_v7  ;;  %v1116_v21 = vor.u32 %v1115_v39, %v1114_v22  ;;  %v4487_v62 = vand.u32 2147483647, %v3733_v50  ;;  %v3010_v32 = vadd.s32 4294967169, %v934_v41 }
 0x145   : > { %v722_v13 = vsub.s32 %v718_v46, %v721_v58  ;;  %vm1117_vm5 = vcmp.lt.s32.totalorder %v3774_v42, 1  ;;  %vm1120_vm7 = vcmp.lt.s32.totalorder %v3774_v42, 4  ;;  %v3789_v44 = vsel %vm3754_vm6, %v3455_v51, %v898_v23 }
 0x146   : > { %vm1119_vm8 = vcmp.lt.s32.totalorder %v3774_v42, 3  ;;  %v1125_v36 = vsel %vm1117_vm5, %v1104_v18, %v1107_v53  ;;  %v1126_v12 = vsel %vm1120_vm7, %v1113_v48, 920167782  ;;  %vm1118_vm9 = vcmp.lt.s32.totalorder %v3774_v42, 2  ;;  %3113 = vset.pattern.permute.xlu2 %v3204_v31 }
 0x147   : > { %vm723_vm2 = vcmp.lt.s32.totalorder %v722_v13, 0  ;;  %v724_v34 = vsub.s32 0, %v722_v13  ;;  %v1127_v40 = vsel %vm1119_vm8, %v1110_v10, %v1126_v12  ;;  %v1134_v46 = vand.u32 65535, %v3781_v0  ;;  %2844 = vperm.xlu2 %3113, %v213_v4  }
 0x148   : > { %v1128_v17 = vsel %vm1118_vm9, %v1125_v36, %v1127_v40  ;;  %v1129_v27 = vsel %vm1117_vm5, %v1107_v53, %v1110_v10  ;;  %v3806_v29 = vand.u32 8388607, %v4487_v62  ;;  %v3811_v41 = vmul.f32 %v3789_v44, %v3789_v44 }
 0x149   : > { %v725_v54 = vsel %vm723_vm2, %v724_v34, %v722_v13  ;;  %v1130_v49 = vsel %vm1120_vm7, %v1116_v21, 1326507024  ;;  %v1158_v61 = vand.u32 65535, %v1128_v17  ;;  %v1159_v3 = vshrl.u32 %v1128_v17, 16 }
 0x14a   : > { %v726_v47 = vclz %v725_v54  ;;  %v1131_v30 = vsel %vm1119_vm8, %v1113_v48, %v1130_v49  ;;  %v1135_v7 = vshrl.u32 %v3781_v0, 16  ;;  %v940_v6 = vadd.s32 1, %v3010_v32 }
 0x14b   : > { %v1101_v58 = vshrl.u32 %v4495_v63, %v1100_v24  ;;  %v1122_v31 = vsel %vm1120_vm7, %v1110_v10, 2102212464  ;;  %v1132_v59 = vsel %vm1118_vm9, %v1129_v27, %v1131_v30  ;;  %v1161_v39 = vmul.u32 %v1159_v3, %v1134_v46 }
 0x14c   : > { %v3005_v16 = vadd.s32 4294967294, %v726_v47  ;;  %v1136_v22 = vand.u32 65535, %v1132_v59  ;;  %v1137_v23 = vshrl.u32 %v1132_v59, 16  ;;  %v3825_v21 = vmul.f32 -0.00019511016, %v3811_v41 }
 0x14d   : > { %v1121_v32 = vsel %vm1117_vm5, %v1101_v58, %v1104_v18  ;;  %v1162_v24 = vmul.u32 %v1158_v61, %v1135_v7  ;;  %v1123_v10 = vsel %vm1119_vm8, %v1107_v53, %v1122_v31  ;;  %v1164_v12 = vshll.u32 %v1161_v39, 16 }
 0x14e   : > { %vm3006_vm10 = vcmp.lt.s32.totalorder %v3005_v16, 0  ;;  %v1139_v54 = vmul.u32 %v1137_v23, %v1134_v46  ;;  %v1140_v40 = vmul.u32 %v1136_v22, %v1135_v7  ;;  %v1160_v47 = vmul.u32 %v1158_v61, %v1134_v46 }
 0x14f   : > { %v729_v48 = vsel %vm3006_vm10, 0, %v3005_v16  ;;  %vm941_vm11 = vcmp.gt.s32.totalorder %v940_v6, 0  ;;  %v1163_v30 = vmul.u32 %v1159_v3, %v1135_v7  ;;  %v1138_v59 = vmul.u32 %v1136_v22, %v1134_v46 }
 0x150   : > { %v730_v34 = vsub.s32 32, %v729_v48  ;;  %v734_v36 = vsub.s32 4294967266, %v729_v48  ;;  %v731_v17 = vshll.u32 %v722_v13, %v729_v48  ;;  %v1141_v16 = vmul.u32 %v1137_v23, %v1135_v7 }
 0x151   : > { %v1142_v62 = vshll.u32 %v1139_v54, 16  ;;  %v1166_v33 = vshll.u32 %v1162_v24, 16  ;;  %vm1168_vm12 = vc.u32 %v1160_v47, %v1164_v12  ;;  %v1170_v4 = vadd.s32 %v1164_v12, %v1160_v47 }
 0x152   : > { %v732_v27 = vshrl.u32 %v714_v52, %v730_v34  ;;  %v735_v49 = vadd.s32 127, %v734_v36  ;;  %v1144_v14 = vshll.u32 %v1140_v40, 16  ;;  %v1169_v31 = vsel %vm1168_vm12, 1, %v4503_v25 }
 0x153   : > { %vm1146_vm14 = vc.u32 %v1138_v59, %v1142_v62  ;;  %v1148_v53 = vadd.s32 %v1142_v62, %v1138_v59  ;;  %v1171_v13 = vadd.s32 %v1169_v31, %v1163_v30  ;;  %v942_v52 = vsel %vm941_vm11, %v940_v6, 0 }
 0x154   : > { %v733_v18 = vor.u32 %v732_v27, %v731_v17  ;;  %v736_v58 = vshll.u32 %v735_v49, 23  ;;  %v1147_v61 = vsel %vm1146_vm14, 1, %v4503_v25  ;;  %vm622_vm15 = vcmp.lt.s32.totalorder %v3573_v19, 0 }
 0x155   : > { %v1149_v46 = vadd.s32 %v1147_v61, %v1141_v16  ;;  %vm1150_vm0 = vc.u32 %v1148_v53, %v1144_v14  ;;  %v1165_v3 = vshrl.u32 %v1161_v39, 16  ;;  %vm1172_vm1 = vc.u32 %v1170_v4, %v1166_v33 }
 0x156   : > { %v737_v11 = vor.u32 4788187, %v736_v58  ;;  %v740_v22 = vcvt.s32.f32 %v733_v18  ;;  %v1151_v23 = vsel %vm1150_vm0, 1, %v4503_v25  ;;  %v1173_v62 = vsel %vm1172_vm1, 1, %v4503_v25 }
 0x157   : > { %v1143_v48 = vshrl.u32 %v1139_v54, 16  ;;  %v1153_v34 = vadd.s32 %v1151_v23, %v1149_v46  ;;  %v1175_v36 = vadd.s32 %v1173_v62, %v1171_v13  ;;  %v944_v12 = vand.u32 31, %v942_v52 }
 0x158   : > { %v738_v7 = vand.u32 2147483647, %v737_v11  ;;  %v1124_v6 = vsel %vm1118_vm9, %v1121_v32, %v1123_v10  ;;  %v1145_v17 = vshrl.u32 %v1140_v40, 16  ;;  %v1167_v27 = vshrl.u32 %v1162_v24, 16 }
 0x159   : > { %vm3841_vm3 = vcmp.le.f32.partialorder %v620_v55, 0.7853982  ;;  %v1154_v11 = vadd.s32 %v1153_v34, %v1143_v48  ;;  %v3845_v39 = vadd.s32 %v1170_v4, %v1166_v33  ;;  %v1176_v49 = vadd.s32 %v1175_v36, %v1165_v3 }
 0x15a   : > { %v741_v47 = vmul.f32 %v740_v22, %v738_v7  ;;  %v945_v54 = vsub.s32 32, %v944_v12  ;;  %v947_v59 = vshll.u32 %v4495_v63, %v944_v12  ;;  %v950_v16 = vshll.u32 %v4501_v1, %v944_v12 }
 0x15b   : > { %v953_v42 = vshll.u32 %v4499_v5, %v944_v12  ;;  %v1155_v32 = vadd.s32 %v1154_v11, %v1145_v17  ;;  %v1177_v24 = vadd.s32 %v1176_v49, %v1167_v27  ;;  %v956_v55 = vshll.u32 %v4493_v8, %v944_v12 }
 0x15c   : > { %v742_v30 = vxor.u32 2147483648, %v741_v47  ;;  %v948_v10 = vshrl.u32 %v4501_v1, %v945_v54  ;;  %v3852_v40 = vshrl.u32 %v942_v52, 5  ;;  %v951_v33 = vshrl.u32 %v4499_v5, %v945_v54 }
 0x15d   : > { %v954_v4 = vshrl.u32 %v4493_v8, %v945_v54  ;;  %v4519_v18 = vmov 920167782   ;;  %v912_v53 = vadd.f32 0.008332121, %v3825_v21  ;;  %v1178_v31 = vmul.u32 %v3781_v0, %v1124_v6 }
 0x15e   : > { %v957_v58 = vshrl.u32 %v4519_v18, %v945_v54  ;;  %vm1180_vm13 = vc.u32 %v1155_v32, %v3845_v39  ;;  %v1181_v61 = vadd.s32 1, %v1177_v24  ;;  %v743_v13 = vsel %vm622_vm15, %v742_v30, %v741_v47 }
 0x15f   : > { %v949_v46 = vor.u32 %v948_v10, %v947_v59  ;;  %v3862_v3 = vor.u32 %v951_v33, %v950_v16  ;;  %v955_v52 = vor.u32 %v954_v4, %v953_v42  ;;  %v959_v23 = vshll.u32 %v4519_v18, %v944_v12 }
 0x160   : > { %v1182_v7 = vsel %vm1180_vm13, %v1181_v61, %v1177_v24  ;;  %v958_v22 = vor.u32 %v957_v58, %v956_v55  ;;  %v4520_v62 = vmov 1326507024   ;;  %vm962_vm2 = vcmp.lt.s32.totalorder %v3852_v40, 1 }
 0x161   : > { %v960_v48 = vshrl.u32 %v4520_v62, %v945_v54  ;;  %v1183_v34 = vadd.s32 %v1182_v7, %v1178_v31  ;;  %vm965_vm5 = vcmp.lt.s32.totalorder %v3852_v40, 4  ;;  %v4521_v0 = vor.u32 8388608, %v3806_v29 }
 0x162   : > { %vm964_vm7 = vcmp.lt.s32.totalorder %v3852_v40, 3  ;;  %v970_v47 = vsel %vm962_vm2, %v949_v46, %v3862_v3  ;;  %v971_v12 = vsel %vm965_vm5, %v958_v22, 920167782  ;;  %v3881_v6 = vsel %vm3841_vm3, %v3573_v19, %v743_v13 }
 0x163   : > { %v3870_v21 = vshll.u32 %v4521_v0, 8  ;;  %v961_v36 = vor.u32 %v960_v48, %v959_v23  ;;  %v1184_v17 = vadd.s32 536870912, %v1183_v34  ;;  %vm963_vm8 = vcmp.lt.s32.totalorder %v3852_v40, 2 }
 0x164   : > { %v972_v29 = vsel %vm964_vm7, %v955_v52, %v971_v12  ;;  %v606_v27 = vadd.f32 1.0, %v3746_v9  ;;  %v974_v49 = vsel %vm962_vm2, %v3862_v3, %v955_v52  ;;  %v449_v59 = vadd.f32 -0.16666654, %v3759_v45 }
 0x165   : > { %v973_v11 = vsel %vm963_vm8, %v970_v47, %v972_v29  ;;  %v975_v30 = vsel %vm965_vm5, %v961_v36, 1326507024  ;;  %v913_v16 = vmul.f32 %v912_v53, %v3811_v41  ;;  %v3896_v42 = vshrl.u32 %v1184_v17, 30 }
 0x166   : > { %v976_v24 = vsel %vm964_vm7, %v958_v22, %v975_v30  ;;  %v3902_v9 = vmul.f32 %v3881_v6, %v3881_v6  ;;  %v946_v10 = vshrl.u32 %v4495_v63, %v945_v54  ;;  %v1004_v33 = vshrl.u32 %v973_v11, 16 }
 0x167   : > { %v977_v55 = vsel %vm963_vm8, %v974_v49, %v976_v24  ;;  %v1186_v4 = vshll.u32 %v3896_v42, 30  ;;  %v979_v45 = vand.u32 65535, %v3870_v21  ;;  %v1003_v53 = vand.u32 65535, %v973_v11 }
 0x168   : > { %v981_v58 = vand.u32 65535, %v977_v55  ;;  %v3910_v31 = vmul.f32 %v606_v27, %v3606_v2  ;;  %v899_v61 = vsub.s32 4, %v3658_v60  ;;  %v980_v13 = vshrl.u32 %v3870_v21, 16 }
 0x169   : > { %v982_v7 = vshrl.u32 %v977_v55, 16  ;;  %v3915_v54 = vmul.f32 %v449_v59, %v3698_v43  ;;  %v914_v22 = vadd.f32 -0.16666654, %v913_v16  ;;  %v1187_v23 = vsub.s32 %v1183_v34, %v1186_v4 }
 0x16a   : > { %v1006_v48 = vmul.u32 %v1004_v33, %v979_v45  ;;  %v756_v0 = vmul.f32 -0.00019511016, %v3902_v9  ;;  %v1179_v36 = vadd.s32 %v3845_v39, %v1155_v32  ;;  %v985_v12 = vmul.u32 %v981_v58, %v980_v13 }
 0x16b   : > { %v984_v47 = vmul.u32 %v982_v7, %v979_v45  ;;  %vm1188_vm9 = vcmp.lt.s32.totalorder %v1187_v23, 0  ;;  %v1189_v2 = vsub.s32 0, %v1187_v23  ;;  %v966_v17 = vsel %vm962_vm2, %v946_v10, %v949_v46 }
 0x16c   : > { %v1007_v29 = vmul.u32 %v1003_v53, %v980_v13  ;;  %v967_v27 = vsel %vm965_vm5, %v955_v52, 2102212464  ;;  %v983_v11 = vmul.u32 %v981_v58, %v979_v45  ;;  %v1005_v30 = vmul.u32 %v1003_v53, %v979_v45 }
 0x16d   : > { %v987_v49 = vshll.u32 %v984_v47, 16  ;;  %v1190_v34 = vsel %vm1188_vm9, %v1189_v2, %v1187_v23  ;;  %v986_v59 = vmul.u32 %v982_v7, %v980_v13  ;;  %v1008_v16 = vmul.u32 %v1004_v33, %v980_v13  ;;  %v3927_v2 = vpop.trf.xlu1 }
 0x16e   : > { %v1009_v24 = vshll.u32 %v1006_v48, 16  ;;  %v1191_v55 = vclz %v1190_v34  ;;  %v989_v39 = vshll.u32 %v985_v12, 16  ;;  %v1011_v8 = vshll.u32 %v1007_v29, 16 }
 0x16f   : > { %vm991_vm10 = vc.u32 %v983_v11, %v987_v49  ;;  %v993_v32 = vadd.s32 %v987_v49, %v983_v11  ;;  %v757_v58 = vadd.f32 0.008332121, %v756_v0  ;;  %v988_v33 = vshrl.u32 %v984_v47, 16 }
 0x170   : > { %v992_v4 = vsel %vm991_vm10, 1, %v4503_v25  ;;  %vm1013_vm11 = vc.u32 %v1005_v30, %v1009_v24  ;;  %v1015_v46 = vadd.s32 %v1009_v24, %v1005_v30  ;;  %v3014_v10 = vadd.s32 4294967294, %v1191_v55 }
 0x171   : > { %v994_v63 = vadd.s32 %v992_v4, %v986_v59  ;;  %vm995_vm12 = vc.u32 %v993_v32, %v989_v39  ;;  %v1014_v52 = vsel %vm1013_vm11, 1, %v4503_v25  ;;  %v968_v49 = vsel %vm964_vm7, %v3862_v3, %v967_v27 }
 0x172   : > { %v996_v45 = vsel %vm995_vm12, 1, %v4503_v25  ;;  %v1016_v53 = vadd.s32 %v1014_v52, %v1008_v16  ;;  %vm1017_vm14 = vc.u32 %v1015_v46, %v1011_v8  ;;  %vm3015_vm0 = vcmp.lt.s32.totalorder %v3014_v10, 0 }
 0x173   : > { %v998_v13 = vadd.s32 %v996_v45, %v994_v63  ;;  %v1018_v7 = vsel %vm1017_vm14, 1, %v4503_v25  ;;  %v1194_v11 = vsel %vm3015_vm0, 0, %v3014_v10  ;;  %v1010_v30 = vshrl.u32 %v1006_v48, 16 }
 0x174   : > { %v1020_v34 = vadd.s32 %v1018_v7, %v1016_v53  ;;  %v1195_v59 = vsub.s32 32, %v1194_v11  ;;  %v1199_v0 = vsub.s32 4294967266, %v1194_v11  ;;  %v990_v24 = vshrl.u32 %v985_v12, 16 }
 0x175   : > { %v999_v55 = vadd.s32 %v998_v13, %v988_v33  ;;  %v1012_v16 = vshrl.u32 %v1007_v29, 16  ;;  %v3932_v39 = vadd.s32 %v1015_v46, %v1011_v8  ;;  %v1398_v63 = vand.u32 2139095040, %v3927_v2 }
 0x176   : > { %v1021_v47 = vadd.s32 %v1020_v34, %v1010_v30  ;;  %v1196_v32 = vshll.u32 %v1187_v23, %v1194_v11  ;;  %v1197_v4 = vshrl.u32 %v1179_v36, %v1195_v59  ;;  %v1200_v52 = vadd.s32 127, %v1199_v0 }
 0x177   : > { %v3935_v10 = vadd.s32 %v999_v55, %v990_v24  ;;  %v744_v45 = vsub.s32 4, %v3761_v26  ;;  %v969_v3 = vsel %vm963_vm8, %v966_v17, %v968_v49  ;;  %v1399_v27 = vshrl.u32 %v1398_v63, 23  ;;  %v3971_v63 = vpop.trf.xlu0 }
 0x178   : > { %v1022_v48 = vadd.s32 %v1021_v47, %v1012_v16  ;;  %v915_v12 = vmul.f32 %v914_v22, %v3811_v41  ;;  %v1198_v29 = vor.u32 %v1197_v4, %v1196_v32  ;;  %v1201_v8 = vshll.u32 %v1200_v52, 23 }
 0x179   : > { %vm1025_vm1 = vc.u32 %v3935_v10, %v3932_v39  ;;  %v758_v23 = vmul.f32 %v757_v58, %v3902_v9  ;;  %v1209_v36 = vsub.s32 4, %v3896_v42  ;;  %v3019_v53 = vadd.s32 4294967169, %v1399_v27 }
 0x17a   : > { %v1026_v46 = vadd.s32 1, %v1022_v48  ;;  %v900_v40 = vsel %vm777_vm4, %v899_v61, %v3658_v60  ;;  %v1202_v17 = vor.u32 4788187, %v1201_v8  ;;  %v1023_v22 = vmul.u32 %v3870_v21, %v969_v3 }
 0x17b   : > { %v4498_v33 = vand.u32 2147483647, %v3927_v2  ;;  %v451_v13 = vadd.f32 1.0, %v3915_v54  ;;  %vm1087_vm13 = vcmp.lt.s32.totalorder %v3708_v35, 0  ;;  %v1405_v7 = vadd.s32 1, %v3019_v53 }
 0x17c   : > { %v1027_v58 = vsel %vm1025_vm1, %v1026_v46, %v1022_v48  ;;  %v916_v11 = vadd.f32 1.0, %v915_v12  ;;  %v1203_v49 = vand.u32 2147483647, %v1202_v17  ;;  %v1205_v30 = vcvt.s32.f32 %v1198_v29 }
 0x17d   : > { %v1028_v34 = vadd.s32 %v1027_v58, %v1023_v22  ;;  %v745_v59 = vsel %vm622_vm15, %v744_v45, %v3761_v26  ;;  %v759_v60 = vadd.f32 -0.16666654, %v758_v23  ;;  %v1210_v21 = vsel %vm1087_vm13, %v1209_v36, %v3896_v42 }
 0x17e   : > { %vm1406_vm4 = vcmp.gt.s32.totalorder %v1405_v7, 0  ;;  %v1206_v61 = vmul.f32 %v1205_v30, %v1203_v49  ;;  %v1402_v0 = vand.u32 8388607, %v4498_v33  ;;  %v3963_v55 = vmul.f32 %v451_v13, %v3687_v28 }
 0x17f   : > { %v1029_v54 = vadd.s32 536870912, %v1028_v34  ;;  %v1407_v24 = vsel %vm1406_vm4, %v1405_v7, 0  ;;  %v3967_v16 = vsel %vm3754_vm6, 0, %v900_v40  ;;  %v4522_v26 = vand.u32 2147483647, %v3708_v35 }
 0x180   : > { %v1409_v47 = vand.u32 31, %v1407_v24  ;;  %v3974_v42 = vmul.f32 %v916_v11, %v3789_v44  ;;  %v3978_v32 = vsel %vm3841_vm3, 0, %v745_v59  ;;  %v1207_v4 = vxor.u32 2147483648, %v1206_v61 }
 0x181   : > { %vm1086_vm15 = vcmp.le.f32.partialorder %v4522_v26, 0.7853982  ;;  %v3980_v28 = vshrl.u32 %v1029_v54, 30  ;;  %v3983_v15 = vmul.f32 %v759_v60, %v3902_v9  ;;  %v4497_v3 = vand.u32 2147483647, %v3971_v63 }
 0x182   : > { %v3985_v52 = vsel %vm1086_vm15, 0, %v1210_v21  ;;  %v1410_v45 = vsub.s32 32, %v1409_v47  ;;  %v1208_v48 = vsel %vm1087_vm13, %v1207_v4, %v1206_v61  ;;  %v1403_v27 = vor.u32 8388608, %v1402_v0 }
 0x183   : > { %4523 = vst [vmem:[#allocation9_spill] sm:$0xff] %v3985_v52  ;;  %v1031_v44 = vshll.u32 %v3980_v28, 30  ;;  %v1243_v14 = vand.u32 2139095040, %v3971_v63  ;;  %v3993_v12 = vsel %vm1086_vm15, %v3708_v35, %v1208_v48  ;;  %v3995_v29 = vshrl.u32 %v1407_v24, 5 }
 0x184   : > { %v1413_v8 = vshrl.u32 %v4501_v1, %v1410_v45  ;;  %v1416_v23 = vshrl.u32 %v4499_v5, %v1410_v45  ;;  %v4524_v46 = vmov 683565275   ;;  %v1415_v40 = vshll.u32 %v4501_v1, %v1409_v47 }
 0x185   : > { %v1032_v36 = vsub.s32 %v1028_v34, %v1031_v44  ;;  %v1412_v53 = vshll.u32 %v4524_v46, %v1409_v47  ;;  %v4525_v17 = vmov 2102212464   ;;  %v4004_v13 = vmul.f32 %v3993_v12, %v3993_v12 }
 0x186   : > { %v1419_v22 = vshrl.u32 %v4525_v17, %v1410_v45  ;;  %v1418_v58 = vshll.u32 %v4499_v5, %v1409_v47  ;;  %v1421_v7 = vshll.u32 %v4525_v17, %v1409_v47  ;;  %v1422_v11 = vshrl.u32 %v4519_v18, %v1410_v45 }
 0x187   : > { %vm1033_vm6 = vcmp.lt.s32.totalorder %v1032_v36, 0  ;;  %v1034_v49 = vsub.s32 0, %v1032_v36  ;;  %v1414_v30 = vor.u32 %v1413_v8, %v1412_v53  ;;  %v4009_v34 = vor.u32 %v1416_v23, %v1415_v40 }
 0x188   : > { %v1420_v59 = vor.u32 %v1419_v22, %v1418_v58  ;;  %v1423_v60 = vor.u32 %v1422_v11, %v1421_v7  ;;  %v1424_v21 = vshll.u32 %v4519_v18, %v1409_v47  ;;  %v1425_v61 = vshrl.u32 %v4520_v62, %v1410_v45 }
 0x189   : > { %v1024_v54 = vadd.s32 %v3932_v39, %v3935_v10  ;;  %v1035_v0 = vsel %vm1033_vm6, %v1034_v49, %v1032_v36  ;;  %v4015_v24 = vshll.u32 %v1403_v27, 8  ;;  %v1244_v26 = vshrl.u32 %v1243_v14, 23 }
 0x18a   : > { %v1036_v4 = vclz %v1035_v0  ;;  %v1426_v48 = vor.u32 %v1425_v61, %v1424_v21  ;;  %vm1427_vm3 = vcmp.lt.s32.totalorder %v3995_v29, 1  ;;  %vm1430_vm2 = vcmp.lt.s32.totalorder %v3995_v29, 4 }
 0x18b   : > { %v1221_v44 = vmul.f32 -0.00019511016, %v4004_v13  ;;  %vm1429_vm5 = vcmp.lt.s32.totalorder %v3995_v29, 3  ;;  %v1435_v47 = vsel %vm1427_vm3, %v1414_v30, %v4009_v34  ;;  %v1436_v39 = vsel %vm1430_vm2, %v1423_v60, 920167782 }
 0x18c   : > { %v3011_v10 = vadd.s32 4294967294, %v1036_v4  ;;  %vm1428_vm7 = vcmp.lt.s32.totalorder %v3995_v29, 2  ;;  %v1437_v27 = vsel %vm1429_vm5, %v1420_v59, %v1436_v39  ;;  %v1439_v14 = vsel %vm1427_vm3, %v4009_v34, %v1420_v59 }
 0x18d   : > { %v1438_v8 = vsel %vm1428_vm7, %v1435_v47, %v1437_v27  ;;  %v1440_v23 = vsel %vm1430_vm2, %v1426_v48, 1326507024  ;;  %v3016_v53 = vadd.s32 4294967169, %v1244_v26  ;;  %v4038_v40 = vand.u32 8388607, %v4497_v3 }
 0x18e   : > { %vm3012_vm8 = vcmp.lt.s32.totalorder %v3011_v10, 0  ;;  %v1441_v22 = vsel %vm1429_vm5, %v1423_v60, %v1440_v23  ;;  %v1444_v58 = vand.u32 65535, %v4015_v24  ;;  %v1469_v7 = vshrl.u32 %v1438_v8, 16 }
 0x18f   : > { %v1222_v11 = vadd.f32 0.008332121, %v1221_v44  ;;  %v1039_v49 = vsel %vm3012_vm8, 0, %v3011_v10  ;;  %v1442_v21 = vsel %vm1428_vm7, %v1439_v14, %v1441_v22  ;;  %v1468_v61 = vand.u32 65535, %v1438_v8 }
 0x190   : > { %v1040_v0 = vsub.s32 32, %v1039_v49  ;;  %v1044_v4 = vsub.s32 4294967266, %v1039_v49  ;;  %v1445_v26 = vshrl.u32 %v4015_v24, 16  ;;  %v1446_v48 = vand.u32 65535, %v1442_v21 }
 0x191   : > { %v1411_v47 = vshrl.u32 %v4524_v46, %v1410_v45  ;;  %v1447_v39 = vshrl.u32 %v1442_v21, 16  ;;  %v1471_v27 = vmul.u32 %v1469_v7, %v1444_v58  ;;  %v1250_v3 = vadd.s32 1, %v3016_v53 }
 0x192   : > { %v1041_v60 = vshll.u32 %v1032_v36, %v1039_v49  ;;  %v1042_v23 = vshrl.u32 %v1024_v54, %v1040_v0  ;;  %v1045_v33 = vadd.s32 127, %v1044_v4  ;;  %v1450_v5 = vmul.u32 %v1446_v48, %v1445_v26 }
 0x193   : > { %v1223_v44 = vmul.f32 %v1222_v11, %v4004_v13  ;;  %v1431_v10 = vsel %vm1427_vm3, %v1411_v47, %v1414_v30  ;;  %v1449_v14 = vmul.u32 %v1447_v39, %v1444_v58  ;;  %v1472_v8 = vmul.u32 %v1468_v61, %v1445_v26 }
 0x194   : > { %v1043_v22 = vor.u32 %v1042_v23, %v1041_v60  ;;  %v1046_v1 = vshll.u32 %v1045_v33, 23  ;;  %v1432_v25 = vsel %vm1430_vm2, %v1420_v59, 2102212464  ;;  %v1470_v45 = vmul.u32 %v1468_v61, %v1444_v58 }
 0x195   : > { %vm932_vm9 = vcmp.lt.s32.totalorder %v3733_v50, 0  ;;  %v1448_v53 = vmul.u32 %v1446_v48, %v1444_v58  ;;  %v1451_v36 = vmul.u32 %v1447_v39, %v1445_v26  ;;  %v1452_v54 = vshll.u32 %v1449_v14, 16 }
 0x196   : > { %v1474_v49 = vshll.u32 %v1471_v27, 16  ;;  %v1047_v21 = vor.u32 4788187, %v1046_v1  ;;  %v1050_v0 = vcvt.s32.f32 %v1043_v22  ;;  %v1454_v11 = vshll.u32 %v1450_v5, 16 }
 0x197   : > { %v1473_v4 = vmul.u32 %v1469_v7, %v1445_v26  ;;  %vm1456_vm10 = vc.u32 %v1448_v53, %v1452_v54  ;;  %v1458_v30 = vadd.s32 %v1452_v54, %v1448_v53  ;;  %v1476_v47 = vshll.u32 %v1472_v8, 16 }
 0x198   : > { %vm1478_vm11 = vc.u32 %v1470_v45, %v1474_v49  ;;  %v4526_v33 = vand.u32 2147483647, %v3733_v50  ;;  %v1048_v59 = vand.u32 2147483647, %v1047_v21  ;;  %v4529_v61 = vmov 0  }
 0x199   : > { %v1457_v58 = vsel %vm1456_vm10, 1, %v4529_v61  ;;  %v1479_v48 = vsel %vm1478_vm11, 1, %v4529_v61  ;;  %v1480_v39 = vadd.s32 %v1474_v49, %v1470_v45  ;;  %vm1460_vm14 = vc.u32 %v1458_v30, %v1454_v11 }
 0x19a   : > { %vm4055_vm12 = vcmp.le.f32.partialorder %v4526_v33, 0.7853982  ;;  %v1459_v1 = vadd.s32 %v1457_v58, %v1451_v36  ;;  %v1481_v23 = vadd.s32 %v1479_v48, %v1473_v4  ;;  %vm1251_vm0 = vcmp.gt.s32.totalorder %v1250_v3, 0 }
 0x19b   : > { %v1051_v7 = vmul.f32 %v1050_v0, %v1048_v59  ;;  %v1433_v26 = vsel %vm1429_vm5, %v4009_v34, %v1432_v25  ;;  %v1461_v22 = vsel %vm1460_vm14, 1, %v4529_v61  ;;  %vm1482_vm1 = vc.u32 %v1480_v39, %v1476_v47 }
 0x19c   : > { %v1453_v53 = vshrl.u32 %v1449_v14, 16  ;;  %v1463_v54 = vadd.s32 %v1461_v22, %v1459_v1  ;;  %v1483_v21 = vsel %vm1482_vm1, 1, %v4529_v61  ;;  %v1252_v33 = vsel %vm1251_vm0, %v1250_v3, 0 }
 0x19d   : > { %v1052_v35 = vxor.u32 2147483648, %v1051_v7  ;;  %v1475_v52 = vshrl.u32 %v1471_v27, 16  ;;  %v1485_v45 = vadd.s32 %v1483_v21, %v1481_v23  ;;  %v1254_v36 = vand.u32 31, %v1252_v33 }
 0x19e   : > { %v1434_v49 = vsel %vm1428_vm7, %v1431_v10, %v1433_v26  ;;  %v1455_v0 = vshrl.u32 %v1450_v5, 16  ;;  %v1464_v11 = vadd.s32 %v1463_v54, %v1453_v53  ;;  %v1248_v4 = vor.u32 8388608, %v4038_v40 }
 0x19f   : > { %v1053_v25 = vsel %vm932_vm9, %v1052_v35, %v1051_v7  ;;  %v1477_v34 = vshrl.u32 %v1472_v8, 16  ;;  %v1486_v14 = vadd.s32 %v1485_v45, %v1475_v52  ;;  %v1255_v30 = vsub.s32 32, %v1254_v36 }
 0x1a0   : > { %v1465_v59 = vadd.s32 %v1464_v11, %v1455_v0  ;;  %v1484_v58 = vadd.s32 %v1480_v39, %v1476_v47  ;;  %v1257_v3 = vshll.u32 %v4524_v46, %v1254_v36  ;;  %v4530_v27 = vmov 2475754826  }
 0x1a1   : > { %v1260_v48 = vshll.u32 %v4530_v27, %v1254_v36  ;;  %v1224_v1 = vadd.f32 -0.16666654, %v1223_v44  ;;  %v1487_v23 = vadd.s32 %v1486_v14, %v1477_v34  ;;  %v1258_v29 = vshrl.u32 %v4530_v27, %v1255_v30 }
 0x1a2   : > { %v4531_v5 = vmov 2131351028   ;;  %v4078_v40 = vsel %vm4055_vm12, %v3733_v50, %v1053_v25  ;;  %vm1490_vm13 = vc.u32 %v1465_v59, %v1484_v58  ;;  %v1264_v52 = vshrl.u32 %v4525_v17, %v1255_v30 }
 0x1a3   : > { %v1263_v10 = vshll.u32 %v4531_v5, %v1254_v36  ;;  %v1261_v35 = vshrl.u32 %v4531_v5, %v1255_v30  ;;  %v1488_v8 = vmul.u32 %v4015_v24, %v1434_v49  ;;  %v1491_v47 = vadd.s32 1, %v1487_v23 }
 0x1a4   : > { %v4083_v39 = vshrl.u32 %v1252_v33, 5  ;;  %v1266_v44 = vshll.u32 %v4525_v17, %v1254_v36  ;;  %v1259_v7 = vor.u32 %v1258_v29, %v1257_v3  ;;  %v1267_v22 = vshrl.u32 %v4519_v18, %v1255_v30 }
 0x1a5   : > { %v4086_v26 = vor.u32 %v1261_v35, %v1260_v48  ;;  %v1269_v53 = vshll.u32 %v4519_v18, %v1254_v36  ;;  %v4092_v54 = vmul.f32 %v4078_v40, %v4078_v40  ;;  %v1492_v21 = vsel %vm1490_vm13, %v1491_v47, %v1487_v23 }
 0x1a6   : > { %v1265_v45 = vor.u32 %v1264_v52, %v1263_v10  ;;  %v1270_v24 = vshrl.u32 %v4520_v62, %v1255_v30  ;;  %v1054_v33 = vsub.s32 4, %v3980_v28  ;;  %v1493_v49 = vadd.s32 %v1492_v21, %v1488_v8 }
 0x1a7   : > { %v1268_v0 = vor.u32 %v1267_v22, %v1266_v44  ;;  %v4096_v17 = vshll.u32 %v1248_v4, 8  ;;  %v1225_v11 = vmul.f32 %v1224_v1, %v4004_v13  ;;  %vm1272_vm4 = vcmp.lt.s32.totalorder %v4083_v39, 1 }
 0x1a8   : > { %v1271_v25 = vor.u32 %v1270_v24, %v1269_v53  ;;  %vm1275_vm15 = vcmp.lt.s32.totalorder %v4083_v39, 4  ;;  %v1494_v18 = vadd.s32 536870912, %v1493_v49  ;;  %vm1274_vm6 = vcmp.lt.s32.totalorder %v4083_v39, 3 }
 0x1a9   : > { %v1280_v62 = vsel %vm1272_vm4, %v1259_v7, %v4086_v26  ;;  %v1281_v36 = vsel %vm1275_vm15, %v1268_v0, 920167782  ;;  %v1066_v4 = vmul.f32 -0.00019511016, %v4092_v54  ;;  %vm1273_vm3 = vcmp.lt.s32.totalorder %v4083_v39, 2 }
 0x1aa   : > { %v1282_v34 = vsel %vm1274_vm6, %v1265_v45, %v1281_v36  ;;  %v1284_v14 = vsel %vm1272_vm4, %v4086_v26, %v1265_v45  ;;  %v761_v3 = vadd.f32 1.0, %v3983_v15  ;;  %v4115_v27 = vshrl.u32 %v1494_v18, 30 }
 0x1ab   : > { %v1283_v48 = vsel %vm1273_vm3, %v1280_v62, %v1282_v34  ;;  %v1285_v1 = vsel %vm1275_vm15, %v1271_v25, 1326507024  ;;  %v1226_v23 = vadd.f32 1.0, %v1225_v11  ;;  %v1055_v29 = vsel %vm932_vm9, %v1054_v33, %v3980_v28 }
 0x1ac   : > { %v1286_v5 = vsel %vm1274_vm6, %v1268_v0, %v1285_v1  ;;  %v1314_v10 = vshrl.u32 %v1283_v48, 16  ;;  %v1496_v35 = vshll.u32 %v4115_v27, 30  ;;  %v1289_v52 = vand.u32 65535, %v4096_v17 }
 0x1ad   : > { %v1287_v15 = vsel %vm1273_vm3, %v1284_v14, %v1286_v5  ;;  %v1313_v8 = vand.u32 65535, %v1283_v48  ;;  %v1067_v47 = vadd.f32 0.008332121, %v1066_v4  ;;  %v1256_v44 = vshrl.u32 %v4524_v46, %v1255_v30 }
 0x1ae   : > { %v1291_v22 = vand.u32 65535, %v1287_v15  ;;  %v1292_v53 = vshrl.u32 %v1287_v15, 16  ;;  %v4132_v21 = vmul.f32 %v761_v3, %v3881_v6  ;;  %v4136_v28 = vsel %vm4055_vm12, 0, %v1055_v29 }
 0x1af   : > { %v1497_v24 = vsub.s32 %v1493_v49, %v1496_v35  ;;  %v1290_v33 = vshrl.u32 %v4096_v17, 16  ;;  %v4140_v0 = vmul.f32 %v1226_v23, %v3993_v12  ;;  %v1489_v11 = vadd.s32 %v1484_v58, %v1465_v59 }
 0x1b0   : > { %v1294_v25 = vmul.u32 %v1292_v53, %v1289_v52  ;;  %v1316_v18 = vmul.u32 %v1314_v10, %v1289_v52  ;;  %v1068_v6 = vmul.f32 %v1067_v47, %v4092_v54  ;;  %v1276_v60 = vsel %vm1272_vm4, %v1256_v44, %v1259_v7 }
 0x1b1   : > { %vm1498_vm2 = vcmp.lt.s32.totalorder %v1497_v24, 0  ;;  %v1499_v46 = vsub.s32 0, %v1497_v24  ;;  %v1295_v30 = vmul.u32 %v1291_v22, %v1290_v33  ;;  %v4142_v62 = vmul.u32 %v1313_v8, %v1290_v33 }
 0x1b2   : > { %v1293_v36 = vmul.u32 %v1291_v22, %v1289_v52  ;;  %v1297_v49 = vshll.u32 %v1294_v25, 16  ;;  %v1296_v34 = vmul.u32 %v1292_v53, %v1290_v33  ;;  %v1315_v12 = vmul.u32 %v1313_v8, %v1289_v52 }
 0x1b3   : > { %v1500_v4 = vsel %vm1498_vm2, %v1499_v46, %v1497_v24  ;;  %v1299_v14 = vshll.u32 %v1295_v30, 16  ;;  %v1319_v58 = vshll.u32 %v1316_v18, 16  ;;  %v1277_v48 = vsel %vm1275_vm15, %v1265_v45, 2102212464 }
 0x1b4   : > { %v1501_v3 = vclz %v1500_v4  ;;  %vm1301_vm5 = vc.u32 %v1293_v36, %v1297_v49  ;;  %v1303_v59 = vadd.s32 %v1297_v49, %v1293_v36  ;;  %v1318_v23 = vmul.u32 %v1314_v10, %v1290_v33  ;;  %v4154_v10 = vpop.permute.xlu2 %1552 }
 0x1b5   : > { %v1302_v1 = vsel %vm1301_vm5, 1, %v4529_v61  ;;  %v1321_v29 = vshll.u32 %v4142_v62, 16  ;;  %vm1323_vm8 = vc.u32 %v1315_v12, %v1319_v58  ;;  %v1325_v52 = vadd.s32 %v1319_v58, %v1315_v12 }
 0x1b6   : > { %v3020_v5 = vadd.s32 4294967294, %v1501_v3  ;;  %v1304_v7 = vadd.s32 %v1302_v1, %v1296_v34  ;;  %vm1305_vm7 = vc.u32 %v1303_v59, %v1299_v14  ;;  %v1324_v15 = vsel %vm1323_vm8, 1, %v4529_v61 }
 0x1b7   : > { %v1306_v35 = vsel %vm1305_vm7, 1, %v4529_v61  ;;  %v439_v8 = vmul.f32 -0.001358992, %v3698_v43  ;;  %v1298_v47 = vshrl.u32 %v1294_v25, 16  ;;  %v1326_v45 = vadd.s32 %v1324_v15, %v1318_v23 }
 0x1b8   : > { %vm3021_vm9 = vcmp.lt.s32.totalorder %v3020_v5, 0  ;;  %v1308_v44 = vadd.s32 %v1306_v35, %v1304_v7  ;;  %v1069_v22 = vadd.f32 -0.16666654, %v1068_v6  ;;  %vm1327_vm10 = vc.u32 %v1325_v52, %v1321_v29 }
 0x1b9   : > { %v1504_v53 = vsel %vm3021_vm9, 0, %v3020_v5  ;;  %v440_v33 = vadd.f32 0.041655596, %v439_v8  ;;  %vm1397_vm11 = vcmp.lt.s32.totalorder %v3927_v2, 0  ;;  %v1278_v49 = vsel %vm1274_vm6, %v4086_v26, %v1277_v48 }
 0x1ba   : > { %v1505_v46 = vsub.s32 32, %v1504_v53  ;;  %v1509_v36 = vsub.s32 4294967266, %v1504_v53  ;;  %v1309_v4 = vadd.s32 %v1308_v44, %v1298_v47  ;;  %v1300_v34 = vshrl.u32 %v1295_v30, 16 }
 0x1bb   : > { %v1320_v14 = vshrl.u32 %v1316_v18, 16  ;;  %v1328_v25 = vsel %vm1327_vm10, 1, %v4529_v61  ;;  %v441_v6 = vmul.f32 %v440_v33, %v3698_v43  ;;  %v1506_v12 = vshll.u32 %v1497_v24, %v1504_v53 }
 0x1bc   : > { %v1507_v3 = vshrl.u32 %v1489_v11, %v1505_v46  ;;  %v1510_v59 = vadd.s32 127, %v1509_v36  ;;  %v1330_v58 = vadd.s32 %v1328_v25, %v1326_v45  ;;  %v4532_v1 = vand.u32 2147483647, %v3927_v2 }
 0x1bd   : > { %v1279_v26 = vsel %vm1273_vm3, %v1276_v60, %v1278_v49  ;;  %v4170_v48 = vadd.s32 %v1309_v4, %v1300_v34  ;;  %v442_v18 = vadd.f32 -0.4999988, %v441_v6  ;;  %v594_v61 = vmul.f32 -0.001358992, %v3618_v57  ;;  %v4189_v4 = vpop.permute.xlu2 %1557 }
 0x1be   : > { %vm4164_vm12 = vcmp.le.f32.partialorder %v4532_v1, 0.7853982  ;;  %v1508_v30 = vor.u32 %v1507_v3, %v1506_v12  ;;  %v1511_v5 = vshll.u32 %v1510_v59, 23  ;;  %v1322_v24 = vshrl.u32 %v4142_v62, 16 }
 0x1bf   : > { %v1331_v11 = vadd.s32 %v1330_v58, %v1320_v14  ;;  %v1519_v7 = vsub.s32 4, %v4115_v27  ;;  %v4175_v35 = vadd.s32 %v1325_v52, %v1321_v29  ;;  %v454_v15 = vadd.s32 3, %v3750_v20 }
 0x1c0   : > { %v595_v8 = vadd.f32 0.041655596, %v594_v61  ;;  %v1070_v39 = vmul.f32 %v1069_v22, %v4092_v54  ;;  %v1512_v60 = vor.u32 4788187, %v1511_v5  ;;  %v609_v44 = vadd.s32 3, %v3742_v56 }
 0x1c1   : > { %v1332_v47 = vadd.s32 %v1331_v11, %v1322_v24  ;;  %v1333_v45 = vmul.u32 %v4096_v17, %v1279_v26  ;;  %vm1335_vm14 = vc.u32 %v4170_v48, %v4175_v35  ;;  %v443_v62 = vmul.f32 %v442_v18, %v3698_v43 }
 0x1c2   : > { %v596_v53 = vmul.f32 %v595_v8, %v3618_v57  ;;  %v1513_v29 = vand.u32 2147483647, %v1512_v60  ;;  %v1515_v52 = vcvt.s32.f32 %v1508_v30  ;;  %v749_v46 = vmul.f32 -0.001358992, %v3902_v9 }
 0x1c3   : > { %v1336_v33 = vadd.s32 1, %v1332_v47  ;;  %v1520_v22 = vsel %vm1397_vm11, %v1519_v7, %v4115_v27  ;;  %v455_v36 = vand.u32 3, %v454_v15  ;;  %v904_v17 = vmul.f32 -0.001358992, %v3811_v41 }
 0x1c4   : > { %v597_v49 = vadd.f32 -0.4999988, %v596_v53  ;;  %v4192_v34 = vadd.f32 1.0, %v1070_v39  ;;  %v1516_v43 = vmul.f32 %v1515_v52, %v1513_v29  ;;  %v750_v25 = vadd.f32 0.041655596, %v749_v46 }
 0x1c5   : > { %v1337_v14 = vsel %vm1335_vm14, %v1336_v33, %v1332_v47  ;;  %v4194_v12 = vadd.f32 1.0, %v443_v62  ;;  %v610_v59 = vand.u32 3, %v609_v44  ;;  %v4199_v27 = vsel %vm4164_vm12, 0, %v1520_v22 }
 0x1c6   : > { %v1338_v6 = vadd.s32 %v1337_v14, %v1333_v45  ;;  %v598_v3 = vmul.f32 %v597_v49, %v3618_v57  ;;  %v1517_v58 = vxor.u32 2147483648, %v1516_v43  ;;  %vm1242_vm0 = vcmp.lt.s32.totalorder %v3971_v63, 0 }
 0x1c7   : > { %v751_v1 = vmul.f32 %v750_v25, %v3902_v9  ;;  %v905_v26 = vadd.f32 0.041655596, %v904_v17  ;;  %vm456_vm1 = vcmp.lt.s32.totalorder %v455_v36, 2  ;;  %vm457_vm13 = vcmp.eq.s32.totalorder %v455_v36, 0  ;;  %v4244_v17 = vpop.permute.xlu2 %2832 }
 0x1c8   : > { %v1339_v18 = vadd.s32 536870912, %v1338_v6  ;;  %vm460_vm4 = vcmp.eq.s32.totalorder %v455_v36, 2  ;;  %v1518_v61 = vsel %vm1397_vm11, %v1517_v58, %v1516_v43  ;;  %v458_v57 = vxor.u32 2147483648, %v3963_v55 }
 0x1c9   : > { %v752_v30 = vadd.f32 -0.4999988, %v751_v1  ;;  %v764_v5 = vadd.s32 3, %v3978_v32  ;;  %v4210_v24 = vsel %vm4164_vm12, %v3927_v2, %v1518_v61  ;;  %v4535_v11 = vand.u32 2147483647, %v3971_v63 }
 0x1ca   : > { %v1340_v15 = vshrl.u32 %v1339_v18, 30  ;;  %v461_v8 = vxor.u32 2147483648, %v4194_v12  ;;  %v4219_v39 = vadd.f32 1.0, %v598_v3  ;;  %vm611_vm6 = vcmp.lt.s32.totalorder %v610_v59, 2 }
 0x1cb   : > { %vm4214_vm15 = vcmp.le.f32.partialorder %v4535_v11, 0.7853982  ;;  %v4223_v60 = vmul.f32 %v4210_v24, %v4210_v24  ;;  %v613_v23 = vxor.u32 2147483648, %v3910_v31  ;;  %v753_v47 = vmul.f32 %v752_v30, %v3902_v9 }
 0x1cc   : > { %v906_v44 = vmul.f32 %v905_v26, %v3811_v41  ;;  %v1341_v45 = vshll.u32 %v1340_v15, 30  ;;  %v1364_v62 = vsub.s32 4, %v1340_v15  ;;  %vm612_vm3 = vcmp.eq.s32.totalorder %v610_v59, 0 }
 0x1cd   : > { %vm615_vm2 = vcmp.eq.s32.totalorder %v610_v59, 2  ;;  %v1531_v53 = vmul.f32 -0.00019511016, %v4223_v60  ;;  %vm453_vm5 = vweird.f32 %v3335_v38  ;;  %vm608_vm7 = vweird.f32 %v3333_v37 }
 0x1ce   : > { %v4231_v29 = vadd.f32 1.0, %v753_v47  ;;  %v765_v52 = vand.u32 3, %v764_v5  ;;  %v907_v33 = vadd.f32 -0.4999988, %v906_v44  ;;  %v4233_v46 = vsub.s32 %v1338_v6, %v1341_v45 }
 0x1cf   : > { %v459_v9 = vsel %vm457_vm13, %v4194_v12, %v458_v57  ;;  %v462_v22 = vsel %vm460_vm4, %v461_v8, %v3963_v55  ;;  %v616_v49 = vxor.u32 2147483648, %v4219_v39  ;;  %v1532_v43 = vadd.f32 0.008332121, %v1531_v53 }
 0x1d0   : > { %v614_v14 = vsel %vm612_vm3, %v4219_v39, %v613_v23  ;;  %vm763_vm8 = vweird.f32 %v3573_v19  ;;  %v768_v25 = vxor.u32 2147483648, %v4132_v21  ;;  %v919_v6 = vadd.s32 3, %v3967_v16 }
 0x1d1   : > { %vm1343_vm9 = vcmp.lt.s32.totalorder %v4233_v46, 0  ;;  %v1344_v3 = vsub.s32 0, %v4233_v46  ;;  %v1365_v58 = vsel %vm1242_vm0, %v1364_v62, %v1340_v15  ;;  %v771_v1 = vxor.u32 2147483648, %v4231_v29 }
 0x1d2   : > { %v1533_v26 = vmul.f32 %v1532_v43, %v4223_v60  ;;  %v463_v18 = vsel %vm456_vm1, %v459_v9, %v462_v22  ;;  %vm767_vm10 = vcmp.eq.s32.totalorder %v765_v52, 0  ;;  %v908_v61 = vmul.f32 %v907_v33, %v3811_v41 }
 0x1d3   : > { %v1345_v30 = vsel %vm1343_vm9, %v1344_v3, %v4233_v46  ;;  %v617_v5 = vsel %vm615_vm2, %v616_v49, %v3910_v31  ;;  %v769_v11 = vsel %vm767_vm10, %v4231_v29, %v768_v25  ;;  %vm770_vm11 = vcmp.eq.s32.totalorder %v765_v52, 2 }
 0x1d4   : > { %v1346_v15 = vclz %v1345_v30  ;;  %v4270_v36 = vsel %vm4214_vm15, 0, %v1365_v58  ;;  %v618_v47 = vsel %vm611_vm6, %v614_v14, %v617_v5  ;;  %v920_v41 = vand.u32 3, %v919_v6 }
 0x1d5   : > { %v1534_v44 = vadd.f32 -0.16666654, %v1533_v26  ;;  %v1539_v45 = vadd.s32 3, %v4199_v27  ;;  %vm766_vm12 = vcmp.lt.s32.totalorder %v765_v52, 2  ;;  %v772_v62 = vsel %vm770_vm11, %v771_v1, %v4132_v21 }
 0x1d6   : > { %v3017_v53 = vadd.s32 4294967294, %v1346_v15  ;;  %v773_v33 = vsel %vm766_vm12, %v769_v11, %v772_v62  ;;  %v4277_v9 = vadd.f32 1.0, %v908_v61  ;;  %v1743_v22 = vand.u32 3, %v3750_v20 }
 0x1d7   : > { %v1334_v43 = vadd.s32 %v4175_v35, %v4170_v48  ;;  %v1384_v59 = vadd.s32 3, %v4270_v36  ;;  %v464_v14 = vsel %vm453_vm5, nan, %v463_v18  ;;  %v619_v52 = vsel %vm608_vm7, nan, %v618_v47  ;;  %v4292_v48 = vpop.permute.xlu2 %2836 }
 0x1d8   : > { %vm3018_vm14 = vcmp.lt.s32.totalorder %v3017_v53, 0  ;;  %vm921_vm1 = vcmp.lt.s32.totalorder %v920_v41, 2  ;;  %vm922_vm13 = vcmp.eq.s32.totalorder %v920_v41, 0  ;;  %v923_v6 = vxor.u32 2147483648, %v3974_v42 }
 0x1d9   : > { %v1535_v3 = vmul.f32 %v1534_v44, %v4223_v60  ;;  %v1349_v58 = vsel %vm3018_vm14, 0, %v3017_v53  ;;  %v774_v20 = vsel %vm763_vm8, nan, %v773_v33  ;;  %vm918_vm4 = vweird.f32 %v3455_v51 }
 0x1da   : > { %vm925_vm6 = vcmp.eq.s32.totalorder %v920_v41, 2  ;;  %v1350_v35 = vsub.s32 32, %v1349_v58  ;;  %v1354_v26 = vsub.s32 4294967266, %v1349_v58  ;;  %v926_v18 = vxor.u32 2147483648, %v4277_v9 }
 0x1db   : > { %vm1745_vm3 = vcmp.eq.s32.totalorder %v1743_v22, 0  ;;  %vm1748_vm2 = vcmp.eq.s32.totalorder %v1743_v22, 2  ;;  %v1897_v30 = vand.u32 3, %v3742_v56  ;;  %v2051_v5 = vand.u32 3, %v3978_v32 }
 0x1dc   : > { %v1747_v61 = vsel %vm1745_vm3, %v4194_v12, %v458_v57  ;;  %v1351_v11 = vshll.u32 %v4233_v46, %v1349_v58  ;;  %v1352_v15 = vshrl.u32 %v1334_v43, %v1350_v35  ;;  %v1355_v47 = vadd.s32 127, %v1354_v26 }
 0x1dd   : > { %v924_v44 = vsel %vm922_vm13, %v4277_v9, %v923_v6  ;;  %v1536_v62 = vadd.f32 1.0, %v1535_v3  ;;  %v1572_v53 = vmul.f32 %v4189_v4, %v774_v20  ;;  %vm1744_vm9 = vcmp.lt.s32.totalorder %v1743_v22, 2 }
 0x1de   : > { %v1750_v57 = vsel %vm1748_vm2, %v461_v8, %v3963_v55  ;;  %v1353_v56 = vor.u32 %v1352_v15, %v1351_v11  ;;  %v1356_v33 = vshll.u32 %v1355_v47, 23  ;;  %v927_v32 = vsel %vm925_vm6, %v926_v18, %v3974_v42 }
 0x1df   : > { %v1751_v46 = vsel %vm1744_vm9, %v1747_v61, %v1750_v57  ;;  %v4315_v43 = vmul.f32 %v4192_v34, %v4078_v40  ;;  %v4317_v3 = vand.u32 3, %v1539_v45  ;;  %v1570_v22 = vmul.f32 %v4154_v10, %v464_v14  ;;  %v4334_v34 = vpop.permute.xlu2 %1562 }
 0x1e0   : > { %v928_v58 = vsel %vm921_vm1, %v924_v44, %v927_v32  ;;  %v1357_v12 = vor.u32 4788187, %v1356_v33  ;;  %v4321_v55 = vand.u32 3, %v1384_v59  ;;  %v4324_v8 = vmul.f32 %v4154_v10, %v619_v52 }
 0x1e1   : > { %v2205_v20 = vand.u32 3, %v3967_v16  ;;  %v4328_v35 = vmul.f32 %v1536_v62, %v4210_v24  ;;  %v4330_v26 = vadd.f32 %v1572_v53, %v1570_v22  ;;  %v1752_v40 = vsel %vm453_vm5, nan, %v1751_v46  ;;  %v4538_v22 = vld [vmem:[#allocation9_spill] sm:$0xff] }
 0x1e2   : > { %vm1898_vm10 = vcmp.lt.s32.totalorder %v1897_v30, 2  ;;  %v1358_v41 = vand.u32 2147483647, %v1357_v12  ;;  %v1360_v45 = vcvt.s32.f32 %v1353_v56  ;;  %v929_v59 = vsel %vm918_vm4, nan, %v928_v58 }
 0x1e3   : > { %vm2053_vm11 = vcmp.eq.s32.totalorder %v2051_v5, 0  ;;  %vm1899_vm12 = vcmp.eq.s32.totalorder %v1897_v30, 0  ;;  %vm1902_vm14 = vcmp.eq.s32.totalorder %v1897_v30, 2  ;;  %v1059_v10 = vmul.f32 -0.001358992, %v4092_v54 }
 0x1e4   : > { %v2055_v16 = vsel %vm2053_vm11, %v4231_v29, %v768_v25  ;;  %v1361_v24 = vmul.f32 %v1360_v45, %v1358_v41  ;;  %v1901_v38 = vsel %vm1899_vm12, %v4219_v39, %v613_v23  ;;  %v2847_v14 = vmul.f32 %v4244_v17, %v1752_v40 }
 0x1e5   : > { %vm2056_vm5 = vcmp.eq.s32.totalorder %v2051_v5, 2  ;;  %v1904_v52 = vsel %vm1902_vm14, %v616_v49, %v3910_v31  ;;  %vm2052_vm1 = vcmp.lt.s32.totalorder %v2051_v5, 2  ;;  %v1060_v25 = vadd.f32 0.041655596, %v1059_v10 }
 0x1e6   : > { %v2058_v61 = vsel %vm2056_vm5, %v771_v1, %v4132_v21  ;;  %v1362_v11 = vxor.u32 2147483648, %v1361_v24  ;;  %v1074_v47 = vadd.s32 3, %v4136_v28  ;;  %v1214_v44 = vmul.f32 -0.001358992, %v4004_v13 }
 0x1e7   : > { %v2059_v15 = vsel %vm2052_vm1, %v2055_v16, %v2058_v61  ;;  %v4355_v23 = vmul.f32 %v4189_v4, %v929_v59  ;;  %v1905_v62 = vsel %vm1898_vm10, %v1901_v38, %v1904_v52  ;;  %vm2207_vm13 = vcmp.eq.s32.totalorder %v2205_v20, 0  ;;  %v4379_v33 = vpop.permute.xlu2 %2840 }
 0x1e8   : > { %v1061_v31 = vmul.f32 %v1060_v25, %v4092_v54  ;;  %v1363_v39 = vsel %vm1242_vm0, %v1362_v11, %v1361_v24  ;;  %vm2206_vm6 = vcmp.lt.s32.totalorder %v2205_v20, 2  ;;  %v2209_v21 = vsel %vm2207_vm13, %v4277_v9, %v923_v6 }
 0x1e9   : > { %v1215_v29 = vadd.f32 0.041655596, %v1214_v44  ;;  %v1366_v49 = vsel %vm4214_vm15, %v3971_v63, %v1363_v39  ;;  %v2060_v4 = vsel %vm763_vm8, nan, %v2059_v15  ;;  %vm2210_vm3 = vcmp.eq.s32.totalorder %v2205_v20, 2 }
 0x1ea   : > { %v1062_v1 = vadd.f32 -0.4999988, %v1061_v31  ;;  %v1368_v30 = vmul.f32 %v1366_v49, %v1366_v49  ;;  %v2212_v5 = vsel %vm2210_vm3, %v926_v18, %v3974_v42  ;;  %v1075_v53 = vand.u32 3, %v1074_v47 }
 0x1eb   : > { %v1216_v57 = vmul.f32 %v1215_v29, %v4004_v13  ;;  %v4375_v6 = vsel %vm608_vm7, nan, %v1905_v62  ;;  %v2213_v56 = vsel %vm2206_vm6, %v2209_v21, %v2212_v5  ;;  %v1078_v19 = vxor.u32 2147483648, %v4315_v43 }
 0x1ec   : > { %v1063_v7 = vmul.f32 %v1062_v1, %v4092_v54  ;;  %v1376_v32 = vmul.f32 -0.00019511016, %v1368_v30  ;;  %v1229_v58 = vadd.s32 3, %v4538_v22  ;;  %v2359_v42 = vand.u32 3, %v4136_v28 }
 0x1ed   : > { %v1217_v46 = vadd.f32 -0.4999988, %v1216_v57  ;;  %v2849_v9 = vmul.f32 %v4292_v48, %v2060_v4  ;;  %vm1073_vm0 = vweird.f32 %v3733_v50  ;;  %v1369_v37 = vmul.f32 -0.001358992, %v1368_v30  ;;  %v4539_v4 = vld [vmem:[#allocation8_spill] sm:$0xff] }
 0x1ee   : > { %v1064_v18 = vadd.f32 1.0, %v1063_v7  ;;  %v1377_v12 = vadd.f32 0.008332121, %v1376_v32  ;;  %v2214_v54 = vsel %vm918_vm4, nan, %v2213_v56  ;;  %vm1077_vm15 = vcmp.eq.s32.totalorder %v1075_v53, 0 }
 0x1ef   : > { %v1218_v20 = vmul.f32 %v1217_v46, %v4004_v13  ;;  %vm1080_vm7 = vcmp.eq.s32.totalorder %v1075_v53, 2  ;;  %v1233_v45 = vxor.u32 2147483648, %v4140_v0  ;;  %v1230_v16 = vand.u32 3, %v1229_v58 }
 0x1f0   : > { %v1079_v40 = vsel %vm1077_vm15, %v1064_v18, %v1078_v19  ;;  %v1081_v41 = vxor.u32 2147483648, %v1064_v18  ;;  %v1378_v59 = vmul.f32 %v1377_v12, %v1368_v30  ;;  %vm2361_vm8 = vcmp.eq.s32.totalorder %v2359_v42, 0 }
 0x1f1   : > { %v1219_v28 = vadd.f32 1.0, %v1218_v20  ;;  %vm1076_vm2 = vcmp.lt.s32.totalorder %v1075_v53, 2  ;;  %v2363_v24 = vsel %vm2361_vm8, %v1064_v18, %v1078_v19  ;;  %v1370_v38 = vadd.f32 0.041655596, %v1369_v37 }
 0x1f2   : > { %v1082_v10 = vsel %vm1080_vm7, %v1081_v41, %v4315_v43  ;;  %v1379_v52 = vadd.f32 -0.16666654, %v1378_v59  ;;  %v4390_v51 = vadd.f32 %v2849_v9, %v2847_v14  ;;  %vm2364_vm4 = vcmp.eq.s32.totalorder %v2359_v42, 2  ;;  %v4397_v14 = vpop.permute.xlu2 %1567 }
 0x1f3   : > { %v1083_v61 = vsel %vm1076_vm2, %v1079_v40, %v1082_v10  ;;  %v1236_v13 = vxor.u32 2147483648, %v1219_v28  ;;  %vm2360_vm9 = vcmp.lt.s32.totalorder %v2359_v42, 2  ;;  %v2366_v25 = vsel %vm2364_vm4, %v1081_v41, %v4315_v43 }
 0x1f4   : > { %v1371_v11 = vmul.f32 %v1370_v38, %v1368_v30  ;;  %v1380_v15 = vmul.f32 %v1379_v52, %v1368_v30  ;;  %vm1232_vm10 = vcmp.eq.s32.totalorder %v1230_v16, 0  ;;  %v2367_v47 = vsel %vm2360_vm9, %v2363_v24, %v2366_v25 }
 0x1f5   : > { %v2513_v44 = vand.u32 3, %v4538_v22  ;;  %v2850_v62 = vmul.f32 %v4292_v48, %v2214_v54  ;;  %v1084_v31 = vsel %vm1073_vm0, nan, %v1083_v61  ;;  %v1234_v39 = vsel %vm1232_vm10, %v1219_v28, %v1233_v45 }
 0x1f6   : > { %v1372_v21 = vadd.f32 -0.4999988, %v1371_v11  ;;  %v1381_v29 = vadd.f32 1.0, %v1380_v15  ;;  %vm1228_vm11 = vweird.f32 %v4539_v4  ;;  %vm1235_vm12 = vcmp.eq.s32.totalorder %v1230_v16, 2 }
 0x1f7   : > { %vm1383_vm14 = vweird.f32 %v3971_v63  ;;  %vm1231_vm5 = vcmp.lt.s32.totalorder %v1230_v16, 2  ;;  %v1237_v43 = vsel %vm1235_vm12, %v1236_v13, %v4140_v0  ;;  %v2368_v1 = vsel %vm1073_vm0, nan, %v2367_v47 }
 0x1f8   : > { %v1373_v48 = vmul.f32 %v1372_v21, %v1368_v30  ;;  %v1382_v5 = vmul.f32 %v1381_v29, %v1366_v49  ;;  %v1238_v53 = vsel %vm1231_vm5, %v1234_v39, %v1237_v43  ;;  %v1574_v57 = vmul.f32 %v4334_v34, %v1084_v31 }
 0x1f9   : > { %vm2514_vm1 = vcmp.lt.s32.totalorder %v2513_v44, 2  ;;  %vm2515_vm13 = vcmp.eq.s32.totalorder %v2513_v44, 0  ;;  %vm2518_vm6 = vcmp.eq.s32.totalorder %v2513_v44, 2  ;;  %v1524_v7 = vmul.f32 -0.001358992, %v4223_v60 }
 0x1fa   : > { %v1374_v56 = vadd.f32 1.0, %v1373_v48  ;;  %v2517_v19 = vsel %vm2515_vm13, %v1219_v28, %v1233_v45  ;;  %v2520_v32 = vsel %vm2518_vm6, %v1236_v13, %v4140_v0  ;;  %v2851_v46 = vmul.f32 %v4379_v33, %v2368_v1  ;;  %v2845_v20 = vpop.permute.xlu2 %2844 }
 0x1fb   : > { %v1388_v22 = vxor.u32 2147483648, %v1382_v5  ;;  %v1239_v50 = vsel %vm1228_vm11, nan, %v1238_v53  ;;  %vm1387_vm3 = vcmp.eq.s32.totalorder %v4321_v55, 0  ;;  %v1525_v30 = vadd.f32 0.041655596, %v1524_v7 }
 0x1fc   : > { %v1391_v49 = vxor.u32 2147483648, %v1374_v56  ;;  %v1579_v58 = vadd.f32 %v4330_v26, %v1574_v57  ;;  %vm1390_vm0 = vcmp.eq.s32.totalorder %v4321_v55, 2  ;;  %v2667_v9 = vand.u32 3, %v4270_v36 }
 0x1fd   : > { %v1389_v42 = vsel %vm1387_vm3, %v1374_v56, %v1388_v22  ;;  %v2521_v18 = vsel %vm2514_vm1, %v2517_v19, %v2520_v32  ;;  %vm1386_vm15 = vcmp.lt.s32.totalorder %v4321_v55, 2  ;;  %v1526_v37 = vmul.f32 %v1525_v30, %v4223_v60 }
 0x1fe   : > { %v1392_v0 = vsel %vm1390_vm0, %v1391_v49, %v1382_v5  ;;  %vm2668_vm7 = vcmp.lt.s32.totalorder %v2667_v9, 2  ;;  %vm2669_vm8 = vcmp.eq.s32.totalorder %v2667_v9, 0  ;;  %vm2672_vm2 = vcmp.eq.s32.totalorder %v2667_v9, 2 }
 0x1ff   : > { %v1393_v12 = vsel %vm1386_vm15, %v1389_v42, %v1392_v0  ;;  %v1527_v26 = vadd.f32 -0.4999988, %v1526_v37  ;;  %v2671_v40 = vsel %vm2669_vm8, %v1374_v56, %v1388_v22  ;;  %v2674_v41 = vsel %vm2672_vm2, %v1391_v49, %v1382_v5 }
 0x200   : > { %v1394_v54 = vsel %vm1383_vm14, nan, %v1393_v12  ;;  %v2522_v36 = vsel %vm1228_vm11, nan, %v2521_v18  ;;  %v2675_v55 = vsel %vm2668_vm7, %v2671_v40, %v2674_v41  ;;  %v2821_v59 = vand.u32 3, %v4199_v27 }
 0x201   : > { %v1576_v45 = vmul.f32 %v4397_v14, %v1394_v54  ;;  %v2848_v28 = vmul.f32 %v4244_v17, %v4375_v6  ;;  %v1528_v16 = vmul.f32 %v1527_v26, %v4223_v60  ;;  %v1543_v10 = vxor.u32 2147483648, %v4328_v35 }
 0x202   : > { %v2676_v24 = vsel %vm1383_vm14, nan, %v2675_v55  ;;  %v1587_v38 = vadd.f32 %v4355_v23, %v4324_v8  ;;  %v2856_v52 = vadd.f32 %v4390_v51, %v2851_v46  ;;  %v1575_v27 = vmul.f32 %v4334_v34, %v1239_v50 }
 0x203   : > { %v1580_v61 = vadd.f32 %v1579_v58, %v1576_v45  ;;  %v2853_v13 = vmul.f32 %v2845_v20, %v2676_v24  ;;  %v2864_v25 = vadd.f32 %v2850_v62, %v2848_v28  ;;  %v2852_v11 = vmul.f32 %v4379_v33, %v2522_v36 }
 0x204   : > { %v1529_v17 = vadd.f32 1.0, %v1528_v16  ;;  %vm1542_vm4 = vcmp.eq.s32.totalorder %v4317_v3, 0  ;;  %vm2823_vm9 = vcmp.eq.s32.totalorder %v2821_v59, 0  ;;  %vm1538_vm10 = vweird.f32 %v3927_v2 }
 0x205   : > { %v1581_v60 = vrot.slane %v1580_v61, 4  ;;  %v2857_v6 = vadd.f32 %v2856_v52, %v2853_v13  ;;  %vm1545_vm11 = vcmp.eq.s32.totalorder %v4317_v3, 2  ;;  %vm2826_vm12 = vcmp.eq.s32.totalorder %v2821_v59, 2 }
 0x206   : > { %v1544_v63 = vsel %vm1542_vm4, %v1529_v17, %v1543_v10  ;;  %v1546_v15 = vxor.u32 2147483648, %v1529_v17  ;;  %v2825_v8 = vsel %vm2823_vm9, %v1529_v17, %v1543_v10  ;;  %vm1541_vm14 = vcmp.lt.s32.totalorder %v4317_v3, 2 }
 0x207   : > { %v1582_v23 = vadd.f32 %v1581_v60, %v1580_v61  ;;  %v2858_v34 = vrot.slane %v2857_v6, 4  ;;  %vm2822_vm5 = vcmp.lt.s32.totalorder %v2821_v59, 2  ;;  %v1588_v39 = vadd.f32 %v1587_v38, %v1575_v27 }
 0x208   : > { %v1547_v33 = vsel %vm1545_vm11, %v1546_v15, %v4328_v35  ;;  %v2828_v51 = vsel %vm2826_vm12, %v1546_v15, %v4328_v35  ;;  %v2865_v21 = vadd.f32 %v2864_v25, %v2852_v11  ;;  %v1596_v46 = vstv %s4436_s20 }
 0x209   : > { %v1548_v47 = vsel %vm1541_vm14, %v1544_v63, %v1547_v33  ;;  %v1583_v44 = vrot.slane %v1582_v23, 2  ;;  %v2829_v62 = vsel %vm2822_vm5, %v2825_v8, %v2828_v51  ;;  %v2859_v31 = vadd.f32 %v2858_v34, %v2857_v6 }
 0x20a   : > { %v1549_v29 = vsel %vm1538_vm10, nan, %v1548_v47  ;;  %v2830_v3 = vsel %vm1538_vm10, nan, %v2829_v62  ;;  %v2873_v22 = vstv %s4441_s24  ;;  %v2882_v59 = vstv %s2996_s25 }
 0x20b   : > { %v1577_v4 = vmul.f32 %v4397_v14, %v1549_v29  ;;  %v1584_v43 = vadd.f32 %v1583_v44, %v1582_v23  ;;  %v2854_v1 = vmul.f32 %v2845_v20, %v2830_v3  ;;  %v2860_v48 = vrot.slane %v2859_v31, 2 }
 0x20c   : > { %v2885_v16 = vstv %s2997_s26  ;;  %v2894_v38 = vlaneseq  ;;  %vm2891_vm1 = vcmask 1040384  }
 0x20d   : > { %v1585_v35 = vrot.slane %v1584_v43, 1  ;;  %v1589_v5 = vadd.f32 %v1588_v39, %v1577_v4  ;;  %v2861_v53 = vadd.f32 %v2860_v48, %v2859_v31  ;;  %v2866_v57 = vadd.f32 %v2865_v21, %v2854_v1 }
 0x20e   : > { %vm2896_vm13 = vcmp.lt.s32.totalorder %v2894_v38, 256 }
 0x20f   : > { %v1586_v56 = vadd.f32 %v1585_v35, %v1584_v43  ;;  %v1590_v7 = vrot.slane %v1589_v5, 4  ;;  %v2862_v19 = vrot.slane %v2861_v53, 1  ;;  %v2867_v32 = vrot.slane %v2866_v57, 4 }
 0x211   : > { %v1591_v50 = vadd.f32 %v1590_v7, %v1589_v5  ;;  %v2863_v49 = vadd.f32 %v2862_v19, %v2861_v53  ;;  %v2868_v30 = vadd.f32 %v2867_v32, %v2866_v57  ;;  %v1597_v58 = vadd.f32 %v1596_v46, %v1586_v56 }
 0x213   : > { %v1592_v2 = vrot.slane %v1591_v50, 2  ;;  %v2869_v42 = vrot.slane %v2868_v30, 2  ;;  %v2874_v14 = vadd.f32 %v2873_v22, %v2863_v49 }
 0x215   : > { %v1593_v9 = vadd.f32 %v1592_v2, %v1591_v50  ;;  %v2870_v18 = vadd.f32 %v2869_v42, %v2868_v30  ;;  %v2876_v12 = vadd.f32 %v2874_v14, %v1597_v58 }
 0x217   : > { %v1594_v0 = vrot.slane %v1593_v9, 1  ;;  %v2871_v37 = vrot.slane %v2870_v18, 1  ;;  %v2878_v41 = vmul.f32 1.442695, %v2876_v12 }
 0x219   : > { %v1595_v54 = vadd.f32 %v1594_v0, %v1593_v9  ;;  %v2872_v26 = vadd.f32 %v2871_v37, %v2870_v18  ;;  %3115 = vpow2.f32 %v2878_v41 }
 0x21b   : > { %v1598_v20 = vadd.f32 %v1596_v46, %v1595_v54  ;;  %v2875_v40 = vadd.f32 %v2873_v22, %v2872_v26 }
 0x21d   : > { %v2877_v36 = vadd.f32 %v2875_v40, %v1598_v20 }
 0x21f   : > { %v2880_v45 = vmul.f32 1.442695, %v2877_v36  ;;  %v3116_v55 = vpop.eup %3115 }
 0x220   : > { %v2883_v10 = vmul.f32 %v3116_v55, %v2882_v59 }
 0x221   : > { %3117 = vpow2.f32 %v2880_v45 }
 0x222   : > { %v2886_v61 = vadd.f32 %v2885_v16, %v2883_v10 }
 0x227   : > { %v3118_v28 = vpop.eup %3117 }
 0x228   : > { %v2884_v24 = vmul.f32 %v3118_v28, %v2882_v59 }
 0x22a   : > { %v2887_v52 = vadd.f32 %v2885_v16, %v2884_v24 }
 0x22c   : > { %v2890_v13 = vrot.slane %v2887_v52, 7 }
 0x22e   : > { %v2892_v25 = vsel %vm2891_vm1, %v2886_v61, %v2890_v13 }
 0x22f   : > { %2898 = vst.msk [vmem:[%s190_s6] sm:$0x3] %vm2896_vm13, %v2892_v25 }
 0x230   : > { %3161 = shalt.err (!%p3158_p8)
}
 0x231   : > { %3054 = dma.vmem_to_hbm [thread:$0]  (%p3269_p5), %s2913_s7, 32, %s2915_s8, %s2900_s16  }
 0x232 PF: > { %p3066_p9 = scmp.ge.s32.totalorder %s3200_s15, 2  ;;  %s2926_s25 = sand.u32 1, %s3188_s12  }
 0x233   : > { %s2927_s26 = scalar_lea.sflag [#allocation3], %s2926_s25 }
 0x234   : > { %p3061_p10 = pnand %p3066_p9, %p3273_p6 }
 0x236   : > { %p3062_p11 = pneg %p3061_p10 }
 0x238   : > { %3183 = dma.done.wait (%p3062_p11), %s2927_s26, 32  }
 0x239   : > { %3185 = vsyncadd (%p3062_p11), %s2927_s26, 4294967264  ;;  %p14_p12 = scmp.ge.s32.totalorder %s3256_s18, 4   ;;  %s4540_s12 = smov %s3192_s13 }
 0x23a   : > { %s4541_s13 = smov %s3196_s14  ;;  %s4542_s14 = smov %s3267_s21 }
 0x23b   : > { %s4543_s15 = smov %s3256_s18  ;;  %16 = sbr.rel (!%p14_p12) target bundleno = 4 (0x4), region = 72 }
 0x240   :  { %2933 = vsyncpa [#allocation3], 1 }
 0x241   :  { %2935 = vsyncpa [#allocation3 + $0x1], 1 }
 0x242   :  { %2936 = vsyncpa [#allocation4], 1 }
 0x243   :  { %2938 = vsyncpa [#allocation4 + $0x1], 1 }

// kernel: tpu_custom_call.1
= control target key start
LH: loop header
LB: loop body
LE: loop exit
PB: predicated region body
PF: predicated region fallthrough
CT: control target
= control target key end

     0   :  { %8 = vsyncpa [#allocation5], 0  ;;  %s4913_s0 = inlined_call_operand.vmem [shape: f32[4], index: 0, kind: input, shape index: {}]   ;;  %s4914_s1 = inlined_call_operand.hbm [shape: f32[32,300], index: 1, kind: input, shape index: {}]   ;;  %s4915_s2 = inlined_call_operand.vmem [shape: f32[32,2], index: 2, kind: input, shape index: {}]   ;;  %s4916_s3 = inlined_call_operand.hbm [shape: f32[1,512], index: 3, kind: output, shape index: {}]  }
   0x1   :  { %9 = vsyncpa [#allocation3], 0 }
   0x2   :  { %11 = vsyncpa [#allocation3 + $0x1], 0 }
   0x3   :  { %12 = vsyncpa [#allocation4], 0 }
   0x4   :  { %14 = vsyncpa [#allocation4 + $0x1], 0  ;;  %s3232_s12 = smov 0   ;;  %s3234_s13 = smov 0  }
   0x5   :  { %s3236_s14 = smov 0   ;;  %s3238_s15 = smov 0  }
   0x6 LB: > { %s3253_s16 = sadd.s32 4294967295, %s3198_s15   ;;  %s2922_s17 = sadd.s32 4294967294, %s3198_s15   ;;  %s3198_s15 = sphi %s3238_s15, %s5011_s15   ;;  %s3194_s14 = sphi %s3236_s14, %s5010_s14   ;;  %s3190_s13 = sphi %s3234_s13, %s5009_s13   ;;  %s3186_s12 = sphi %s3232_s12, %s5008_s12  }
   0x7   : > { %s3257_s18 = sadd.s32 1, %s3198_s15   ;;  %s48_s19 = sadd.s32 1, %s3194_s14 }
   0x8   : > { %s45_s20 = ssub.s32 %s3198_s15, %s3257_s18  ;;  %p55_p0 = scmp.ne.s32.totalorder %s3194_s14, %s3190_s13 }
   0x9   : > { %p46_p1 = scmp.eq.s32.totalorder %s45_s20, 0  ;;  %p56_p2 = scmp.eq.s32.totalorder %s3198_s15, 0 }
   0xa   : > { %p61_p3 = scmp.ne.s32.totalorder %s3190_s13, %s3186_s12  ;;  %p4919_p4 = scmp.eq.s32.totalorder %s3253_s16, 0 }
   0xb   : > { %s3269_s21 = scalar_select %p46_p1, %s3194_s14, %s48_s19  }
   0xc   : > { %p3271_p5 = por %p56_p2, %p55_p0  ;;  %p3277_p6 = por %p4919_p4, %p61_p3 }
   0xd   : > { %p106_p7 = scmp.eq.s32.totalorder %s3253_s16, 1  ;;  %p112_p8 = scmp.eq.s32.totalorder %s2922_s17, 1 }
   0xe   : > { %p2923_p9 = scmp.ge.s32.totalorder %s3198_s15, 1  ;;  %p119_p10 = scmp.lt.s32.totalorder %s3198_s15, 3 }
   0xf   : > { %p3284_p11 = por %p106_p7, %p55_p0  ;;  %p3288_p12 = por %p112_p8, %p61_p3 }
  0x10   : > { %p3292_p13 = pnand %p2923_p9, %p119_p10  ;;  %s131_s29 = sshll.u32 %s4913_s0, 4  ;;  %s132_s29 = int_to_ptr.vmem [resolvable:$true] %s131_s29 }
  0x11   : > { %s4950_s25 = scalar_select %p3288_p12, 1, 0 }
  0x12   : > { %p3003_p1 = pneg %p3292_p13  ;;  %s3200_s30 = smov [#allocation2]  }
  0x13   : > { %p4918_p2 = scmp.ge.s32.totalorder %s3198_s15, 2 }
  0x14   : > { %p3004_p0 = pnand %p3003_p1, %p4919_p4 }
  0x15   : > { %141 = sbr.rel (%p4918_p2) target bundleno = 64 (0x40), region = 24 }
  0x16   : > { %3006 = dma.vmem_to_smem (!%p3004_p0), %s132_s29, 16, %s3200_s30, [#allocation5]  }
  0x1a   : > { %144 = sbr.rel (!%p3271_p5) target bundleno = 64 (0x40), region = 28  ;;  %s145_s4 = sand.u32 (%p3271_p5), 1, %s3194_s14  }
  0x1b   : > { %s2927_s5 = sshll.u32 (%p3271_p5), %s3198_s15, 1  ;;  %s2926_s6 = sshll.u32 (%p3271_p5), %s145_s4, 6 }
  0x1c   : > { %s151_s7 = ssub.s32 (%p3271_p5), 3, %s2927_s5  ;;  %s3313_s11 = scalar_lea.sflag (%p3271_p5), [#allocation3], %s145_s4 }
  0x1d   : > { %p152_p3 = scmp.lt.s32.totalorder (%p3271_p5), %s151_s7, 2  ;;  %s149_s17 = scalar_lea.vmem (%p3271_p5), [#allocation6], %s2926_s6 }
  0x1f   : > { %s5013_s7 = smov (!%p152_p3, %s151_s7), 2 }
  0x20   : > { %s2928_s8 = sshll.u32 %s5013_s7, 5 }
  0x21   : > { %s155_s9 = ssub.s32 64, %s2928_s8 }
  0x22   : > { %s156_s10 = sshll.u32 %s155_s9, 4 }
  0x23   : > { %157 = vsyncadd %s3313_s11, %s156_s10  ;;  %p3316_p5 = scmp.ne.s32.totalorder %s2928_s8, 0  ;;  %s2993_s20 = sshll.u32 %s3198_s15, 4 }
  0x24   : > { %s160_s28 = scalar_lea.hbm %s4914_s1, %s2993_s20  ;;  %s2931_s29 = sshll.u32 %s5013_s7, 3 }
  0x25   : > { %s163_s30 = sshll.u32 %s160_s28, 4  ;;  %s3325_s4 = sshll.u32 %s149_s17, 4  ;;  %s3327_s30 = int_to_ptr.hbm [resolvable:$true] %s163_s30  ;;  %s166_s4 = int_to_ptr.vmem [resolvable:$true] %s3325_s4 }
  0x26   : > { %s4917_s5 = sshll.u32 %s5013_s7, 9  ;;  %s3089_s6 = sshra.s32 %s3327_s30, 4  ;;  %s3090_s6 = int_to_ptr.hbm [resolvable:$true] %s3089_s6 }
  0x27   : > { %s3091_s8 = sshrl.u32 %s4917_s5, 4  ;;  %s3100_s17 = scalar_lea.hbm %s4914_s1, 96 }
  0x28   : > { %s3096_s9 = scalar_lea.hbm %s3090_s6, %s3091_s8  ;;  %p3101_p10 = scmp.lt.s32.totalorder %s3090_s6, %s4914_s1 }
  0x29   : > { %p3097_p7 = scmp.ne.s32.totalorder %s3090_s6, %s3096_s9  ;;  %p3102_p1 = scmp.lt.s32.totalorder %s3100_s17, %s3096_s9 }
  0x2b   : > { %p3098_p8 = pnand %p3097_p7, %p3316_p5  ;;  %p3103_p0 = por %p3102_p1, %p3101_p10 }
  0x2d   : > { %p3099_p9 = pneg %p3098_p8 }
  0x2f   : > { %p3104_p3 = pnand %p3103_p0, %p3099_p9 }
  0x31   : > { %3107 = shalt.err (!%p3104_p3)
}
  0x32   : > { %s3108_s28 = sshra.s32 %s166_s4, 4  ;;  %s3201_s10 = smov [#allocation6]   ;;  %s3109_s28 = int_to_ptr.vmem [resolvable:$true] %s3108_s28 }
  0x33   : > { %s3115_s5 = scalar_lea.vmem %s3109_s28, %s3091_s8  ;;  %s3119_s20 = scalar_lea.vmem %s3201_s10, 128 }
  0x34   : > { %p3116_p7 = scmp.ne.s32.totalorder %s3109_s28, %s3115_s5  ;;  %p3121_p4 = scmp.lt.s32.totalorder %s3119_s20, %s3115_s5 }
  0x36   : > { %p3117_p8 = pnand %p3116_p7, %p3316_p5 }
  0x38   : > { %p3118_p2 = pneg %p3117_p8 }
  0x3a   : > { %p3123_p12 = pnand %p3121_p4, %p3118_p2 }
  0x3c   : > { %3126 = shalt.err (!%p3123_p12)
}
  0x3d   : > { %s3202_s6 = smov 384   ;;  %s3203_s9 = smov 256  }
  0x3e   : > { %s4953_s8 = sshll.u32 %s5013_s7, 9 }
  0x3f   : > { %171 = dma.hbm_to_vmem [thread:$0]  (%p3316_p5), %s3327_s30, %s4953_s8, %s166_s4, %s3313_s11, %s3202_s6, %s3203_s9, %s2931_s29  }
  0x40 PF: > { %177 = sbr.rel (%p3292_p13) target bundleno = 451 (0x1c3), region = 32 }
  0x45   : > { %p4954_p4 = scmp.eq.s32.totalorder %s3253_s16, 0 }
  0x47   : > { %3173 = dma.done.wait (%p4954_p4), [#allocation5], 16   ;;  %p4955_p12 = pmov %p4954_p4 }
  0x48   : > { %s3363_s5 = sand.u32 1, %s3190_s13  }
  0x49   : > { %3175 = vsyncadd (%p4955_p12), [#allocation5], 4294967280  ;;  %s2936_s19 = sshll.u32 %s3363_s5, 6  ;;  %s185_s7 = scalar_lea.sflag [#allocation3], %s3363_s5 }
  0x4a   : > { %s3367_s11 = scalar_lea.vmem [#allocation6], %s2936_s19 }
  0x4b   : > { %3177 = dma.done.wait (%p3277_p6), %s185_s7, 1024  }
  0x4c   : > { %3179 = vsyncadd (%p3277_p6), %s185_s7, 4294966272 }
  0x4d   : > { %194 = sfence }
  0x4e   : > { %v223_v0 = vld [vmem:[%s4915_s2] sm:$0xff]  ;;  %v3204_v1 = vmov 1   ;;  %v4937_v2 = vmov 0   ;;  %v225_v3 = vld [vmem:[%s4915_s2 + $0x10] sm:$0xff]  ;;  %v224_v8 = vld [vmem:[%s4915_s2 + $0x8] sm:$0xff]  ;;  %s4870_s28 = sld [smem:[#allocation2 + $0x1]] }
  0x4f   : > { %3058 = vset.pattern.permute.xlu1 %v3204_v1  ;;  %3057 = vset.pattern.permute.xlu0 %v4937_v2  ;;  %v3382_v4 = vld [vmem:[%s3367_s11] sm:$0xff]  ;;  %v3391_v11 = vld [vmem:[%s3367_s11 + $0x8] sm:$0xff]  ;;  %v226_v15 = vld [vmem:[%s4915_s2 + $0x18] sm:$0xff]  ;;  %v4922_v17 = vmov 2102212464   ;;  %s4873_s10 = sld [smem:[#allocation2]] }
  0x50   : > { %2757 = vperm.xlu1 %3058, %v223_v0   ;;  %1477 = vperm.xlu0 %3057, %v223_v0   ;;  %v238_v5 = vand.u32 2139095040, %v3382_v4  ;;  %v235_v13 = vand.u32 2147483647, %v3382_v4  ;;  %v4932_v19 = vmov 920167782   ;;  %v393_v21 = vand.u32 2139095040, %v3391_v11 }
  0x51   : > { %3059 = vset.pattern.permute.xlu2 %v4937_v2  ;;  %v4934_v22 = vmov 683565275   ;;  %v4926_v24 = vmov 2475754826   ;;  %v4924_v27 = vmov 2131351028  }
  0x52   : > { %1487 = vperm.xlu2 %3059, %v225_v3   ;;  %v239_v6 = vshrl.u32 %v238_v5, 23  ;;  %v4930_v32 = vmov 1326507024   ;;  %v242_v34 = vand.u32 8388607, %v235_v13  ;;  %v394_v37 = vshrl.u32 %v393_v21, 23 }
  0x53   : > { %s2939_s20 = sld [smem:[#allocation2 + $0x2]]  ;;  %s2937_s9 = sshll.u32 %s3363_s5, 1 }
  0x54   : > { %v2941_v7 = vadd.s32 4294967169, %v239_v6  ;;  %v243_v42 = vor.u32 8388608, %v242_v34  ;;  %v2944_v44 = vadd.s32 4294967169, %v394_v37  ;;  %s2940_s6 = sld [smem:[#allocation2 + $0x3]]  ;;  %s2990_s8 = sshll.u32 %s3253_s16, 1 }
  0x55   : > { %s212_s26 = scalar_lea.vmem [#allocation7], %s2937_s9  ;;  %s2825_s16 = scalar_lea.sflag [#allocation4], %s3363_s5 }
  0x56   : > { %v245_v9 = vadd.s32 1, %v2941_v7  ;;  %v3447_v49 = vshll.u32 %v243_v42, 8  ;;  %v400_v50 = vadd.s32 1, %v2944_v44  ;;  %s2837_s29 = sshll.u32 %s212_s26, 4  ;;  %s3148_s27 = scalar_lea.hbm %s4916_s3, 4  ;;  %s2838_s29 = int_to_ptr.vmem [resolvable:$true] %s2837_s29 }
  0x58   : > { %2761 = vperm.xlu1 %3058, %v224_v8   ;;  %1482 = vperm.xlu0 %3057, %v224_v8   ;;  %vm246_vm0 = vcmp.gt.s32.totalorder %v245_v9, 0  ;;  %v284_v53 = vand.u32 65535, %v3447_v49  ;;  %vm401_vm5 = vcmp.gt.s32.totalorder %v400_v50, 0  ;;  %v285_v57 = vshrl.u32 %v3447_v49, 16 }
  0x59   : > { %v247_v10 = vsel %vm246_vm0, %v245_v9, 0  ;;  %v402_v56 = vsel %vm401_vm5, %v400_v50, 0 }
  0x5a   : > { %3060 = vset.pattern.permute.xlu2 %v3204_v1  ;;  %v249_v12 = vand.u32 31, %v247_v10  ;;  %v3399_v16 = vshrl.u32 %v247_v10, 5  ;;  %v404_v62 = vand.u32 31, %v402_v56 }
  0x5b   : > { %2765 = vperm.xlu2 %3060, %v225_v3   ;;  %v390_v3 = vand.u32 2147483647, %v3391_v11 }
  0x5c   : > { %v3394_v14 = vsub.s32 32, %v249_v12  ;;  %v261_v18 = vshll.u32 %v4922_v17, %v249_v12  ;;  %v264_v20 = vshll.u32 %v4932_v19, %v249_v12  ;;  %v252_v23 = vshll.u32 %v4934_v22, %v249_v12 }
  0x5d   : > { %v255_v26 = vshll.u32 %v4926_v24, %v249_v12  ;;  %v258_v28 = vshll.u32 %v4924_v27, %v249_v12  ;;  %vm270_vm1 = vcmp.lt.s32.totalorder %v3399_v16, 4  ;;  %vm267_vm2 = vcmp.lt.s32.totalorder %v3399_v16, 1 }
  0x5e   : > { %v253_v25 = vshrl.u32 %v4926_v24, %v3394_v14  ;;  %v256_v29 = vshrl.u32 %v4924_v27, %v3394_v14  ;;  %v259_v30 = vshrl.u32 %v4922_v17, %v3394_v14  ;;  %v262_v31 = vshrl.u32 %v4932_v19, %v3394_v14 }
  0x5f   : > { %v265_v33 = vshrl.u32 %v4930_v32, %v3394_v14  ;;  %vm269_vm3 = vcmp.lt.s32.totalorder %v3399_v16, 3  ;;  %vm268_vm4 = vcmp.lt.s32.totalorder %v3399_v16, 2  ;;  %v3466_v8 = vsub.s32 32, %v404_v62 }
  0x60   : > { %2769 = vperm.xlu1 %3058, %v226_v15   ;;  %1492 = vperm.xlu0 %3057, %v226_v15   ;;  %v263_v35 = vor.u32 %v262_v31, %v261_v18  ;;  %v3420_v38 = vor.u32 %v253_v25, %v252_v23  ;;  %v3422_v39 = vor.u32 %v256_v29, %v255_v26  ;;  %v397_v12 = vand.u32 8388607, %v390_v3 }
  0x61   : > { %v266_v36 = vor.u32 %v265_v33, %v264_v20  ;;  %v3424_v40 = vor.u32 %v259_v30, %v258_v28  ;;  %v3474_v20 = vshrl.u32 %v402_v56, 5  ;;  %v407_v23 = vshll.u32 %v4934_v22, %v404_v62 }
  0x62   : > { %v276_v41 = vsel %vm270_vm1, %v263_v35, 920167782  ;;  %v275_v45 = vsel %vm267_vm2, %v3420_v38, %v3422_v39  ;;  %v416_v25 = vshll.u32 %v4922_v17, %v404_v62  ;;  %v417_v26 = vshrl.u32 %v4932_v19, %v3466_v8 }
  0x63   : > { %v280_v43 = vsel %vm270_vm1, %v266_v36, 1326507024  ;;  %v277_v46 = vsel %vm269_vm3, %v3424_v40, %v276_v41  ;;  %v279_v47 = vsel %vm267_vm2, %v3422_v39, %v3424_v40  ;;  %v419_v30 = vshll.u32 %v4932_v19, %v404_v62 }
  0x64   : > { %v281_v48 = vsel %vm269_vm3, %v263_v35, %v280_v43  ;;  %v278_v51 = vsel %vm268_vm4, %v275_v45, %v277_v46  ;;  %v420_v31 = vshrl.u32 %v4930_v32, %v3466_v8  ;;  %v408_v34 = vshrl.u32 %v4926_v24, %v3466_v8 }
  0x65   : > { %v282_v52 = vsel %vm268_vm4, %v279_v47, %v281_v48  ;;  %v309_v54 = vshrl.u32 %v278_v51, 16  ;;  %v308_v58 = vand.u32 65535, %v278_v51  ;;  %v410_v35 = vshll.u32 %v4926_v24, %v404_v62 }
  0x66   : > { %v287_v55 = vshrl.u32 %v282_v52, 16  ;;  %v286_v60 = vand.u32 65535, %v282_v52  ;;  %v411_v36 = vshrl.u32 %v4924_v27, %v3466_v8  ;;  %v413_v37 = vshll.u32 %v4924_v27, %v404_v62 }
  0x67   : > { %v3455_v59 = vmul.u32 %v309_v54, %v284_v53  ;;  %v310_v63 = vmul.u32 %v308_v58, %v284_v53  ;;  %v3459_v0 = vmul.u32 %v308_v58, %v285_v57  ;;  %v313_v21 = vmul.u32 %v309_v54, %v285_v57  ;;  %v3507_v54 = vld [vmem:[%s3367_s11 + $0x20] sm:$0xff] }
  0x68   : > { %3061 = vset.pattern.permute.xlu0 %v3204_v1  ;;  %v3457_v61 = vmul.u32 %v287_v55, %v284_v53  ;;  %v288_v5 = vmul.u32 %v286_v60, %v284_v53  ;;  %v3463_v6 = vmul.u32 %v286_v60, %v285_v57  ;;  %v291_v28 = vmul.u32 %v287_v55, %v285_v57 }
  0x69   : > { %v314_v1 = vshll.u32 %v3455_v59, 16  ;;  %v316_v9 = vshll.u32 %v3459_v0, 16  ;;  %v414_v41 = vshrl.u32 %v4922_v17, %v3466_v8  ;;  %v418_v43 = vor.u32 %v417_v26, %v416_v25 }
  0x6a   : > { %v292_v7 = vshll.u32 %v3457_v61, 16  ;;  %v294_v15 = vshll.u32 %v3463_v6, 16  ;;  %v421_v46 = vor.u32 %v420_v31, %v419_v30  ;;  %vm425_vm10 = vcmp.lt.s32.totalorder %v3474_v20, 4 }
  0x6b   : > { %vm318_vm6 = vc.u32 %v310_v63, %v314_v1  ;;  %v3469_v10 = vadd.s32 %v314_v1, %v310_v63  ;;  %v398_v48 = vor.u32 8388608, %v397_v12  ;;  %v315_v50 = vshrl.u32 %v3455_v59, 16 }
  0x6c   : > { %vm296_vm7 = vc.u32 %v288_v5, %v292_v7  ;;  %v298_v18 = vadd.s32 %v292_v7, %v288_v5  ;;  %v319_v29 = vsel %vm318_vm6, 1, %v4937_v2  ;;  %v3500_v51 = vor.u32 %v408_v34, %v407_v23 }
  0x6d   : > { %v297_v33 = vsel %vm296_vm7, 1, %v4937_v2  ;;  %vm322_vm8 = vc.u32 %v3469_v10, %v316_v9  ;;  %v321_v42 = vadd.s32 %v319_v29, %v313_v21  ;;  %v3502_v52 = vor.u32 %v411_v36, %v410_v35 }
  0x6e   : > { %vm300_vm9 = vc.u32 %v298_v18, %v294_v15  ;;  %v299_v44 = vadd.s32 %v297_v33, %v291_v28  ;;  %v323_v45 = vsel %vm322_vm8, 1, %v4937_v2  ;;  %v3504_v53 = vor.u32 %v414_v41, %v413_v37 }
  0x6f   : > { %v301_v47 = vsel %vm300_vm9, 1, %v4937_v2  ;;  %v325_v55 = vadd.s32 %v323_v45, %v321_v42  ;;  %vm422_vm11 = vcmp.lt.s32.totalorder %v3474_v20, 1  ;;  %vm424_vm12 = vcmp.lt.s32.totalorder %v3474_v20, 3 }
  0x70   : > { %v431_v56 = vsel %vm425_vm10, %v418_v43, 920167782  ;;  %v293_v57 = vshrl.u32 %v3457_v61, 16  ;;  %v303_v58 = vadd.s32 %v301_v47, %v299_v44  ;;  %v435_v59 = vsel %vm425_vm10, %v421_v46, 1326507024 }
  0x71   : > { %v3516_v60 = vshll.u32 %v398_v48, 8  ;;  %v858_v62 = vand.u32 2139095040, %v3507_v54  ;;  %v251_v63 = vshrl.u32 %v4934_v22, %v3394_v14  ;;  %vm423_vm13 = vcmp.lt.s32.totalorder %v3474_v20, 2 }
  0x72   : > { %v430_v1 = vsel %vm422_vm11, %v3500_v51, %v3502_v52  ;;  %v432_v61 = vsel %vm424_vm12, %v3504_v53, %v431_v56  ;;  %v317_v5 = vshrl.u32 %v3459_v0, 16  ;;  %v326_v7 = vadd.s32 %v325_v55, %v315_v50 }
  0x73   : > { %v434_v12 = vsel %vm422_vm11, %v3502_v52, %v3504_v53  ;;  %v436_v14 = vsel %vm424_vm12, %v418_v43, %v435_v59  ;;  %v295_v15 = vshrl.u32 %v3463_v6, 16  ;;  %v304_v18 = vadd.s32 %v303_v58, %v293_v57 }
  0x74   : > { %v272_v21 = vsel %vm270_vm1, %v3424_v40, 2102212464  ;;  %v433_v23 = vsel %vm423_vm13, %v430_v1, %v432_v61  ;;  %v437_v25 = vsel %vm423_vm13, %v434_v12, %v436_v14  ;;  %v271_v26 = vsel %vm267_vm2, %v251_v63, %v3420_v38 }
  0x75   : > { %v327_v28 = vadd.s32 %v326_v7, %v317_v5  ;;  %v439_v29 = vand.u32 65535, %v3516_v60  ;;  %v859_v30 = vshrl.u32 %v858_v62, 23  ;;  %v273_v6 = vsel %vm269_vm3, %v3422_v39, %v272_v21 }
  0x76   : > { %v3551_v31 = vadd.s32 %v304_v18, %v295_v15  ;;  %v3556_v40 = vadd.s32 %v3469_v10, %v316_v9  ;;  %v464_v33 = vshrl.u32 %v433_v23, 16  ;;  %v442_v34 = vshrl.u32 %v437_v25, 16 }
  0x77   : > { %v274_v38 = vsel %vm268_vm4, %v271_v26, %v273_v6  ;;  %v331_v35 = vadd.s32 1, %v327_v28  ;;  %v2953_v36 = vadd.s32 4294967169, %v859_v30  ;;  %v440_v37 = vshrl.u32 %v3516_v60, 16 }
  0x78   : > { %vm330_vm14 = vc.u32 %v3551_v31, %v3556_v40  ;;  %v463_v39 = vand.u32 65535, %v433_v23  ;;  %v466_v41 = vmul.u32 %v464_v33, %v439_v29  ;;  %v441_v42 = vand.u32 65535, %v437_v25 }
  0x79   : > { %v444_v43 = vmul.u32 %v442_v34, %v439_v29  ;;  %v328_v0 = vmul.u32 %v3447_v49, %v274_v38  ;;  %v332_v9 = vsel %vm330_vm14, %v331_v35, %v327_v28  ;;  %v865_v10 = vadd.s32 1, %v2953_v36 }
  0x7a   : > { %v465_v44 = vmul.u32 %v463_v39, %v439_v29  ;;  %v3564_v45 = vmul.u32 %v463_v39, %v440_v37  ;;  %v469_v16 = vshll.u32 %v466_v41, 16  ;;  %v443_v46 = vmul.u32 %v441_v42, %v439_v29 }
  0x7b   : > { %v445_v47 = vmul.u32 %v441_v42, %v440_v37  ;;  %v447_v48 = vshll.u32 %v444_v43, 16  ;;  %v333_v50 = vadd.s32 %v332_v9, %v328_v0  ;;  %vm866_vm15 = vcmp.gt.s32.totalorder %v865_v10, 0 }
  0x7c   : > { %v471_v55 = vshll.u32 %v3564_v45, 16  ;;  %vm473_vm0 = vc.u32 %v465_v44, %v469_v16  ;;  %v475_v56 = vadd.s32 %v469_v16, %v465_v44  ;;  %v468_v49 = vmul.u32 %v464_v33, %v440_v37 }
  0x7d   : > { %v449_v57 = vshll.u32 %v445_v47, 16  ;;  %vm451_vm1 = vc.u32 %v443_v46, %v447_v48  ;;  %v453_v58 = vadd.s32 %v447_v48, %v443_v46  ;;  %v334_v59 = vadd.s32 536870912, %v333_v50 }
  0x7e   : > { %v867_v62 = vsel %vm866_vm15, %v865_v10, 0  ;;  %v446_v63 = vmul.u32 %v442_v34, %v440_v37  ;;  %v474_v1 = vsel %vm473_vm0, 1, %v4937_v2  ;;  %v452_v61 = vsel %vm451_vm1, 1, %v4937_v2 }
  0x7f   : > { %vm477_vm2 = vc.u32 %v475_v56, %v471_v55  ;;  %vm455_vm3 = vc.u32 %v453_v58, %v449_v57  ;;  %v869_v5 = vand.u32 31, %v867_v62  ;;  %v3569_v7 = vshrl.u32 %v334_v59, 30 }
  0x80   : > { %v476_v12 = vadd.s32 %v474_v1, %v468_v49  ;;  %v454_v14 = vadd.s32 %v452_v61, %v446_v63  ;;  %v478_v15 = vsel %vm477_vm2, 1, %v4937_v2  ;;  %v456_v18 = vsel %vm455_vm3, 1, %v4937_v2 }
  0x81   : > { %v3573_v21 = vsub.s32 32, %v869_v5  ;;  %v336_v23 = vshll.u32 %v3569_v7, 30  ;;  %v470_v25 = vshrl.u32 %v466_v41, 16  ;;  %v448_v28 = vshrl.u32 %v444_v43, 16 }
  0x82   : > { %v480_v26 = vadd.s32 %v478_v15, %v476_v12  ;;  %v458_v29 = vadd.s32 %v456_v18, %v454_v14  ;;  %v406_v30 = vshrl.u32 %v4934_v22, %v3466_v8  ;;  %v427_v6 = vsel %vm425_vm10, %v3504_v53, 2102212464  ;;  %v3636_v12 = vld [vmem:[%s3367_s11 + $0x28] sm:$0xff] }
  0x83   : > { %v4921_v33 = vand.u32 2147483647, %v3507_v54  ;;  %v881_v34 = vshll.u32 %v4922_v17, %v869_v5  ;;  %v882_v38 = vshrl.u32 %v4932_v19, %v3573_v21  ;;  %v884_v35 = vshll.u32 %v4932_v19, %v869_v5 }
  0x84   : > { %v885_v36 = vshrl.u32 %v4930_v32, %v3573_v21  ;;  %v3588_v37 = vsub.s32 %v333_v50, %v336_v23  ;;  %v472_v8 = vshrl.u32 %v3564_v45, 16  ;;  %v481_v39 = vadd.s32 %v480_v26, %v470_v25 }
  0x85   : > { %v3591_v41 = vshrl.u32 %v867_v62, 5  ;;  %v450_v53 = vshrl.u32 %v445_v47, 16  ;;  %v459_v42 = vadd.s32 %v458_v29, %v448_v28  ;;  %v872_v43 = vshll.u32 %v4934_v22, %v869_v5 }
  0x86   : > { %v875_v0 = vshll.u32 %v4926_v24, %v869_v5  ;;  %v873_v9 = vshrl.u32 %v4926_v24, %v3573_v21  ;;  %v876_v10 = vshrl.u32 %v4924_v27, %v3573_v21  ;;  %v878_v44 = vshll.u32 %v4924_v27, %v869_v5 }
  0x87   : > { %v879_v45 = vshrl.u32 %v4922_v17, %v3573_v21  ;;  %v862_v16 = vand.u32 8388607, %v4921_v33  ;;  %v883_v46 = vor.u32 %v882_v38, %v881_v34  ;;  %v886_v47 = vor.u32 %v885_v36, %v884_v35 }
  0x88   : > { %v339_v48 = vsub.s32 0, %v3588_v37  ;;  %v426_v50 = vsel %vm422_vm11, %v406_v30, %v3500_v51  ;;  %v482_v57 = vadd.s32 %v481_v39, %v472_v8  ;;  %vm890_vm4 = vcmp.lt.s32.totalorder %v3591_v41, 4 }
  0x89   : > { %vm338_vm5 = vcmp.lt.s32.totalorder %v3588_v37, 0  ;;  %v428_v58 = vsel %vm424_vm12, %v3502_v52, %v427_v6  ;;  %v3613_v59 = vadd.s32 %v459_v42, %v450_v53  ;;  %v3615_v49 = vadd.s32 %v475_v56, %v471_v55 }
  0x8a   : > { %v3617_v62 = vor.u32 %v873_v9, %v872_v43  ;;  %v3619_v63 = vor.u32 %v876_v10, %v875_v0  ;;  %v3621_v1 = vor.u32 %v879_v45, %v878_v44  ;;  %vm887_vm6 = vcmp.lt.s32.totalorder %v3591_v41, 1 }
  0x8b   : > { %vm889_vm7 = vcmp.lt.s32.totalorder %v3591_v41, 3  ;;  %v896_v51 = vsel %vm890_vm4, %v883_v46, 920167782  ;;  %v900_v52 = vsel %vm890_vm4, %v886_v47, 1326507024  ;;  %v340_v61 = vsel %vm338_vm5, %v339_v48, %v3588_v37 }
  0x8c   : > { %v429_v55 = vsel %vm423_vm13, %v426_v50, %v428_v58  ;;  %v486_v56 = vadd.s32 1, %v482_v57  ;;  %v863_v5 = vor.u32 8388608, %v862_v16  ;;  %vm485_vm8 = vc.u32 %v3613_v59, %v3615_v49  ;;  %v3669_v16 = vld [vmem:[%s3367_s11 + $0x10] sm:$0xff] }
  0x8d   : > { %vm888_vm9 = vcmp.lt.s32.totalorder %v3591_v41, 2  ;;  %v895_v14 = vsel %vm887_vm6, %v3617_v62, %v3619_v63  ;;  %v897_v15 = vsel %vm889_vm7, %v3621_v1, %v896_v51  ;;  %v899_v20 = vsel %vm887_vm6, %v3619_v63, %v3621_v1 }
  0x8e   : > { %v901_v18 = vsel %vm889_vm7, %v883_v46, %v900_v52  ;;  %v341_v23 = vclz %v340_v61  ;;  %v483_v25 = vmul.u32 %v3516_v60, %v429_v55  ;;  %v487_v26 = vsel %vm485_vm8, %v486_v56, %v482_v57 }
  0x8f   : > { %v3652_v28 = vshll.u32 %v863_v5, 8  ;;  %v898_v29 = vsel %vm888_vm9, %v895_v14, %v897_v15  ;;  %v902_v30 = vsel %vm888_vm9, %v899_v20, %v901_v18  ;;  %v1013_v6 = vand.u32 2139095040, %v3636_v12 }
  0x90   : > { %v2942_v34 = vadd.s32 4294967294, %v341_v23  ;;  %v3659_v38 = vadd.s32 %v487_v26, %v483_v25  ;;  %v907_v8 = vshrl.u32 %v902_v30, 16  ;;  %v929_v60 = vshrl.u32 %v898_v29, 16 }
  0x91   : > { %v1014_v35 = vshrl.u32 %v1013_v6, 23  ;;  %v904_v36 = vand.u32 65535, %v3652_v28  ;;  %v928_v42 = vand.u32 65535, %v898_v29  ;;  %v905_v0 = vshrl.u32 %v3652_v28, 16 }
  0x92   : > { %vm2943_vm10 = vcmp.lt.s32.totalorder %v2942_v34, 0  ;;  %v489_v53 = vadd.s32 536870912, %v3659_v38  ;;  %v906_v9 = vand.u32 65535, %v902_v30  ;;  %v4920_v61 = vand.u32 2147483647, %v3636_v12 }
  0x93   : > { %v2956_v39 = vadd.s32 4294967169, %v1014_v35  ;;  %v3664_v10 = vmul.u32 %v907_v8, %v904_v36  ;;  %v3666_v44 = vmul.u32 %v929_v60, %v904_v36  ;;  %v3671_v46 = vsel %vm2943_vm10, 0, %v2942_v34 }
  0x94   : > { %v3673_v47 = vshrl.u32 %v489_v53, 30  ;;  %v930_v48 = vmul.u32 %v928_v42, %v904_v36  ;;  %v908_v57 = vmul.u32 %v906_v9, %v904_v36  ;;  %v3675_v58 = vmul.u32 %v906_v9, %v905_v0 }
  0x95   : > { %v1020_v43 = vadd.s32 1, %v2956_v39  ;;  %v912_v51 = vshll.u32 %v3664_v10, 16  ;;  %v934_v52 = vshll.u32 %v3666_v44, 16  ;;  %v548_v56 = vand.u32 2139095040, %v3669_v16 }
  0x96   : > { %v329_v5 = vadd.s32 %v3556_v40, %v3551_v31  ;;  %v349_v14 = vsub.s32 4294967266, %v3671_v46  ;;  %v491_v15 = vshll.u32 %v3673_v47, 30  ;;  %v3687_v20 = vmul.u32 %v928_v42, %v905_v0 }
  0x97   : > { %vm1021_vm11 = vcmp.gt.s32.totalorder %v1020_v43, 0  ;;  %v911_v18 = vmul.u32 %v907_v8, %v905_v0  ;;  %v914_v23 = vshll.u32 %v3675_v58, 16  ;;  %vm916_vm12 = vc.u32 %v908_v57, %v912_v51 }
  0x98   : > { %v1022_v45 = vsel %vm1021_vm11, %v1020_v43, 0  ;;  %vm938_vm13 = vc.u32 %v930_v48, %v934_v52  ;;  %v1017_v25 = vand.u32 8388607, %v4920_v61  ;;  %v549_v31 = vshrl.u32 %v548_v56, 23 }
  0x99   : > { %v1024_v50 = vand.u32 31, %v1022_v45  ;;  %v918_v40 = vadd.s32 %v912_v51, %v908_v57  ;;  %v933_v30 = vmul.u32 %v929_v60, %v905_v0  ;;  %v917_v35 = vsel %vm916_vm12, 1, %v4937_v2 }
  0x9a   : > { %v936_v36 = vshll.u32 %v3687_v20, 16  ;;  %v3700_v8 = vadd.s32 %v934_v52, %v930_v48  ;;  %v3702_v39 = vshrl.u32 %v1022_v45, 5  ;;  %v939_v53 = vsel %vm938_vm13, 1, %v4937_v2 }
  0x9b   : > { %v3680_v55 = vsub.s32 32, %v1024_v50  ;;  %v1027_v26 = vshll.u32 %v4934_v22, %v1024_v50  ;;  %v1030_v6 = vshll.u32 %v4926_v24, %v1024_v50  ;;  %v1033_v42 = vshll.u32 %v4924_v27, %v1024_v50 }
  0x9c   : > { %v1036_v43 = vshll.u32 %v4922_v17, %v1024_v50  ;;  %v1018_v0 = vor.u32 8388608, %v1017_v25  ;;  %v2947_v51 = vadd.s32 4294967169, %v549_v31  ;;  %v1039_v52 = vshll.u32 %v4932_v19, %v1024_v50 }
  0x9d   : > { %v1028_v29 = vshrl.u32 %v4926_v24, %v3680_v55  ;;  %v1031_v34 = vshrl.u32 %v4924_v27, %v3680_v55  ;;  %v1034_v60 = vshrl.u32 %v4922_v17, %v3680_v55  ;;  %v1037_v57 = vshrl.u32 %v4932_v19, %v3680_v55 }
  0x9e   : > { %v1040_v56 = vshrl.u32 %v4930_v32, %v3680_v55  ;;  %vm1042_vm14 = vcmp.lt.s32.totalorder %v3702_v39, 1  ;;  %vm1044_vm15 = vcmp.lt.s32.totalorder %v3702_v39, 3  ;;  %vm1045_vm0 = vcmp.lt.s32.totalorder %v3702_v39, 4 }
  0x9f   : > { %v3709_v9 = vor.u32 %v1028_v29, %v1027_v26  ;;  %v3713_v48 = vor.u32 %v1031_v34, %v1030_v6  ;;  %v3715_v45 = vor.u32 %v1034_v60, %v1033_v42  ;;  %v1038_v61 = vor.u32 %v1037_v57, %v1036_v43 }
  0xa0   : > { %v345_v25 = vsub.s32 32, %v3671_v46  ;;  %v350_v26 = vadd.s32 127, %v349_v14  ;;  %vm920_vm1 = vc.u32 %v918_v40, %v914_v23  ;;  %vm942_vm2 = vc.u32 %v3700_v8, %v936_v36 }
  0xa1   : > { %v3728_v50 = vsub.s32 %v3659_v38, %v491_v15  ;;  %v919_v29 = vadd.s32 %v917_v35, %v911_v18  ;;  %v941_v31 = vadd.s32 %v939_v53, %v933_v30  ;;  %v1051_v6 = vsel %vm1045_vm0, %v1038_v61, 920167782 }
  0xa2   : > { %v1041_v34 = vor.u32 %v1040_v56, %v1039_v52  ;;  %vm1043_vm3 = vcmp.lt.s32.totalorder %v3702_v39, 2  ;;  %v1050_v14 = vsel %vm1042_vm14, %v3709_v9, %v3713_v48  ;;  %v1052_v23 = vsel %vm1044_vm15, %v3715_v45, %v1051_v6 }
  0xa3   : > { %v921_v38 = vsel %vm920_vm1, 1, %v4937_v2  ;;  %v943_v15 = vsel %vm942_vm2, 1, %v4937_v2  ;;  %v3742_v18 = vshll.u32 %v1018_v0, 8  ;;  %v555_v40 = vadd.s32 1, %v2947_v51 }
  0xa4   : > { %v346_v30 = vshll.u32 %v3588_v37, %v3671_v46  ;;  %v347_v35 = vshrl.u32 %v329_v5, %v345_v25  ;;  %v351_v53 = vshll.u32 %v350_v26, 23  ;;  %v494_v42 = vsub.s32 0, %v3728_v50 }
  0xa5   : > { %v913_v60 = vshrl.u32 %v3664_v10, 16  ;;  %v3750_v43 = vsel %vm1043_vm3, %v1050_v14, %v1052_v23  ;;  %v1054_v0 = vsel %vm1042_vm14, %v3713_v48, %v3715_v45  ;;  %v923_v57 = vadd.s32 %v921_v38, %v919_v29 }
  0xa6   : > { %v935_v51 = vshrl.u32 %v3666_v44, 16  ;;  %v945_v52 = vadd.s32 %v943_v15, %v941_v31  ;;  %v1055_v37 = vsel %vm1045_vm0, %v1041_v34, 1326507024  ;;  %v1059_v10 = vand.u32 65535, %v3742_v18 }
  0xa7   : > { %v1056_v46 = vsel %vm1044_vm15, %v1038_v61, %v1055_v37  ;;  %v1084_v5 = vshrl.u32 %v3750_v43, 16  ;;  %vm556_vm5 = vcmp.gt.s32.totalorder %v555_v40, 0  ;;  %vm493_vm8 = vcmp.lt.s32.totalorder %v3728_v50, 0 }
  0xa8   : > { %v871_v56 = vshrl.u32 %v4934_v22, %v3573_v21  ;;  %v892_v44 = vsel %vm890_vm4, %v3621_v1, 2102212464  ;;  %v1057_v25 = vsel %vm1043_vm3, %v1054_v0, %v1056_v46  ;;  %v348_v26 = vor.u32 %v347_v35, %v346_v30 }
  0xa9   : > { %v352_v29 = vor.u32 4788187, %v351_v53  ;;  %v915_v61 = vshrl.u32 %v3675_v58, 16  ;;  %v1062_v31 = vshrl.u32 %v1057_v25, 16  ;;  %v924_v6 = vadd.s32 %v923_v57, %v913_v60 }
  0xaa   : > { %v937_v34 = vshrl.u32 %v3687_v20, 16  ;;  %v946_v14 = vadd.s32 %v945_v52, %v935_v51  ;;  %v557_v23 = vsel %vm556_vm5, %v555_v40, 0  ;;  %v495_v38 = vsel %vm493_vm8, %v494_v42, %v3728_v50 }
  0xab   : > { %v1060_v21 = vshrl.u32 %v3742_v18, 16  ;;  %v1083_v15 = vand.u32 65535, %v3750_v43  ;;  %v3776_v1 = vmul.u32 %v1084_v5, %v1059_v10  ;;  %v891_v30 = vsel %vm887_vm6, %v871_v56, %v3617_v62 }
  0xac   : > { %v1061_v35 = vand.u32 65535, %v1057_v25  ;;  %v3781_v58 = vmul.u32 %v1062_v31, %v1059_v10  ;;  %v353_v53 = vand.u32 2147483647, %v352_v29  ;;  %v355_v60 = vcvt.s32.f32 %v348_v26 }
  0xad   : > { %v893_v40 = vsel %vm889_vm7, %v3619_v63, %v892_v44  ;;  %v559_v42 = vand.u32 31, %v557_v23  ;;  %v496_v0 = vclz %v495_v38  ;;  %v3786_v57 = vadd.s32 %v924_v6, %v915_v61 }
  0xae   : > { %v3791_v43 = vadd.s32 %v3700_v8, %v936_v36  ;;  %v947_v51 = vadd.s32 %v946_v14, %v937_v34  ;;  %v1085_v62 = vmul.u32 %v1083_v15, %v1059_v10  ;;  %v3793_v52 = vmul.u32 %v1083_v15, %v1060_v21 }
  0xaf   : > { %v1089_v37 = vshll.u32 %v3776_v1, 16  ;;  %v1063_v46 = vmul.u32 %v1061_v35, %v1059_v10  ;;  %v3796_v56 = vmul.u32 %v1061_v35, %v1060_v21  ;;  %v1067_v63 = vshll.u32 %v3781_v58, 16 }
  0xb0   : > { %v356_v44 = vmul.f32 %v355_v60, %v353_v53  ;;  %v894_v25 = vsel %vm888_vm9, %v891_v30, %v893_v40  ;;  %v3801_v26 = vsub.s32 32, %v559_v42  ;;  %v2945_v20 = vadd.s32 4294967294, %v496_v0 }
  0xb1   : > { %vm950_vm4 = vc.u32 %v3786_v57, %v3791_v43  ;;  %v951_v36 = vadd.s32 1, %v947_v51  ;;  %v4929_v8 = vand.u32 2147483647, %v3669_v16  ;;  %v1091_v29 = vshll.u32 %v3793_v52, 16 }
  0xb2   : > { %vm3807_vm6 = vc.u32 %v1085_v62, %v1089_v37  ;;  %v3811_v61 = vadd.s32 %v1089_v37, %v1085_v62  ;;  %v3813_v6 = vshrl.u32 %v557_v23, 5  ;;  %vm237_vm7 = vcmp.lt.s32.totalorder %v3382_v4, 0 }
  0xb3   : > { %v1069_v41 = vshll.u32 %v3796_v56, 16  ;;  %vm3817_vm9 = vc.u32 %v1063_v46, %v1067_v63  ;;  %v1073_v14 = vadd.s32 %v1067_v63, %v1063_v46  ;;  %v571_v38 = vshll.u32 %v4922_v17, %v559_v42 }
  0xb4   : > { %v562_v15 = vshll.u32 %v4934_v22, %v559_v42  ;;  %v563_v30 = vshrl.u32 %v4926_v24, %v3801_v26  ;;  %v565_v35 = vshll.u32 %v4926_v24, %v559_v42  ;;  %v566_v23 = vshrl.u32 %v4924_v27, %v3801_v26 }
  0xb5   : > { %v568_v53 = vshll.u32 %v4924_v27, %v559_v42  ;;  %v569_v60 = vshrl.u32 %v4922_v17, %v3801_v26  ;;  %v572_v40 = vshrl.u32 %v4932_v19, %v3801_v26  ;;  %v574_v0 = vshll.u32 %v4932_v19, %v559_v42 }
  0xb6   : > { %v948_v62 = vmul.u32 %v3652_v28, %v894_v25  ;;  %v952_v37 = vsel %vm950_vm4, %v951_v36, %v947_v51  ;;  %v1088_v46 = vmul.u32 %v1084_v5, %v1060_v21  ;;  %v552_v63 = vand.u32 8388607, %v4929_v8 }
  0xb7   : > { %v1066_v33 = vmul.u32 %v1062_v31, %v1060_v21  ;;  %v1094_v17 = vsel %vm3807_vm6, 1, %v4937_v2  ;;  %v573_v27 = vor.u32 %v572_v40, %v571_v38  ;;  %v575_v24 = vshrl.u32 %v4930_v32, %v3801_v26 }
  0xb8   : > { %v1072_v28 = vsel %vm3817_vm9, 1, %v4937_v2  ;;  %vm3848_vm10 = vc.u32 %v1073_v14, %v1069_v41  ;;  %vm3855_vm11 = vc.u32 %v3811_v61, %v1091_v29  ;;  %v3859_v31 = vor.u32 %v563_v30, %v562_v15 }
  0xb9   : > { %v3861_v21 = vor.u32 %v566_v23, %v565_v35  ;;  %v3863_v51 = vor.u32 %v569_v60, %v568_v53  ;;  %v576_v25 = vor.u32 %v575_v24, %v574_v0  ;;  %vm580_vm12 = vcmp.lt.s32.totalorder %v3813_v6, 4 }
  0xba   : > { %vm3868_vm13 = vcmp.le.f32.partialorder %v235_v13, 0.7853982  ;;  %v357_v10 = vxor.u32 2147483648, %v356_v44  ;;  %vm577_vm1 = vcmp.lt.s32.totalorder %v3813_v6, 1  ;;  %vm579_vm2 = vcmp.lt.s32.totalorder %v3813_v6, 3 }
  0xbb   : > { %vm2946_vm5 = vcmp.lt.s32.totalorder %v2945_v20, 0  ;;  %v1096_v41 = vadd.s32 %v1094_v17, %v1088_v46  ;;  %v553_v34 = vor.u32 8388608, %v552_v63  ;;  %v586_v14 = vsel %vm580_vm12, %v573_v27, 920167782 }
  0xbc   : > { %v3876_v24 = vadd.s32 %v952_v37, %v948_v62  ;;  %v1074_v38 = vadd.s32 %v1072_v28, %v1066_v33  ;;  %v1076_v13 = vsel %vm3848_vm10, 1, %v4937_v2  ;;  %v1098_v15 = vsel %vm3855_vm11, 1, %v4937_v2 }
  0xbd   : > { %vm578_vm8 = vcmp.lt.s32.totalorder %v3813_v6, 2  ;;  %v585_v17 = vsel %vm577_vm1, %v3859_v31, %v3861_v21  ;;  %v587_v30 = vsel %vm579_vm2, %v3863_v51, %v586_v14  ;;  %v590_v33 = vsel %vm580_vm12, %v576_v25, 1326507024 }
  0xbe   : > { %v358_v35 = vsel %vm237_vm7, %v357_v10, %v356_v44  ;;  %v359_v23 = vsub.s32 4, %v3569_v7  ;;  %v484_v53 = vadd.s32 %v3615_v49, %v3613_v59  ;;  %v589_v60 = vsel %vm577_vm1, %v3861_v21, %v3863_v51 }
  0xbf   : > { %v1090_v40 = vshrl.u32 %v3776_v1, 16  ;;  %v1100_v0 = vadd.s32 %v1098_v15, %v1096_v41  ;;  %v591_v62 = vsel %vm579_vm2, %v573_v27, %v590_v33  ;;  %v3906_v37 = vshll.u32 %v553_v34, 8 }
  0xc0   : > { %v3909_v44 = vsel %vm2946_vm5, 0, %v2945_v20  ;;  %v1068_v46 = vshrl.u32 %v3781_v58, 16  ;;  %v1078_v63 = vadd.s32 %v1076_v13, %v1074_v38  ;;  %v588_v59 = vsel %vm578_vm8, %v585_v17, %v587_v30 }
  0xc1   : > { %v954_v49 = vadd.s32 536870912, %v3876_v24  ;;  %v592_v1 = vsel %vm578_vm8, %v589_v60, %v591_v62  ;;  %v594_v28 = vand.u32 65535, %v3906_v37  ;;  %v595_v27 = vshrl.u32 %v3906_v37, 16 }
  0xc2   : > { %v3922_v20 = vsel %vm3868_vm13, %v3382_v4, %v358_v35  ;;  %v1026_v58 = vshrl.u32 %v4934_v22, %v3680_v55  ;;  %v1047_v42 = vsel %vm1045_vm0, %v3715_v45, 2102212464  ;;  %v1092_v5 = vshrl.u32 %v3793_v52, 16 }
  0xc3   : > { %v1101_v25 = vadd.s32 %v1100_v0, %v1090_v40  ;;  %v596_v10 = vand.u32 65535, %v592_v1  ;;  %v597_v41 = vshrl.u32 %v592_v1, 16  ;;  %v619_v34 = vshrl.u32 %v588_v59, 16 }
  0xc4   : > { %v504_v14 = vsub.s32 4294967266, %v3909_v44  ;;  %v1070_v38 = vshrl.u32 %v3796_v56, 16  ;;  %v1079_v13 = vadd.s32 %v1078_v63, %v1068_v46  ;;  %v618_v15 = vand.u32 65535, %v588_v59 }
  0xc5   : > { %v3932_v17 = vshrl.u32 %v954_v49, 30  ;;  %v598_v30 = vmul.u32 %v596_v10, %v594_v28  ;;  %v599_v55 = vmul.u32 %v597_v41, %v594_v28  ;;  %v3934_v33 = vmul.u32 %v596_v10, %v595_v27 }
  0xc6   : > { %v500_v45 = vsub.s32 32, %v3909_v44  ;;  %v1046_v35 = vsel %vm1042_vm14, %v1026_v58, %v3709_v9  ;;  %v1048_v60 = vsel %vm1044_vm15, %v3713_v48, %v1047_v42  ;;  %v3943_v40 = vmul.u32 %v619_v34, %v594_v28 }
  0xc7   : > { %v3948_v56 = vadd.s32 %v3811_v61, %v1091_v29  ;;  %v1102_v0 = vadd.s32 %v1101_v25, %v1092_v5  ;;  %v602_v62 = vshll.u32 %v599_v55, 16  ;;  %v604_v46 = vshll.u32 %v3934_v33, 16 }
  0xc8   : > { %v3951_v63 = vadd.s32 %v1079_v13, %v1070_v38  ;;  %v601_v59 = vmul.u32 %v597_v41, %v595_v27  ;;  %v620_v49 = vmul.u32 %v618_v15, %v594_v28  ;;  %v624_v9 = vshll.u32 %v3943_v40, 16 }
  0xc9   : > { %v505_v1 = vadd.s32 127, %v504_v14  ;;  %v956_v48 = vshll.u32 %v3932_v17, 30  ;;  %vm606_vm14 = vc.u32 %v598_v30, %v602_v62  ;;  %v608_v58 = vadd.s32 %v602_v62, %v598_v30  ;;  %v3974_v14 = vld [vmem:[%s3367_s11 + $0x18] sm:$0xff] }
  0xca   : > { %v360_v52 = vsel %vm237_vm7, %v359_v23, %v3569_v7  ;;  %v3960_v29 = vmul.f32 %v3922_v20, %v3922_v20  ;;  %v607_v61 = vsel %vm606_vm14, 1, %v4937_v2  ;;  %v622_v42 = vmul.u32 %v618_v15, %v595_v27  ;;  %4966 = vst [vmem:[#allocation11_spill] sm:$0xff] %v3974_v14 }
  0xcb   : > { %v501_v28 = vshll.u32 %v3728_v50, %v3909_v44  ;;  %v1049_v5 = vsel %vm1043_vm3, %v1046_v35, %v1048_v60  ;;  %v1106_v25 = vadd.s32 1, %v1102_v0  ;;  %vm610_vm15 = vc.u32 %v608_v58, %v604_v46 }
  0xcc   : > { %vm392_vm0 = vcmp.lt.s32.totalorder %v3391_v11, 0  ;;  %vm1105_vm4 = vc.u32 %v3951_v63, %v3948_v56  ;;  %v609_v4 = vadd.s32 %v607_v61, %v601_v59  ;;  %v623_v7 = vmul.u32 %v619_v34, %v595_v27 }
  0xcd   : > { %vm628_vm6 = vc.u32 %v620_v49, %v624_v9  ;;  %v502_v23 = vshrl.u32 %v484_v53, %v500_v45  ;;  %v506_v10 = vshll.u32 %v505_v1, 23  ;;  %v3971_v41 = vsub.s32 %v3876_v24, %v956_v48 }
  0xce   : > { %v611_v39 = vsel %vm610_vm15, 1, %v4937_v2  ;;  %v364_v50 = vmul.f32 -0.001358992, %v3960_v29  ;;  %v514_v44 = vsub.s32 4, %v3673_v47  ;;  %v626_v38 = vshll.u32 %v622_v42, 16 }
  0xcf   : > { %v629_v13 = vsel %vm628_vm6, 1, %v4937_v2  ;;  %v371_v15 = vmul.f32 -0.00019511016, %v3960_v29  ;;  %v1103_v27 = vmul.u32 %v3742_v18, %v1049_v5  ;;  %v1107_v53 = vsel %vm1105_vm4, %v1106_v25, %v1102_v0 }
  0xd0   : > { %v630_v34 = vadd.s32 %v624_v9, %v620_v49  ;;  %v603_v30 = vshrl.u32 %v599_v55, 16  ;;  %v613_v24 = vadd.s32 %v611_v39, %v609_v4  ;;  %v631_v45 = vadd.s32 %v629_v13, %v623_v7 }
  0xd1   : > { %v703_v35 = vand.u32 2139095040, %v3974_v14  ;;  %v503_v60 = vor.u32 %v502_v23, %v501_v28  ;;  %v507_v62 = vor.u32 4788187, %v506_v10  ;;  %vm958_vm3 = vcmp.lt.s32.totalorder %v3971_v41, 0 }
  0xd2   : > { %v959_v46 = vsub.s32 0, %v3971_v41  ;;  %v561_v59 = vshrl.u32 %v4934_v22, %v3801_v26  ;;  %v625_v1 = vshrl.u32 %v3943_v40, 16  ;;  %vm632_vm7 = vc.u32 %v630_v34, %v626_v38 }
  0xd3   : > { %v704_v18 = vshrl.u32 %v703_v35, 23  ;;  %v3988_v0 = vadd.s32 %v1107_v53, %v1103_v27  ;;  %v582_v55 = vsel %vm580_vm12, %v3863_v51, 2102212464  ;;  %v605_v49 = vshrl.u32 %v3934_v33, 16 }
  0xd4   : > { %v633_v9 = vsel %vm632_vm7, 1, %v4937_v2  ;;  %v614_v48 = vadd.s32 %v613_v24, %v603_v30  ;;  %v627_v58 = vshrl.u32 %v622_v42, 16  ;;  %v365_v5 = vadd.f32 0.041655596, %v364_v50 }
  0xd5   : > { %v635_v61 = vadd.s32 %v633_v9, %v631_v45  ;;  %v2950_v28 = vadd.s32 4294967169, %v704_v18  ;;  %v372_v26 = vadd.f32 0.008332121, %v371_v15  ;;  %vm3997_vm9 = vcmp.le.f32.partialorder %v390_v3, 0.7853982 }
  0xd6   : > { %v515_v51 = vsel %vm392_vm0, %v514_v44, %v3673_v47  ;;  %v508_v25 = vand.u32 2147483647, %v507_v62  ;;  %v510_v33 = vcvt.s32.f32 %v503_v60  ;;  %v960_v42 = vsel %vm958_vm3, %v959_v46, %v3971_v41 }
  0xd7   : > { %v636_v4 = vadd.s32 %v635_v61, %v625_v1  ;;  %v710_v7 = vadd.s32 1, %v2950_v28  ;;  %v1109_v23 = vadd.s32 536870912, %v3988_v0  ;;  %v581_v3 = vsel %vm577_vm1, %v561_v59, %v3859_v31 }
  0xd8   : > { %v583_v10 = vsel %vm579_vm2, %v3861_v21, %v582_v55  ;;  %v4014_v39 = vadd.s32 %v614_v48, %v605_v49  ;;  %v4016_v47 = vadd.s32 %v630_v34, %v626_v38  ;;  %v362_v44 = vsel %vm3868_vm13, 0, %v360_v52 }
  0xd9   : > { %v637_v50 = vadd.s32 %v636_v4, %v627_v58  ;;  %vm711_vm10 = vcmp.gt.s32.totalorder %v710_v7, 0  ;;  %v366_v13 = vmul.f32 %v365_v5, %v3960_v29  ;;  %v517_v15 = vsel %vm3997_vm9, 0, %v515_v51 }
  0xda   : > { %v712_v27 = vsel %vm711_vm10, %v710_v7, 0  ;;  %v373_v31 = vmul.f32 %v372_v26, %v3960_v29  ;;  %v511_v53 = vmul.f32 %v510_v33, %v508_v25  ;;  %v4928_v21 = vand.u32 2147483647, %v3974_v14 }
  0xdb   : > { %v714_v30 = vand.u32 31, %v712_v27  ;;  %v961_v24 = vclz %v960_v42  ;;  %v4025_v38 = vshrl.u32 %v1109_v23, 30  ;;  %v584_v34 = vsel %vm578_vm8, %v581_v3, %v583_v10 }
  0xdc   : > { %v641_v36 = vadd.s32 1, %v637_v50  ;;  %vm640_vm11 = vc.u32 %v4014_v39, %v4016_v47  ;;  %v367_v45 = vadd.f32 -0.4999988, %v366_v13  ;;  %v4033_v35 = vand.u32 3, %v362_v44 }
  0xdd   : > { %v4031_v52 = vsub.s32 32, %v714_v30  ;;  %v4035_v60 = vadd.s32 3, %v362_v44  ;;  %v4037_v62 = vadd.s32 3, %v517_v15  ;;  %v374_v46 = vadd.f32 -0.16666654, %v373_v31 }
  0xde   : > { %v512_v59 = vxor.u32 2147483648, %v511_v53  ;;  %v638_v1 = vmul.u32 %v3906_v37, %v584_v34  ;;  %v707_v6 = vand.u32 8388607, %v4928_v21  ;;  %v2954_v18 = vadd.s32 4294967294, %v961_v24  ;;  %v4072_v34 = vld [vmem:[%s3367_s11 + $0x30] sm:$0xff] }
  0xdf   : > { %v1111_v55 = vshll.u32 %v4025_v38, 30  ;;  %v642_v49 = vsel %vm640_vm11, %v641_v36, %v637_v50  ;;  %v4969_v9 = vmov 2475754826   ;;  %v4970_v58 = vmov 2131351028  }
  0xe0   : > { %v720_v48 = vshll.u32 %v4969_v9, %v714_v30  ;;  %v721_v61 = vshrl.u32 %v4970_v58, %v4031_v52  ;;  %v723_v28 = vshll.u32 %v4970_v58, %v714_v30  ;;  %v4971_v5 = vmov 2102212464  }
  0xe1   : > { %v724_v26 = vshrl.u32 %v4971_v5, %v4031_v52  ;;  %v726_v51 = vshll.u32 %v4971_v5, %v714_v30  ;;  %v4050_v37 = vshrl.u32 %v712_v27, 5  ;;  %v717_v25 = vshll.u32 %v4934_v22, %v714_v30 }
  0xe2   : > { %v718_v33 = vshrl.u32 %v4969_v9, %v4031_v52  ;;  %v727_v4 = vshrl.u32 %v4932_v19, %v4031_v52  ;;  %v4057_v7 = vadd.s32 %v642_v49, %v638_v1  ;;  %v708_v42 = vor.u32 8388608, %v707_v6 }
  0xe3   : > { %v729_v23 = vshll.u32 %v4932_v19, %v714_v30  ;;  %v730_v3 = vshrl.u32 %v4930_v32, %v4031_v52  ;;  %v368_v10 = vmul.f32 %v367_v45, %v3960_v29  ;;  %v513_v50 = vsel %vm392_vm0, %v512_v59, %v511_v53  ;;  %v3066_v59 = vld [vmem:[%s3367_s11 + $0x8] sm:$0xff] }
  0xe4   : > { %v4065_v44 = vand.u32 3, %v517_v15  ;;  %vm2955_vm12 = vcmp.lt.s32.totalorder %v2954_v18, 0  ;;  %v4067_v13 = vor.u32 %v721_v61, %v720_v48  ;;  %v4069_v27 = vor.u32 %v724_v26, %v723_v28 }
  0xe5   : > { %v728_v31 = vor.u32 %v727_v4, %v726_v51  ;;  %v731_v24 = vor.u32 %v730_v3, %v729_v23  ;;  %v375_v30 = vmul.f32 %v374_v46, %v3960_v29  ;;  %v4076_v36 = vsub.s32 %v3988_v0, %v1111_v55 }
  0xe6   : > { %v4078_v45 = vor.u32 %v718_v33, %v717_v25  ;;  %vm732_vm13 = vcmp.lt.s32.totalorder %v4050_v37, 1  ;;  %v964_v11 = vsel %vm2955_vm12, 0, %v2954_v18  ;;  %v644_v15 = vadd.s32 536870912, %v4057_v7 }
  0xe7   : > { %vm735_vm1 = vcmp.lt.s32.totalorder %v4050_v37, 4  ;;  %v4083_v53 = vshll.u32 %v708_v42, 8  ;;  %v4088_v1 = vsel %vm3997_vm9, %v3066_v59, %v513_v50  ;;  %v949_v29 = vadd.s32 %v3791_v43, %v3786_v57 }
  0xe8   : > { %vm734_vm2 = vcmp.lt.s32.totalorder %v4050_v37, 3  ;;  %v1168_v0 = vand.u32 2139095040, %v4072_v34  ;;  %vm733_vm5 = vcmp.lt.s32.totalorder %v4050_v37, 2  ;;  %v741_v46 = vsel %vm735_vm1, %v728_v31, 920167782 }
  0xe9   : > { %v744_v6 = vsel %vm732_vm13, %v4067_v13, %v4069_v27  ;;  %v745_v40 = vsel %vm735_vm1, %v731_v24, 1326507024  ;;  %v965_v18 = vsub.s32 32, %v964_v11  ;;  %v969_v55 = vsub.s32 4294967266, %v964_v11 }
  0xea   : > { %v1114_v57 = vsub.s32 0, %v4076_v36  ;;  %v740_v43 = vsel %vm732_vm13, %v4078_v45, %v4067_v13  ;;  %v4108_v49 = vshrl.u32 %v644_v15, 30  ;;  %v742_v48 = vsel %vm734_vm2, %v4069_v27, %v741_v46 }
  0xeb   : > { %v746_v61 = vsel %vm734_vm2, %v728_v31, %v745_v40  ;;  %v749_v28 = vand.u32 65535, %v4083_v53  ;;  %v376_v26 = vadd.f32 1.0, %v375_v30  ;;  %vm1113_vm8 = vcmp.lt.s32.totalorder %v4076_v36, 0 }
  0xec   : > { %v747_v51 = vsel %vm733_vm5, %v744_v6, %v746_v61  ;;  %v750_v25 = vshrl.u32 %v4083_v53, 16  ;;  %v743_v33 = vsel %vm733_vm5, %v740_v43, %v742_v48  ;;  %v1169_v23 = vshrl.u32 %v1168_v0, 23 }
  0xed   : > { %v751_v4 = vand.u32 65535, %v747_v51  ;;  %v752_v42 = vshrl.u32 %v747_v51, 16  ;;  %v4124_v3 = vmul.f32 %v4088_v1, %v4088_v1  ;;  %v4127_v50 = vand.u32 3, %v4035_v60 }
  0xee   : > { %v966_v31 = vshll.u32 %v3971_v41, %v964_v11  ;;  %v967_v24 = vshrl.u32 %v949_v29, %v965_v18  ;;  %v970_v30 = vadd.s32 127, %v969_v55  ;;  %v1115_v15 = vsel %vm1113_vm8, %v1114_v57, %v4076_v36 }
  0xef   : > { %v646_v59 = vshll.u32 %v4108_v49, 30  ;;  %v754_v46 = vmul.u32 %v752_v42, %v749_v28  ;;  %v753_v6 = vmul.u32 %v751_v4, %v749_v28  ;;  %v755_v40 = vmul.u32 %v751_v4, %v750_v25 }
  0xf0   : > { %v773_v43 = vand.u32 65535, %v743_v33  ;;  %v774_v0 = vshrl.u32 %v743_v33, 16  ;;  %v4132_v48 = vadd.f32 1.0, %v368_v10  ;;  %v4135_v61 = vmul.f32 %v376_v26, %v3922_v20 }
  0xf1   : > { %v519_v60 = vmul.f32 -0.001358992, %v4124_v3  ;;  %v2959_v51 = vadd.s32 4294967169, %v1169_v23  ;;  %v4139_v41 = vmul.f32 -0.00019511016, %v4124_v3  ;;  %v756_v11 = vmul.u32 %v752_v42, %v750_v25 }
  0xf2   : > { %v757_v29 = vshll.u32 %v754_v46, 16  ;;  %v759_v18 = vshll.u32 %v755_v40, 16  ;;  %v4141_v55 = vor.u32 %v967_v24, %v966_v31  ;;  %v971_v57 = vshll.u32 %v970_v30, 23 }
  0xf3   : > { %v1116_v4 = vclz %v1115_v15  ;;  %v4144_v33 = vsub.s32 %v4057_v7, %v646_v59  ;;  %v775_v20 = vmul.u32 %v773_v43, %v749_v28  ;;  %v776_v26 = vmul.u32 %v774_v0, %v749_v28 }
  0xf4   : > { %vm761_vm14 = vc.u32 %v753_v6, %v757_v29  ;;  %v763_v10 = vadd.s32 %v757_v29, %v753_v6  ;;  %v758_v21 = vshrl.u32 %v754_v46, 16  ;;  %v777_v8 = vmul.u32 %v773_v43, %v750_v25 }
  0xf5   : > { %v762_v23 = vsel %vm761_vm14, 1, %v4937_v2  ;;  %v1175_v32 = vadd.s32 1, %v2959_v51  ;;  %v778_v42 = vmul.u32 %v774_v0, %v750_v25  ;;  %v779_v22 = vshll.u32 %v776_v26, 16 }
  0xf6   : > { %v764_v19 = vadd.s32 %v762_v23, %v756_v11  ;;  %vm765_vm15 = vc.u32 %v763_v10, %v759_v18  ;;  %v972_v31 = vor.u32 4788187, %v971_v57  ;;  %v2957_v24 = vadd.s32 4294967294, %v1116_v4 }
  0xf7   : > { %v4972_v30 = vmov 683565275   ;;  %v766_v7 = vsel %vm765_vm15, 1, %v4937_v2  ;;  %v649_v59 = vsub.s32 0, %v4144_v33  ;;  %v781_v28 = vshll.u32 %v777_v8, 16 }
  0xf8   : > { %v716_v15 = vshrl.u32 %v4972_v30, %v4031_v52  ;;  %v768_v6 = vadd.s32 %v766_v7, %v764_v19  ;;  %vm783_vm0 = vc.u32 %v775_v20, %v779_v22  ;;  %v737_v46 = vsel %vm735_vm1, %v4069_v27, 2102212464 }
  0xf9   : > { %v784_v43 = vsel %vm783_vm0, 1, %v4937_v2  ;;  %v785_v25 = vadd.s32 %v779_v22, %v775_v20  ;;  %vm1176_vm4 = vcmp.gt.s32.totalorder %v1175_v32, 0  ;;  %v760_v0 = vshrl.u32 %v755_v40, 16 }
  0xfa   : > { %v769_v51 = vadd.s32 %v768_v6, %v758_v21  ;;  %v786_v11 = vadd.s32 %v784_v43, %v778_v42  ;;  %v1177_v29 = vsel %vm1176_vm4, %v1175_v32, 0  ;;  %vm648_vm6 = vcmp.lt.s32.totalorder %v4144_v33, 0 }
  0xfb   : > { %v780_v52 = vshrl.u32 %v776_v26, 16  ;;  %vm787_vm3 = vc.u32 %v785_v25, %v781_v28  ;;  %v4936_v19 = vand.u32 2147483647, %v4072_v34  ;;  %v973_v18 = vand.u32 2147483647, %v972_v31 }
  0xfc   : > { %v975_v57 = vcvt.s32.f32 %v4141_v55  ;;  %v788_v4 = vsel %vm787_vm3, 1, %v4937_v2  ;;  %v1179_v27 = vand.u32 31, %v1177_v29  ;;  %v736_v22 = vsel %vm732_vm13, %v716_v15, %v4078_v45 }
  0xfd   : > { %v738_v32 = vsel %vm734_vm2, %v4067_v13, %v737_v46  ;;  %v782_v21 = vshrl.u32 %v777_v8, 16  ;;  %v790_v40 = vadd.s32 %v788_v4, %v786_v11  ;;  %v650_v10 = vsel %vm648_vm6, %v649_v59, %v4144_v33  ;;  %v4186_v46 = vld [vmem:[%s3367_s11 + $0x20] sm:$0xff] }
  0xfe   : > { %v4166_v20 = vadd.s32 %v769_v51, %v760_v0  ;;  %v4168_v26 = vadd.s32 %v785_v25, %v781_v28  ;;  %v4170_v55 = vsub.s32 32, %v1179_v27  ;;  %v520_v23 = vadd.f32 0.041655596, %v519_v60 }
  0xff   : > { %vm2958_vm7 = vcmp.lt.s32.totalorder %v2957_v24, 0  ;;  %v791_v42 = vadd.s32 %v790_v40, %v780_v52  ;;  %v1172_v45 = vand.u32 8388607, %v4936_v19  ;;  %v739_v13 = vsel %vm733_vm5, %v736_v22, %v738_v32 }
 0x100   : > { %v1185_v8 = vshll.u32 %v4969_v9, %v1179_v27  ;;  %v1186_v31 = vshrl.u32 %v4970_v58, %v4170_v55  ;;  %v1188_v15 = vshll.u32 %v4970_v58, %v1179_v27  ;;  %v651_v7 = vclz %v650_v10 }
 0x101   : > { %v792_v59 = vadd.s32 %v791_v42, %v782_v21  ;;  %v4180_v6 = vshrl.u32 %v1177_v29, 5  ;;  %v1189_v60 = vshrl.u32 %v4971_v5, %v4170_v55  ;;  %v527_v28 = vadd.f32 0.008332121, %v4139_v41 }
 0x102   : > { %vm857_vm9 = vcmp.lt.s32.totalorder %v4186_v46, 0  ;;  %v976_v37 = vmul.f32 %v975_v57, %v973_v18  ;;  %vm795_vm10 = vc.u32 %v4166_v20, %v4168_v26  ;;  %v4973_v43 = vmov 920167782  }
 0x103   : > { %v1194_v25 = vshll.u32 %v4973_v43, %v1179_v27  ;;  %v793_v0 = vmul.u32 %v4083_v53, %v739_v13  ;;  %v796_v51 = vadd.s32 1, %v792_v59  ;;  %v1191_v11 = vshll.u32 %v4971_v5, %v1179_v27 }
 0x104   : > { %v1192_v29 = vshrl.u32 %v4973_v43, %v4170_v55  ;;  %v4197_v41 = vsel %vm2958_vm7, 0, %v2957_v24  ;;  %v4199_v52 = vor.u32 %v1186_v31, %v1185_v8  ;;  %v4201_v4 = vor.u32 %v1189_v60, %v1188_v15 }
 0x105   : > { %v4974_v18 = vmov 1326507024   ;;  %vm1673_vm11 = vcmp.eq.s32.totalorder %v4033_v35, 2  ;;  %v4975_v53 = vand.u32 2147483647, %v3507_v54  ;;  %v2948_v32 = vadd.s32 4294967294, %v651_v7 }
 0x106   : > { %v1195_v57 = vshrl.u32 %v4974_v18, %v4170_v55  ;;  %v797_v21 = vsel %vm795_vm10, %v796_v51, %v792_v59  ;;  %v1173_v40 = vor.u32 8388608, %v1172_v45  ;;  %vm1197_vm13 = vcmp.lt.s32.totalorder %v4180_v6, 1 }
 0x107   : > { %vm4208_vm12 = vcmp.le.f32.partialorder %v4975_v53, 0.7853982  ;;  %v1182_v24 = vshll.u32 %v4972_v30, %v1179_v27  ;;  %v1183_v10 = vshrl.u32 %v4969_v9, %v4170_v55  ;;  %vm1200_vm1 = vcmp.lt.s32.totalorder %v4180_v6, 4 }
 0x108   : > { %v1196_v42 = vor.u32 %v1195_v57, %v1194_v25  ;;  %vm1670_vm2 = vcmp.eq.s32.totalorder %v4033_v35, 0  ;;  %v1124_v54 = vsub.s32 4294967266, %v4197_v41  ;;  %v4219_v13 = vadd.s32 %v797_v21, %v793_v0 }
 0x109   : > { %v1193_v8 = vor.u32 %v1192_v29, %v1191_v11  ;;  %vm1199_vm5 = vcmp.lt.s32.totalorder %v4180_v6, 3  ;;  %v521_v45 = vmul.f32 %v520_v23, %v4124_v3  ;;  %v528_v31 = vmul.f32 %v527_v28, %v4124_v3 }
 0x10a   : > { %vm1198_vm8 = vcmp.lt.s32.totalorder %v4180_v6, 2  ;;  %v1209_v27 = vsel %vm1197_vm13, %v4199_v52, %v4201_v4  ;;  %v977_v15 = vxor.u32 2147483648, %v976_v37  ;;  %v1104_v7 = vadd.s32 %v3948_v56, %v3951_v63 }
 0x10b   : > { %v1210_v59 = vsel %vm1200_vm1, %v1196_v42, 1326507024  ;;  %v4233_v60 = vshll.u32 %v1173_v40, 8  ;;  %v1120_v23 = vsub.s32 32, %v4197_v41  ;;  %vm2949_vm14 = vcmp.lt.s32.totalorder %v2948_v32, 0 }
 0x10c   : > { %v4236_v28 = vor.u32 %v1183_v10, %v1182_v24  ;;  %v1211_v25 = vsel %vm1199_vm5, %v1193_v8, %v1210_v59  ;;  %vm1669_vm15 = vcmp.lt.s32.totalorder %v4033_v35, 2  ;;  %v1125_v0 = vadd.s32 127, %v1124_v54 }
 0x10d   : > { %v799_v51 = vadd.s32 536870912, %v4219_v13  ;;  %v1206_v56 = vsel %vm1200_vm1, %v1193_v8, 920167782  ;;  %v4246_v63 = vsel %vm1198_vm8, %v1209_v27, %v1211_v25  ;;  %v383_v11 = vxor.u32 2147483648, %v4135_v61 }
 0x10e   : > { %v386_v29 = vxor.u32 2147483648, %v4132_v48  ;;  %vm385_vm0 = vcmp.eq.s32.totalorder %v4127_v50, 2  ;;  %v4252_v57 = vand.u32 3, %v4037_v62  ;;  %v978_v53 = vsel %vm857_vm9, %v977_v15, %v976_v37 }
 0x10f   : > { %v4256_v21 = vsel %vm2949_vm14, 0, %v2948_v32  ;;  %v4259_v40 = vand.u32 65535, %v4233_v60  ;;  %v1217_v24 = vshrl.u32 %v4246_v63, 16  ;;  %v522_v10 = vadd.f32 -0.4999988, %v521_v45 }
 0x110   : > { %v529_v42 = vadd.f32 -0.16666654, %v528_v31  ;;  %v1205_v54 = vsel %vm1197_vm13, %v4236_v28, %v4199_v52  ;;  %v1207_v62 = vsel %vm1199_vm5, %v4201_v4, %v1206_v56  ;;  %vm381_vm4 = vcmp.lt.s32.totalorder %v4127_v50, 2  ;;  %v3068_v56 = vld [vmem:[%s3367_s11] sm:$0xff] }
 0x111   : > { %v1121_v37 = vshll.u32 %v4076_v36, %v4197_v41  ;;  %v1122_v32 = vshrl.u32 %v1104_v7, %v1120_v23  ;;  %v1126_v8 = vshll.u32 %v1125_v0, 23  ;;  %v4272_v27 = vshrl.u32 %v799_v51, 30 }
 0x112   : > { %v1675_v45 = vsel %vm1673_vm11, %v386_v29, %v4135_v61  ;;  %vm382_vm6 = vcmp.eq.s32.totalorder %v4127_v50, 0  ;;  %v4281_v31 = vsel %vm4208_vm12, %v4186_v46, %v978_v53  ;;  %v659_v15 = vsub.s32 4294967266, %v4256_v21 }
 0x113   : > { %4978 = vst [vmem:[#allocation12_spill] sm:$0xff] %v4272_v27  ;;  %v4286_v36 = vsel %vm1198_vm8, %v1205_v54, %v1207_v62  ;;  %v4289_v41 = vshrl.u32 %v4233_v60, 16  ;;  %v1216_v7 = vand.u32 65535, %v4246_v63  ;;  %v4293_v59 = vmul.u32 %v1217_v24, %v4259_v40 }
 0x114   : > { %v523_v23 = vmul.f32 %v522_v10, %v4124_v3  ;;  %v530_v25 = vmul.f32 %v529_v42, %v4124_v3  ;;  %v1672_v0 = vsel %vm1670_vm2, %v4132_v48, %v383_v11  ;;  %v387_v51 = vsel %vm385_vm0, %v386_v29, %v4135_v61 }
 0x115   : > { %vm378_vm3 = vweird.f32 %v3068_v56  ;;  %v4306_v63 = vmul.f32 %v4281_v31, %v4281_v31  ;;  %v1123_v53 = vor.u32 %v1122_v32, %v1121_v37  ;;  %v1127_v54 = vor.u32 4788187, %v1126_v8 }
 0x116   : > { %v801_v10 = vshll.u32 %v4272_v27, 30  ;;  %vm1827_vm7 = vcmp.eq.s32.totalorder %v4065_v44, 2  ;;  %v384_v3 = vsel %vm382_vm6, %v4132_v48, %v383_v11  ;;  %v639_v42 = vadd.s32 %v4016_v47, %v4014_v39 }
 0x117   : > { %v655_v61 = vsub.s32 32, %v4256_v21  ;;  %v1239_v29 = vshrl.u32 %v4286_v36, 16  ;;  %v660_v62 = vadd.s32 127, %v659_v15  ;;  %v1218_v19 = vmul.u32 %v1216_v7, %v4259_v40 }
 0x118   : > { %v4319_v37 = vmul.u32 %v1216_v7, %v4289_v41  ;;  %v1222_v32 = vshll.u32 %v4293_v59, 16  ;;  %v4322_v8 = vadd.f32 1.0, %v523_v23  ;;  %v531_v2 = vadd.f32 1.0, %v530_v25 }
 0x119   : > { %v1676_v48 = vsel %vm1669_vm15, %v1672_v0, %v1675_v45  ;;  %v984_v39 = vmul.f32 -0.001358992, %v4306_v63  ;;  %v991_v47 = vmul.f32 -0.00019511016, %v4306_v63  ;;  %v1128_v11 = vand.u32 2147483647, %v1127_v54 }
 0x11a   : > { %v1130_v27 = vcvt.s32.f32 %v1123_v53  ;;  %v4329_v15 = vsub.s32 %v4219_v13, %v801_v10  ;;  %v656_v7 = vshll.u32 %v4144_v33, %v4256_v21  ;;  %v657_v14 = vshrl.u32 %v639_v42, %v655_v61 }
 0x11b   : > { %v1238_v23 = vand.u32 65535, %v4286_v36  ;;  %v4335_v25 = vmul.u32 %v1239_v29, %v4259_v40  ;;  %v661_v35 = vshll.u32 %v660_v62, 23  ;;  %v1224_v45 = vshll.u32 %v4319_v37, 16 }
 0x11c   : > { %vm1226_vm10 = vc.u32 %v1218_v19, %v1222_v32  ;;  %v1228_v0 = vadd.s32 %v1222_v32, %v1218_v19  ;;  %v4339_v54 = vmul.f32 %v531_v2, %v4088_v1  ;;  %v541_v13 = vxor.u32 2147483648, %v4322_v8 }
 0x11d   : > { %v388_v53 = vsel %vm381_vm4, %v384_v3, %v387_v51  ;;  %v979_v33 = vsub.s32 4, %v3932_v17  ;;  %vm1824_vm11 = vcmp.eq.s32.totalorder %v4065_v44, 0  ;;  %v985_v21 = vadd.f32 0.041655596, %v984_v39 }
 0x11e   : > { %v992_v36 = vadd.f32 0.008332121, %v991_v47  ;;  %v804_v10 = vsub.s32 0, %v4329_v15  ;;  %v1221_v42 = vmul.u32 %v1217_v24, %v4289_v41  ;;  %vm803_vm2 = vcmp.lt.s32.totalorder %v4329_v15, 0 }
 0x11f   : > { %v4979_v19 = vmov 0   ;;  %v1240_v1 = vmul.u32 %v1238_v23, %v4259_v40  ;;  %v1244_v61 = vshll.u32 %v4335_v25, 16  ;;  %v1131_v50 = vmul.f32 %v1130_v27, %v1128_v11 }
 0x120   : > { %v1227_v2 = vsel %vm1226_vm10, 1, %v4979_v19  ;;  %v658_v51 = vor.u32 %v657_v14, %v656_v7  ;;  %v662_v3 = vor.u32 4788187, %v661_v35  ;;  %vm1230_vm14 = vc.u32 %v1228_v0, %v1224_v45  ;;  %v4377_v0 = vld [vmem:[%s3367_s11 + $0x28] sm:$0xff] }
 0x121   : > { %v538_v62 = vxor.u32 2147483648, %v4339_v54  ;;  %v4354_v32 = vsel %vm378_vm3, nan, %v1676_v48  ;;  %v4357_v24 = vsel %vm378_vm3, nan, %v388_v53  ;;  %vm540_vm15 = vcmp.eq.s32.totalorder %v4252_v57, 2  ;;  %4980 = vst [vmem:[#allocation13_spill] sm:$0xff] %v4377_v0 }
 0x122   : > { %v4363_v40 = vsel %vm1827_vm7, %v541_v13, %v4339_v54  ;;  %v805_v14 = vsel %vm803_vm2, %v804_v10, %v4329_v15  ;;  %v1229_v27 = vadd.s32 %v1227_v2, %v1221_v42  ;;  %v4367_v39 = vmul.u32 %v1238_v23, %v4289_v41 }
 0x123   : > { %v986_v48 = vmul.f32 %v985_v21, %v4306_v63  ;;  %v993_v56 = vmul.f32 %v992_v36, %v4306_v63  ;;  %v1231_v47 = vsel %vm1230_vm14, 1, %v4979_v19  ;;  %vm1248_vm0 = vc.u32 %v1240_v1, %v1244_v61 }
 0x124   : > { %v980_v11 = vsel %vm857_vm9, %v979_v33, %v3932_v17  ;;  %v1132_v7 = vxor.u32 2147483648, %v1131_v50  ;;  %v663_v35 = vand.u32 2147483647, %v662_v3  ;;  %v665_v45 = vcvt.s32.f32 %v658_v51 }
 0x125   : > { %vm537_vm4 = vcmp.eq.s32.totalorder %v4252_v57, 0  ;;  %vm1012_vm6 = vcmp.lt.s32.totalorder %v4377_v0, 0  ;;  %v806_v23 = vclz %v805_v14  ;;  %v1223_v53 = vshrl.u32 %v4293_v59, 16 }
 0x126   : > { %v1243_v21 = vmul.u32 %v1239_v29, %v4289_v41  ;;  %v1233_v36 = vadd.s32 %v1231_v47, %v1229_v27  ;;  %v1246_v10 = vshll.u32 %v4367_v39, 16  ;;  %v1249_v17 = vsel %vm1248_vm0, 1, %v4979_v19 }
 0x127   : > { %v1250_v33 = vadd.s32 %v1244_v61, %v1240_v1  ;;  %v4387_v42 = vsel %vm540_vm15, %v541_v13, %v4339_v54  ;;  %v4391_v2 = vsel %vm4208_vm12, 0, %v980_v11  ;;  %v987_v51 = vadd.f32 -0.4999988, %v986_v48 }
 0x128   : > { %v994_v59 = vadd.f32 -0.16666654, %v993_v56  ;;  %v4981_v41 = vand.u32 2147483647, %v3636_v12  ;;  %v1133_v1 = vsel %vm1012_vm6, %v1132_v7, %v1131_v50  ;;  %v666_v61 = vmul.f32 %v665_v45, %v663_v35  ;;  %v4415_v50 = vld [vmem:[%s3367_s11 + $0x38] sm:$0xff] }
 0x129   : > { %v1181_v13 = vshrl.u32 %v4972_v30, %v4170_v55  ;;  %v4408_v22 = vsel %vm1824_vm11, %v4322_v8, %v538_v62  ;;  %v2951_v3 = vadd.s32 4294967294, %v806_v23  ;;  %v1202_v12 = vsel %vm1200_vm1, %v4201_v4, 2102212464 }
 0x12a   : > { %vm4395_vm9 = vcmp.le.f32.partialorder %v4981_v41, 0.7853982  ;;  %v1251_v14 = vadd.s32 %v1249_v17, %v1243_v21  ;;  %v999_v27 = vadd.s32 3, %v4391_v2  ;;  %v1225_v48 = vshrl.u32 %v4319_v37, 16  ;;  %v4441_v21 = vld [vmem:[%s3367_s11 + $0x10] sm:$0xff] }
 0x12b   : > { %v1234_v55 = vadd.s32 %v1233_v36, %v1223_v53  ;;  %vm1252_vm12 = vc.u32 %v1250_v33, %v1246_v10  ;;  %v988_v56 = vmul.f32 %v987_v51, %v4306_v63  ;;  %v995_v47 = vmul.f32 %v994_v59, %v4306_v63 }
 0x12c   : > { %v4423_v11 = vsel %vm4395_vm9, %v4377_v0, %v1133_v1  ;;  %v1245_v4 = vshrl.u32 %v4335_v25, 16  ;;  %v667_v7 = vxor.u32 2147483648, %v666_v61  ;;  %v1201_v35 = vsel %vm1197_vm13, %v1181_v13, %v4236_v28 }
 0x12d   : > { %v1203_v37 = vsel %vm1199_vm5, %v4199_v52, %v1202_v12  ;;  %v1253_v45 = vsel %vm1252_vm12, 1, %v4979_v19  ;;  %vm1823_vm1 = vcmp.lt.s32.totalorder %v4065_v44, 2  ;;  %vm2952_vm3 = vcmp.lt.s32.totalorder %v2951_v3, 0 }
 0x12e   : > { %v1247_v63 = vshrl.u32 %v4367_v39, 16  ;;  %v1255_v23 = vadd.s32 %v1253_v45, %v1251_v14  ;;  %v1323_v53 = vand.u32 2139095040, %v4415_v50  ;;  %v4438_v25 = vmul.f32 %v4423_v11, %v4423_v11 }
 0x12f   : > { %vm547_vm13 = vcmp.lt.s32.totalorder %v4441_v21, 0  ;;  %v4444_v28 = vadd.s32 %v1234_v55, %v1225_v48  ;;  %v4446_v52 = vadd.s32 %v1250_v33, %v1246_v10  ;;  %v4448_v36 = vand.u32 3, %v999_v27 }
 0x130   : > { %v1204_v39 = vsel %vm1198_vm8, %v1201_v35, %v1203_v37  ;;  %v1256_v17 = vadd.s32 %v1255_v23, %v1245_v4  ;;  %v1324_v51 = vshrl.u32 %v1323_v53, 23  ;;  %v4457_v59 = vsel %vm537_vm4, %v4322_v8, %v538_v62 }
 0x131   : > { %v4459_v41 = vadd.f32 1.0, %v988_v56  ;;  %v996_v1 = vadd.f32 1.0, %v995_v47  ;;  %v809_v10 = vsel %vm2952_vm3, 0, %v2951_v3  ;;  %v4984_v33 = vand.u32 2147483647, %v3669_v16 }
 0x132   : > { %v668_v6 = vsel %vm547_vm13, %v667_v7, %v666_v61  ;;  %v1257_v54 = vadd.s32 %v1256_v17, %v1247_v63  ;;  %v2962_v12 = vadd.s32 4294967169, %v1324_v51  ;;  %v1139_v14 = vmul.f32 -0.001358992, %v4438_v25  ;;  %v4488_v7 = vpop.permute.xlu1 %2757 }
 0x133   : > { %vm4464_vm5 = vcmp.le.f32.partialorder %v4984_v33, 0.7853982  ;;  %v1146_v8 = vmul.f32 -0.00019511016, %v4438_v25  ;;  %v1258_v62 = vmul.u32 %v4233_v60, %v1204_v39  ;;  %vm1260_vm8 = vc.u32 %v4444_v28, %v4446_v52  ;;  %4987 = vst [vmem:[#allocation14_spill] sm:$0xff] %v4488_v7 }
 0x134   : > { %vm1005_vm7 = vcmp.eq.s32.totalorder %v4448_v36, 2  ;;  %v814_v16 = vsub.s32 4294967266, %v809_v10  ;;  %v1261_v3 = vadd.s32 1, %v1257_v54  ;;  %v1330_v27 = vadd.s32 1, %v2962_v12 }
 0x135   : > { %v4477_v48 = vmul.f32 %v996_v1, %v4281_v31  ;;  %v4482_v61 = vsel %vm4464_vm5, %v4441_v21, %v668_v6  ;;  %v794_v55 = vadd.s32 %v4168_v26, %v4166_v20  ;;  %v810_v60 = vsub.s32 32, %v809_v10 }
 0x136   : > { %v4943_v56 = vxor.u32 2147483648, %v4459_v41  ;;  %v1134_v47 = vsub.s32 4, %v4025_v38  ;;  %v1262_v4 = vsel %vm1260_vm8, %v1261_v3, %v1257_v54  ;;  %vm1331_vm10 = vcmp.gt.s32.totalorder %v1330_v27, 0 }
 0x137   : > { %v1140_v35 = vadd.f32 0.041655596, %v1139_v14  ;;  %v1147_v31 = vadd.f32 0.008332121, %v1146_v8  ;;  %v1263_v37 = vadd.s32 %v1262_v4, %v1258_v62  ;;  %v1332_v45 = vsel %vm1331_vm10, %v1330_v27, 0 }
 0x138   : > { %v4492_v63 = vmul.f32 %v4482_v61, %v4482_v61  ;;  %v815_v23 = vadd.s32 127, %v814_v16  ;;  %v4942_v20 = vand.u32 2147483647, %v4415_v50  ;;  %v1334_v26 = vand.u32 31, %v1332_v45 }
 0x139   : > { %v4499_v53 = vsel %vm1823_vm1, %v4408_v22, %v4363_v40  ;;  %v811_v39 = vshll.u32 %v4329_v15, %v809_v10  ;;  %v812_v17 = vshrl.u32 %v794_v55, %v810_v60  ;;  %v1264_v51 = vadd.s32 536870912, %v1263_v37 }
 0x13a   : > { %4988 = vst [vmem:[#allocation15_spill] sm:$0xff] %v4499_v53  ;;  %v4504_v1 = vmul.f32 %v4488_v7, %v4354_v32  ;;  %v4512_v6 = vsel %vm1005_vm7, %v4943_v56, %v4477_v48  ;;  %v4514_v44 = vsub.s32 32, %v1334_v26  ;;  %v4519_v15 = vsel %vm1012_vm6, %v1134_v47, %v4025_v38 }
 0x13b   : > { %v4522_v40 = vmul.f32 %v1140_v35, %v4438_v25  ;;  %v674_v32 = vmul.f32 -0.001358992, %v4492_v63  ;;  %v4525_v22 = vshrl.u32 %v1264_v51, 30  ;;  %v4528_v10 = vmul.f32 %v1147_v31, %v4438_v25 }
 0x13c   : > { %v681_v54 = vmul.f32 -0.00019511016, %v4492_v63  ;;  %v816_v12 = vshll.u32 %v815_v23, 23  ;;  %v1327_v14 = vand.u32 8388607, %v4942_v20  ;;  %v813_v8 = vor.u32 %v812_v17, %v811_v39 }
 0x13d   : > { %v1266_v38 = vshll.u32 %v4525_v22, 30  ;;  %v4534_v62 = vshrl.u32 %v1332_v45, 5  ;;  %v1337_v16 = vshll.u32 %v4972_v30, %v1334_v26  ;;  %v1338_v3 = vshrl.u32 %v4969_v9, %v4514_v44 }
 0x13e   : > { %v1340_v27 = vshll.u32 %v4969_v9, %v1334_v26  ;;  %v1341_v55 = vshrl.u32 %v4970_v58, %v4514_v44  ;;  %v1346_v60 = vshll.u32 %v4971_v5, %v1334_v26  ;;  %v1343_v4 = vshll.u32 %v4970_v58, %v1334_v26 }
 0x13f   : > { %v4543_v47 = vsub.s32 %v1263_v37, %v1266_v38  ;;  %v1344_v35 = vshrl.u32 %v4971_v5, %v4514_v44  ;;  %v1347_v31 = vshrl.u32 %v4973_v43, %v4514_v44  ;;  %v669_v45 = vsub.s32 4, %v4108_v49 }
 0x140   : > { %v675_v23 = vadd.f32 0.041655596, %v674_v32  ;;  %v817_v39 = vor.u32 4788187, %v816_v12  ;;  %v1328_v9 = vor.u32 8388608, %v1327_v14  ;;  %v1349_v37 = vshll.u32 %v4973_v43, %v1334_v26 }
 0x141   : > { %v682_v17 = vadd.f32 0.008332121, %v681_v54  ;;  %vm1268_vm11 = vcmp.lt.s32.totalorder %v4543_v47, 0  ;;  %v1269_v51 = vsub.s32 0, %v4543_v47  ;;  %v820_v38 = vcvt.s32.f32 %v813_v8 }
 0x142   : > { %v4554_v58 = vor.u32 %v1338_v3, %v1337_v16  ;;  %v4556_v20 = vor.u32 %v1341_v55, %v1340_v27  ;;  %v1348_v5 = vor.u32 %v1347_v31, %v1346_v60  ;;  %v1345_v33 = vor.u32 %v1344_v35, %v1343_v4 }
 0x143   : > { %v1270_v56 = vsel %vm1268_vm11, %v1269_v51, %v4543_v47  ;;  %v1350_v32 = vshrl.u32 %v4974_v18, %v4514_v44  ;;  %vm1352_vm2 = vcmp.lt.s32.totalorder %v4534_v62, 1  ;;  %v818_v54 = vand.u32 2147483647, %v817_v39 }
 0x144   : > { %v1271_v12 = vclz %v1270_v56  ;;  %vm1354_vm14 = vcmp.lt.s32.totalorder %v4534_v62, 3  ;;  %v4563_v14 = vshll.u32 %v1328_v9, 8  ;;  %v4568_v43 = vsel %vm547_vm13, %v669_v45, %v4108_v49 }
 0x145   : > { %v676_v26 = vmul.f32 %v675_v23, %v4492_v63  ;;  %v1351_v8 = vor.u32 %v1350_v32, %v1349_v37  ;;  %vm1355_vm15 = vcmp.lt.s32.totalorder %v4534_v62, 4  ;;  %vm1353_vm0 = vcmp.lt.s32.totalorder %v4534_v62, 2 }
 0x146   : > { %v2960_v16 = vadd.s32 4294967294, %v1271_v12  ;;  %v1360_v18 = vsel %vm1352_vm2, %v4554_v58, %v4556_v20  ;;  %v1361_v56 = vsel %vm1355_vm15, %v1348_v5, 920167782  ;;  %v683_v3 = vmul.f32 %v682_v17, %v4492_v63 }
 0x147   : > { %v1362_v49 = vsel %vm1354_vm14, %v1345_v33, %v1361_v56  ;;  %v1364_v27 = vsel %vm1352_vm2, %v4556_v20, %v1345_v33  ;;  %v1365_v55 = vsel %vm1355_vm15, %v1351_v8, 1326507024  ;;  %v4587_v60 = vmul.f32 %v820_v38, %v818_v54 }
 0x148   : > { %v1259_v4 = vadd.s32 %v4446_v52, %v4444_v28  ;;  %vm2961_vm4 = vcmp.lt.s32.totalorder %v2960_v16, 0  ;;  %v1369_v35 = vand.u32 65535, %v4563_v14  ;;  %v1363_v45 = vsel %vm1353_vm0, %v1360_v18, %v1362_v49 }
 0x149   : > { %v1274_v31 = vsel %vm2961_vm4, 0, %v2960_v16  ;;  %v1366_v23 = vsel %vm1354_vm14, %v1348_v5, %v1365_v55  ;;  %v1370_v39 = vshrl.u32 %v4563_v14, 16  ;;  %v1393_v38 = vand.u32 65535, %v1363_v45 }
 0x14a   : > { %v1275_v9 = vsub.s32 32, %v1274_v31  ;;  %v1276_v17 = vshll.u32 %v4543_v47, %v1274_v31  ;;  %v1279_v51 = vsub.s32 4294967266, %v1274_v31  ;;  %v1367_v37 = vsel %vm1353_vm0, %v1364_v27, %v1366_v23  ;;  %v4614_v31 = vld [vmem:[%s3367_s11 + $0x18] sm:$0xff] }
 0x14b   : > { %v1371_v28 = vand.u32 65535, %v1367_v37  ;;  %v1372_v52 = vshrl.u32 %v1367_v37, 16  ;;  %v1394_v32 = vshrl.u32 %v1363_v45, 16  ;;  %v4600_v54 = vadd.f32 -0.4999988, %v676_v26 }
 0x14c   : > { %v684_v12 = vadd.f32 -0.16666654, %v683_v3  ;;  %v1277_v8 = vshrl.u32 %v1259_v4, %v1275_v9  ;;  %v1280_v16 = vadd.s32 127, %v1279_v51  ;;  %vm1002_vm6 = vcmp.eq.s32.totalorder %v4448_v36, 0 }
 0x14d   : > { %v822_v5 = vxor.u32 2147483648, %v4587_v60  ;;  %vm1167_vm12 = vcmp.lt.s32.totalorder %v4072_v34, 0  ;;  %v1373_v47 = vmul.u32 %v1371_v28, %v1369_v35  ;;  %v1374_v18 = vmul.u32 %v1372_v52, %v1369_v35 }
 0x14e   : > { %v1375_v56 = vmul.u32 %v1371_v28, %v1370_v39  ;;  %v4989_v49 = vand.u32 2147483647, %v4072_v34  ;;  %v1278_v26 = vor.u32 %v1277_v8, %v1276_v17  ;;  %v1281_v55 = vshll.u32 %v1280_v16, 23 }
 0x14f   : > { %v1336_v3 = vshrl.u32 %v4972_v30, %v4514_v44  ;;  %v1396_v4 = vmul.u32 %v1394_v32, %v1369_v35  ;;  %vm702_vm3 = vcmp.lt.s32.totalorder %v4614_v31, 0  ;;  %v1376_v45 = vmul.u32 %v1372_v52, %v1370_v39 }
 0x150   : > { %vm4607_vm1 = vcmp.le.f32.partialorder %v4989_v49, 0.7853982  ;;  %v1377_v23 = vshll.u32 %v1374_v18, 16  ;;  %v1379_v9 = vshll.u32 %v1375_v56, 16  ;;  %v1395_v51 = vmul.u32 %v1393_v38, %v1369_v35 }
 0x151   : > { %v1282_v37 = vor.u32 4788187, %v1281_v55  ;;  %v1285_v28 = vcvt.s32.f32 %v1278_v26  ;;  %v1357_v49 = vsel %vm1355_vm15, %v1345_v33, 2102212464  ;;  %v1397_v7 = vmul.u32 %v1393_v38, %v1370_v39 }
 0x152   : > { %vm1381_vm13 = vc.u32 %v1373_v47, %v1377_v23  ;;  %v1383_v17 = vadd.s32 %v1377_v23, %v1373_v47  ;;  %v1398_v8 = vmul.u32 %v1394_v32, %v1370_v39  ;;  %v1399_v16 = vshll.u32 %v1396_v4, 16 }
 0x153   : > { %v1283_v30 = vand.u32 2147483647, %v1282_v37  ;;  %v1378_v44 = vshrl.u32 %v1374_v18, 16  ;;  %v1382_v0 = vsel %vm1381_vm13, 1, %v4979_v19  ;;  %v1401_v53 = vshll.u32 %v1397_v7, 16 }
 0x154   : > { %vm1001_vm8 = vcmp.lt.s32.totalorder %v4448_v36, 2  ;;  %v1384_v52 = vadd.s32 %v1382_v0, %v1376_v45  ;;  %vm1385_vm7 = vc.u32 %v1383_v17, %v1379_v9  ;;  %vm1403_vm10 = vc.u32 %v1395_v51, %v1399_v16  ;;  %v4993_v17 = vld [vmem:[#allocation11_spill] sm:$0xff] }
 0x155   : > { %v1405_v35 = vadd.s32 %v1399_v16, %v1395_v51  ;;  %v1286_v26 = vmul.f32 %v1285_v28, %v1283_v30  ;;  %v1380_v55 = vshrl.u32 %v1375_v56, 16  ;;  %v1386_v33 = vsel %vm1385_vm7, 1, %v4979_v19 }
 0x156   : > { %v1404_v38 = vsel %vm1403_vm10, 1, %v4979_v19  ;;  %v1388_v47 = vadd.s32 %v1386_v33, %v1384_v52  ;;  %v1400_v39 = vshrl.u32 %v1396_v4, 16  ;;  %vm536_vm15 = vcmp.lt.s32.totalorder %v4252_v57, 2 }
 0x157   : > { %v1406_v32 = vadd.s32 %v1404_v38, %v1398_v8  ;;  %vm1407_vm11 = vc.u32 %v1405_v35, %v1401_v53  ;;  %vm998_vm4 = vweird.f32 %v4186_v46  ;;  %v1287_v18 = vxor.u32 2147483648, %v1286_v26 }
 0x158   : > { %v1356_v0 = vsel %vm1352_vm2, %v1336_v3, %v4554_v58  ;;  %v1358_v56 = vsel %vm1354_vm14, %v4556_v20, %v1357_v49  ;;  %v1408_v45 = vsel %vm1407_vm11, 1, %v4979_v19  ;;  %v685_v23 = vmul.f32 %v684_v12, %v4492_v63 }
 0x159   : > { %v1389_v4 = vadd.s32 %v1388_v47, %v1378_v44  ;;  %v1402_v9 = vshrl.u32 %v1397_v7, 16  ;;  %v1410_v51 = vadd.s32 %v1408_v45, %v1406_v32  ;;  %v4992_v37 = vxor.u32 2147483648, %v4477_v48 }
 0x15a   : > { %v4994_v8 = vand.u32 2147483647, %v4993_v17  ;;  %v1288_v19 = vsel %vm1167_vm12, %v1287_v18, %v1286_v26  ;;  %v4646_v20 = vadd.s32 %v1405_v35, %v1401_v53  ;;  %v1359_v12 = vsel %vm1353_vm0, %v1356_v0, %v1358_v56 }
 0x15b   : > { %v1004_v28 = vsel %vm1002_vm6, %v4459_v41, %v4992_v37  ;;  %v4651_v7 = vsel %vm4607_vm1, %v4072_v34, %v1288_v19  ;;  %v4655_v3 = vadd.s32 %v1389_v4, %v1380_v55  ;;  %v1411_v49 = vadd.s32 %v1410_v51, %v1400_v39 }
 0x15c   : > { %vm4640_vm2 = vcmp.le.f32.partialorder %v4994_v8, 0.7853982  ;;  %v1142_v16 = vadd.f32 -0.4999988, %v4522_v40  ;;  %v672_v30 = vsel %vm4464_vm5, 0, %v4568_v43  ;;  %v823_v53 = vsel %vm702_vm3, %v822_v5, %v4587_v60  ;;  %v4686_v5 = vpop.permute.xlu0 %1477 }
 0x15d   : > { %v4666_v44 = vmul.f32 %v4651_v7, %v4651_v7  ;;  %v1149_v62 = vadd.f32 -0.16666654, %v4528_v10  ;;  %v678_v52 = vmul.f32 %v4600_v54, %v4492_v63  ;;  %v686_v35 = vadd.f32 1.0, %v685_v23 }
 0x15e   : > { %v1412_v26 = vadd.s32 %v1411_v49, %v1402_v9  ;;  %v1413_v43 = vmul.u32 %v4563_v14, %v1359_v12  ;;  %vm1415_vm5 = vc.u32 %v4655_v3, %v4646_v20  ;;  %v4679_v60 = vsel %vm4395_vm9, 0, %v4519_v15 }
 0x15f   : > { %v1294_v40 = vmul.f32 -0.001358992, %v4666_v44  ;;  %v1301_v13 = vmul.f32 -0.00019511016, %v4666_v44  ;;  %v4684_v63 = vsel %vm4640_vm2, %v4614_v31, %v823_v53  ;;  %v689_v10 = vadd.s32 3, %v672_v30 }
 0x160   : > { %v1416_v54 = vadd.s32 1, %v1412_v26  ;;  %v1008_v14 = vsel %vm1001_vm8, %v1004_v28, %v4512_v6  ;;  %v1143_v55 = vmul.f32 %v1142_v16, %v4438_v25  ;;  %v1150_v29 = vmul.f32 %v1149_v62, %v4438_v25 }
 0x161   : > { %v1295_v33 = vadd.f32 0.041655596, %v1294_v40  ;;  %v1302_v38 = vadd.f32 0.008332121, %v1301_v13  ;;  %v679_v15 = vadd.f32 1.0, %v678_v52  ;;  %v687_v47 = vmul.f32 %v686_v35, %v4482_v61 }
 0x162   : > { %v1417_v39 = vsel %vm1415_vm5, %v1416_v54, %v1412_v26  ;;  %v4696_v32 = vmul.f32 %v4684_v63, %v4684_v63  ;;  %v1976_v18 = vand.u32 3, %v672_v30  ;;  %v4703_v36 = vsel %vm536_vm15, %v4457_v59, %v4387_v42  ;;  %v4997_v42 = vld [vmem:[#allocation12_spill] sm:$0xff]  ;;  %v4732_v54 = vpop.permute.xlu2 %1487 }
 0x163   : > { %v1303_v0 = vmul.f32 %v1302_v38, %v4666_v44  ;;  %v1418_v56 = vadd.s32 %v1417_v39, %v1413_v43  ;;  %v4707_v25 = vmul.f32 %v4686_v5, %v4357_v24  ;;  %v1009_v61 = vsel %vm998_vm4, nan, %v1008_v14 }
 0x164   : > { %v690_v6 = vand.u32 3, %v689_v10  ;;  %v1154_v45 = vadd.s32 3, %v4679_v60  ;;  %v1296_v23 = vmul.f32 %v1295_v33, %v4666_v44  ;;  %v4713_v51 = vadd.f32 1.0, %v1143_v55 }
 0x165   : > { %v1304_v4 = vadd.f32 -0.16666654, %v1303_v0  ;;  %v1419_v9 = vadd.s32 536870912, %v1418_v56  ;;  %v1151_v37 = vadd.f32 1.0, %v1150_v29  ;;  %v693_v57 = vxor.u32 2147483648, %v687_v47 }
 0x166   : > { %v824_v59 = vsub.s32 4, %v4997_v42  ;;  %v696_v28 = vxor.u32 2147483648, %v679_v15  ;;  %v836_v24 = vmul.f32 -0.00019511016, %v4696_v32  ;;  %vm1978_vm9 = vcmp.eq.s32.totalorder %v1976_v18, 0 }
 0x167   : > { %v4717_v17 = vshrl.u32 %v1419_v9, 30  ;;  %v829_v8 = vmul.f32 -0.001358992, %v4696_v32  ;;  %vm1981_vm14 = vcmp.eq.s32.totalorder %v1976_v18, 2  ;;  %vm692_vm0 = vcmp.eq.s32.totalorder %v690_v6, 0 }
 0x168   : > { %v1289_v19 = vsub.s32 4, %v4525_v22  ;;  %vm695_vm6 = vcmp.eq.s32.totalorder %v690_v6, 2  ;;  %v1297_v12 = vadd.f32 -0.4999988, %v1296_v23  ;;  %v1305_v49 = vmul.f32 %v1304_v4, %v4666_v44 }
 0x169   : > { %v1421_v16 = vshll.u32 %v4717_v17, 30  ;;  %v4724_v30 = vmul.f32 %v1151_v37, %v4423_v11  ;;  %v825_v53 = vsel %vm702_vm3, %v824_v59, %v4997_v42  ;;  %vm1977_vm13 = vcmp.lt.s32.totalorder %v1976_v18, 2 }
 0x16a   : > { %v1980_v62 = vsel %vm1978_vm9, %v679_v15, %v693_v57  ;;  %v837_v52 = vadd.f32 0.008332121, %v836_v24  ;;  %v1983_v35 = vsel %vm1981_vm14, %v696_v28, %v687_v47  ;;  %vm691_vm8 = vcmp.lt.s32.totalorder %v690_v6, 2 }
 0x16b   : > { %v1422_v26 = vsub.s32 %v1418_v56, %v1421_v16  ;;  %v830_v40 = vadd.f32 0.041655596, %v829_v8  ;;  %v694_v13 = vsel %vm692_vm0, %v679_v15, %v693_v57  ;;  %v697_v43 = vsel %vm695_vm6, %v696_v28, %v687_v47  ;;  %v4762_v8 = vpop.permute.xlu1 %2761 }
 0x16c   : > { %v1290_v10 = vsel %vm1167_vm12, %v1289_v19, %v4525_v22  ;;  %v1298_v11 = vmul.f32 %v1297_v12, %v4666_v44  ;;  %v1306_v14 = vadd.f32 1.0, %v1305_v49  ;;  %v4735_v33 = vand.u32 3, %v1154_v45  ;;  %v4764_v19 = vpop.permute.xlu0 %1482 }
 0x16d   : > { %vm1423_vm7 = vcmp.lt.s32.totalorder %v1422_v26, 0  ;;  %v1424_v55 = vsub.s32 0, %v1422_v26  ;;  %v4738_v38 = vmul.f32 %v4732_v54, %v1009_v61  ;;  %vm688_vm3 = vweird.f32 %v4441_v21 }
 0x16e   : > { %v827_v29 = vsel %vm4640_vm2, 0, %v825_v53  ;;  %v838_v34 = vmul.f32 %v837_v52, %v4696_v32  ;;  %v1984_v22 = vsel %vm1977_vm13, %v1980_v62, %v1983_v35  ;;  %v2284_v15 = vand.u32 3, %v4391_v2 }
 0x16f   : > { %v1425_v44 = vsel %vm1423_vm7, %v1424_v55, %v1422_v26  ;;  %v831_v47 = vmul.f32 %v830_v40, %v4696_v32  ;;  %v698_v39 = vsel %vm691_vm8, %v694_v13, %v697_v43  ;;  %v1292_v0 = vsel %vm4607_vm1, 0, %v1290_v10 }
 0x170   : > { %v1426_v56 = vclz %v1425_v44  ;;  %v1158_v61 = vxor.u32 2147483648, %v4724_v30  ;;  %v1161_v58 = vxor.u32 2147483648, %v4713_v51  ;;  %v1299_v45 = vadd.f32 1.0, %v1298_v11  ;;  %v3072_v44 = vld [vmem:[%s3367_s11 + $0x30] sm:$0xff] }
 0x171   : > { %v1307_v23 = vmul.f32 %v1306_v14, %v4651_v7  ;;  %v1985_v18 = vsel %vm688_vm3, nan, %v1984_v22  ;;  %v4755_v2 = vand.u32 3, %v827_v29  ;;  %v844_v4 = vadd.s32 3, %v827_v29 }
 0x172   : > { %v2963_v9 = vadd.s32 4294967294, %v1426_v56  ;;  %vm1160_vm12 = vcmp.eq.s32.totalorder %v4735_v33, 2  ;;  %v839_v6 = vadd.f32 -0.16666654, %v838_v34  ;;  %v699_v27 = vsel %vm688_vm3, nan, %v698_v39 }
 0x173   : > { %vm2286_vm1 = vcmp.eq.s32.totalorder %v2284_v15, 0  ;;  %v1309_v37 = vadd.s32 3, %v1292_v0  ;;  %v832_v57 = vadd.f32 -0.4999988, %v831_v47  ;;  %vm2289_vm10 = vcmp.eq.s32.totalorder %v2284_v15, 2 }
 0x174   : > { %v1414_v7 = vadd.s32 %v4646_v20, %v4655_v3  ;;  %vm2964_vm11 = vcmp.lt.s32.totalorder %v2963_v9, 0  ;;  %v1313_v42 = vxor.u32 2147483648, %v1307_v23  ;;  %v1316_v59 = vxor.u32 2147483648, %v1299_v45 }
 0x175   : > { %v1429_v28 = vsel %vm2964_vm11, 0, %v2963_v9  ;;  %v2592_v24 = vand.u32 3, %v1292_v0  ;;  %v1310_v16 = vand.u32 3, %v1309_v37  ;;  %v840_v53 = vmul.f32 %v839_v6, %v4696_v32 }
 0x176   : > { %v1430_v12 = vsub.s32 32, %v1429_v28  ;;  %v1431_v49 = vshll.u32 %v1422_v26, %v1429_v28  ;;  %v1434_v21 = vsub.s32 4294967266, %v1429_v28  ;;  %vm2285_vm15 = vcmp.lt.s32.totalorder %v2284_v15, 2 }
 0x177   : > { %vm2594_vm2 = vcmp.eq.s32.totalorder %v2592_v24, 0  ;;  %vm2597_vm5 = vcmp.eq.s32.totalorder %v2592_v24, 2  ;;  %v4998_v20 = vxor.u32 2147483648, %v4477_v48  ;;  %v4999_v62 = vxor.u32 2147483648, %v4459_v41 }
 0x178   : > { %v1432_v35 = vshrl.u32 %v1414_v7, %v1430_v12  ;;  %v1435_v40 = vadd.s32 127, %v1434_v21  ;;  %v833_v26 = vmul.f32 %v832_v57, %v4696_v32  ;;  %vm2593_vm9 = vcmp.lt.s32.totalorder %v2592_v24, 2  ;;  %v4798_v57 = vpop.permute.xlu1 %2769  ;;  %v4801_v7 = vpop.permute.xlu0 %1492 }
 0x179   : > { %v2288_v3 = vsel %vm2286_vm1, %v4459_v41, %v4998_v20  ;;  %v2291_v52 = vsel %vm2289_vm10, %v4999_v62, %v4477_v48  ;;  %v2596_v13 = vsel %vm2594_vm2, %v1299_v45, %v1313_v42  ;;  %v2599_v43 = vsel %vm2597_vm5, %v1316_v59, %v1307_v23 }
 0x17a   : > { %v1433_v10 = vor.u32 %v1432_v35, %v1431_v49  ;;  %v1436_v11 = vshll.u32 %v1435_v40, 23  ;;  %vm1311_vm14 = vcmp.lt.s32.totalorder %v1310_v16, 2  ;;  %vm1312_vm0 = vcmp.eq.s32.totalorder %v1310_v16, 0 }
 0x17b   : > { %v841_v14 = vadd.f32 1.0, %v840_v53  ;;  %v2292_v55 = vsel %vm2285_vm15, %v2288_v3, %v2291_v52  ;;  %v1314_v29 = vsel %vm1312_vm0, %v1299_v45, %v1313_v42  ;;  %vm1315_vm6 = vcmp.eq.s32.totalorder %v1310_v16, 2  ;;  %v4791_v45 = vpop.permute.xlu2 %2765  ;;  %v3073_v42 = vld [vmem:[%s3367_s11 + $0x8] sm:$0xff]  ;;  %s2835_s11 = scalar_lea.hbm %s4916_s3, %s2990_s8 }
 0x17c   : > { %v2774_v41 = vmul.f32 %v4762_v8, %v1985_v18  ;;  %v1437_v48 = vor.u32 4788187, %v1436_v11  ;;  %v1440_v34 = vcvt.s32.f32 %v1433_v10  ;;  %v1317_v22 = vsel %vm1315_vm6, %v1316_v59, %v1307_v23  ;;  %s2839_s30 = sshll.u32 %s2835_s11, 4  ;;  %s2840_s30 = int_to_ptr.hbm [resolvable:$true] %s2839_s30 }
 0x17d   : > { %v1497_v32 = vmul.f32 %v4764_v19, %v699_v27  ;;  %vm1308_vm13 = vweird.f32 %v3072_v44  ;;  %v2600_v47 = vsel %vm2593_vm9, %v2596_v13, %v2599_v43  ;;  %v1318_v39 = vsel %vm1311_vm14, %v1314_v29, %v1317_v22  ;;  %s3142_s4 = sshra.s32 %s2840_s30, 4  ;;  %s3143_s4 = int_to_ptr.hbm [resolvable:$true] %s3142_s4 }
 0x17e   : > { %vm1157_vm8 = vcmp.eq.s32.totalorder %v4735_v33, 0  ;;  %v4787_v15 = vsel %vm1160_vm12, %v1161_v58, %v4724_v30  ;;  %v834_v0 = vadd.f32 1.0, %v833_v26  ;;  %v2293_v56 = vsel %vm998_vm4, nan, %v2292_v55  ;;  %s3144_s23 = scalar_lea.hbm %s3143_s4, 2  ;;  %p3149_p5 = scmp.lt.s32.totalorder %s3143_s4, %s4916_s3 }
 0x17f   : > { %v1438_v23 = vand.u32 2147483647, %v1437_v48  ;;  %v842_v18 = vmul.f32 %v841_v14, %v4684_v63  ;;  %vm2131_vm7 = vcmp.lt.s32.totalorder %v4755_v2, 2  ;;  %vm2132_vm3 = vcmp.eq.s32.totalorder %v4755_v2, 0  ;;  %p3145_p6 = scmp.ne.s32.totalorder %s3143_s4, %s3144_s23  ;;  %p3150_p9 = scmp.lt.s32.totalorder %s3148_s27, %s3144_s23 }
 0x180   : > { %v845_v9 = vand.u32 3, %v844_v4  ;;  %v2780_v6 = vadd.f32 %v2774_v41, %v4504_v1  ;;  %v2601_v37 = vsel %vm1308_vm13, nan, %v2600_v47  ;;  %v1319_v46 = vsel %vm1308_vm13, nan, %v1318_v39  ;;  %v5003_v39 = vld [vmem:[#allocation15_spill] sm:$0xff] }
 0x181   : > { %v1441_v27 = vmul.f32 %v1440_v34, %v1438_v23  ;;  %vm533_vm4 = vweird.f32 %v3073_v42  ;;  %v1503_v63 = vadd.f32 %v1497_v32, %v4707_v25  ;;  %v2776_v59 = vmul.f32 %v4791_v45, %v2293_v56  ;;  %p3146_p13 = pnand %p3145_p6, %p3284_p11  ;;  %p3151_p10 = por %p3150_p9, %p3149_p5 }
 0x182   : > { %vm1322_vm12 = vcmp.lt.s32.totalorder %v4415_v50, 0  ;;  %v1444_v4 = vsub.s32 4, %v4717_v17  ;;  %vm1156_vm1 = vcmp.lt.s32.totalorder %v4735_v33, 2  ;;  %v851_v1 = vxor.u32 2147483648, %v834_v0  ;;  %v5005_v33 = vld [vmem:[#allocation14_spill] sm:$0xff] }
 0x183   : > { %v2438_v28 = vand.u32 3, %v4679_v60  ;;  %v5000_v24 = vand.u32 2147483647, %v4415_v50  ;;  %v1442_v49 = vxor.u32 2147483648, %v1441_v27  ;;  %v848_v21 = vxor.u32 2147483648, %v842_v18  ;;  %p3147_p2 = pneg %p3146_p13 }
 0x184   : > { %vm2135_vm11 = vcmp.eq.s32.totalorder %v4755_v2, 2  ;;  %v2778_v25 = vmul.f32 %v4798_v57, %v2601_v37  ;;  %v1501_v16 = vmul.f32 %v4801_v7, %v1319_v46  ;;  %vm846_vm15 = vcmp.lt.s32.totalorder %v845_v9, 2  ;;  %v5004_v2 = vld [vmem:[#allocation13_spill] sm:$0xff] }
 0x185   : > { %vm4812_vm10 = vcmp.le.f32.partialorder %v5000_v24, 0.7853982  ;;  %vm847_vm2 = vcmp.eq.s32.totalorder %v845_v9, 0  ;;  %vm850_vm5 = vcmp.eq.s32.totalorder %v845_v9, 2  ;;  %v1443_v60 = vsel %vm1322_vm12, %v1442_v49, %v1441_v27  ;;  %p3152_p1 = pnand %p3151_p10, %p3147_p2 }
 0x186   : > { %v2781_v53 = vadd.f32 %v2780_v6, %v2776_v59  ;;  %v1445_v20 = vsel %vm1322_vm12, %v1444_v4, %v4717_v17  ;;  %v1446_v3 = vsel %vm4812_vm10, %v4415_v50, %v1443_v60  ;;  %v1504_v62 = vadd.f32 %v1503_v63, %v4738_v38 }
 0x187   : > { %v2137_v52 = vsel %vm2135_vm11, %v851_v1, %v842_v18  ;;  %vm2440_vm9 = vcmp.eq.s32.totalorder %v2438_v28, 0  ;;  %vm2443_vm14 = vcmp.eq.s32.totalorder %v2438_v28, 2  ;;  %v1448_v35 = vmul.f32 %v1446_v3, %v1446_v3 }
 0x188   : > { %v2134_v40 = vsel %vm2132_vm3, %v834_v0, %v848_v21  ;;  %v852_v26 = vsel %vm850_vm5, %v851_v1, %v842_v18  ;;  %v2782_v13 = vadd.f32 %v2781_v53, %v2778_v25  ;;  %v1505_v43 = vadd.f32 %v1504_v62, %v1501_v16 }
 0x189   : > { %v849_v10 = vsel %vm847_vm2, %v834_v0, %v848_v21  ;;  %v1447_v17 = vsel %vm4812_vm10, 0, %v1445_v20  ;;  %v1449_v11 = vmul.f32 -0.001358992, %v1448_v35  ;;  %v1456_v14 = vmul.f32 -0.00019511016, %v1448_v35 }
 0x18a   : > { %v1159_v38 = vsel %vm1157_vm8, %v4713_v51, %v1158_v61  ;;  %vm843_vm0 = vweird.f32 %v4614_v31  ;;  %vm2439_vm6 = vcmp.lt.s32.totalorder %v2438_v28, 2  ;;  %v2442_v55 = vsel %vm2440_vm9, %v4713_v51, %v1158_v61 }
 0x18b   : > { %v2138_v29 = vsel %vm2131_vm7, %v2134_v40, %v2137_v52  ;;  %v2445_v41 = vsel %vm2443_vm14, %v1161_v58, %v4724_v30  ;;  %v1450_v48 = vadd.f32 0.041655596, %v1449_v11  ;;  %v1457_v34 = vadd.f32 0.008332121, %v1456_v14 }
 0x18c   : > { %v853_v22 = vsel %vm846_vm15, %v849_v10, %v852_v26  ;;  %v2783_v32 = vrot.slane %v2782_v13, 4  ;;  %v1464_v44 = vadd.s32 3, %v1447_v17  ;;  %v1506_v47 = vrot.slane %v1505_v43, 4 }
 0x18d   : > { %v1831_v0 = vsel %vm533_vm4, nan, %v5003_v39  ;;  %v1451_v56 = vmul.f32 %v1450_v48, %v1448_v35  ;;  %v1458_v23 = vmul.f32 %v1457_v34, %v1448_v35  ;;  %v544_v61 = vsel %vm533_vm4, nan, %v4703_v36 }
 0x18e   : > { %vm1153_vm13 = vweird.f32 %v5004_v2  ;;  %v1163_v51 = vsel %vm1156_vm1, %v1159_v38, %v4787_v15  ;;  %v2139_v30 = vsel %vm843_vm0, nan, %v2138_v29  ;;  %v854_v58 = vsel %vm843_vm0, nan, %v853_v22 }
 0x18f   : > { %v2446_v18 = vsel %vm2439_vm6, %v2442_v55, %v2445_v41  ;;  %v1452_v9 = vadd.f32 -0.4999988, %v1451_v56  ;;  %v1459_v6 = vadd.f32 -0.16666654, %v1458_v23  ;;  %v2746_v27 = vand.u32 3, %v1447_v17 }
 0x190   : > { %v2784_v37 = vadd.f32 %v2783_v32, %v2782_v13  ;;  %v1465_v46 = vand.u32 3, %v1464_v44  ;;  %v1507_v36 = vadd.f32 %v1506_v47, %v1505_v43  ;;  %v2775_v42 = vmul.f32 %v4762_v8, %v2139_v30 }
 0x191   : > { %v1453_v63 = vmul.f32 %v1452_v9, %v1448_v35  ;;  %v1460_v59 = vmul.f32 %v1459_v6, %v1448_v35  ;;  %v2773_v15 = vmul.f32 %v5005_v33, %v1831_v0  ;;  %v1498_v4 = vmul.f32 %v4764_v19, %v854_v58 }
 0x192   : > { %v2447_v31 = vsel %vm1153_vm13, nan, %v2446_v18  ;;  %v1496_v1 = vmul.f32 %v4686_v5, %v544_v61  ;;  %v1164_v28 = vsel %vm1153_vm13, nan, %v1163_v51  ;;  %vm2751_vm8 = vcmp.eq.s32.totalorder %v2746_v27, 2 }
 0x193   : > { %v1454_v24 = vadd.f32 1.0, %v1453_v63  ;;  %v1461_v12 = vadd.f32 1.0, %v1460_v59  ;;  %v2785_v49 = vrot.slane %v2784_v37, 2  ;;  %vm1470_vm7 = vcmp.eq.s32.totalorder %v1465_v46, 2 }
 0x194   : > { %v1508_v8 = vrot.slane %v1507_v36, 2  ;;  %v2789_v21 = vadd.f32 %v2775_v42, %v2773_v15  ;;  %v2777_v25 = vmul.f32 %v4791_v45, %v2447_v31  ;;  %v1512_v19 = vadd.f32 %v1498_v4, %v1496_v1 }
 0x195   : > { %v1462_v16 = vmul.f32 %v1461_v12, %v1446_v3  ;;  %v1471_v60 = vxor.u32 2147483648, %v1454_v24  ;;  %vm2747_vm3 = vcmp.lt.s32.totalorder %v2746_v27, 2  ;;  %vm2748_vm4 = vcmp.eq.s32.totalorder %v2746_v27, 0 }
 0x196   : > { %vm1467_vm12 = vcmp.eq.s32.totalorder %v1465_v46, 0  ;;  %vm1466_vm1 = vcmp.lt.s32.totalorder %v1465_v46, 2  ;;  %vm1463_vm10 = vweird.f32 %v4415_v50  ;;  %v2786_v62 = vadd.f32 %v2785_v49, %v2784_v37 }
 0x197   : > { %v1468_v53 = vxor.u32 2147483648, %v1462_v16  ;;  %v2753_v5 = vsel %vm2751_vm8, %v1471_v60, %v1462_v16  ;;  %v1472_v20 = vsel %vm1470_vm7, %v1471_v60, %v1462_v16  ;;  %v1509_v52 = vadd.f32 %v1508_v8, %v1507_v36 }
 0x198   : > { %v1500_v35 = vmul.f32 %v4732_v54, %v1164_v28  ;;  %v2790_v13 = vadd.f32 %v2789_v21, %v2777_v25  ;;  %v2787_v11 = vrot.slane %v2786_v62, 1  ;;  %v2798_v22 = vstv %s4870_s28 }
 0x199   : > { %v2750_v40 = vsel %vm2748_vm4, %v1454_v24, %v1468_v53  ;;  %v1469_v45 = vsel %vm1467_vm12, %v1454_v24, %v1468_v53  ;;  %v1510_v38 = vrot.slane %v1509_v52, 1  ;;  %v1521_v32 = vstv %s4873_s10 }
 0x19a   : > { %v2754_v3 = vsel %vm2747_vm3, %v2750_v40, %v2753_v5  ;;  %v1473_v26 = vsel %vm1466_vm1, %v1469_v45, %v1472_v20  ;;  %v1513_v17 = vadd.f32 %v1512_v19, %v1500_v35  ;;  %v2788_v29 = vadd.f32 %v2787_v11, %v2786_v62 }
 0x19b   : > { %v2755_v43 = vsel %vm1463_vm10, nan, %v2754_v3  ;;  %v1474_v10 = vsel %vm1463_vm10, nan, %v1473_v26  ;;  %v1511_v48 = vadd.f32 %v1510_v38, %v1509_v52  ;;  %v2807_v36 = vstv %s2939_s20 }
 0x19c   : > { %v2779_v50 = vmul.f32 %v4798_v57, %v2755_v43  ;;  %v1502_v14 = vmul.f32 %v4801_v7, %v1474_v10  ;;  %v2799_v0 = vadd.f32 %v2798_v22, %v2788_v29  ;;  %v2810_v63 = vstv %s2940_s6 }
 0x19d   : > { %v1522_v23 = vadd.f32 %v1521_v32, %v1511_v48  ;;  %v2819_v15 = vlaneseq  ;;  %vm2816_vm11 = vcmask 1040384  }
 0x19e   : > { %v2791_v55 = vadd.f32 %v2790_v13, %v2779_v50  ;;  %v1514_v54 = vadd.f32 %v1513_v17, %v1502_v14 }
 0x19f   : > { %v2801_v51 = vadd.f32 %v2799_v0, %v1522_v23  ;;  %vm2821_vm15 = vcmp.lt.s32.totalorder %v2819_v15, 256 }
 0x1a0   : > { %v2792_v41 = vrot.slane %v2791_v55, 4  ;;  %v1515_v34 = vrot.slane %v1514_v54, 4 }
 0x1a1   : > { %v2803_v6 = vmul.f32 1.442695, %v2801_v51 }
 0x1a2   : > { %v2793_v44 = vadd.f32 %v2792_v41, %v2791_v55  ;;  %v1516_v47 = vadd.f32 %v1515_v34, %v1514_v54 }
 0x1a3   : > { %3062 = vpow2.f32 %v2803_v6 }
 0x1a4   : > { %v2794_v39 = vrot.slane %v2793_v44, 2  ;;  %v1517_v56 = vrot.slane %v1516_v47, 2 }
 0x1a6   : > { %v2795_v61 = vadd.f32 %v2794_v39, %v2793_v44  ;;  %v1518_v57 = vadd.f32 %v1517_v56, %v1516_v47 }
 0x1a8   : > { %v2796_v7 = vrot.slane %v2795_v61, 1  ;;  %v1519_v2 = vrot.slane %v1518_v57, 1 }
 0x1a9   : > { %v3063_v46 = vpop.eup %3062 }
 0x1aa   : > { %v2797_v30 = vadd.f32 %v2796_v7, %v2795_v61  ;;  %v1520_v58 = vadd.f32 %v1519_v2, %v1518_v57  ;;  %v2808_v59 = vmul.f32 %v3063_v46, %v2807_v36 }
 0x1ac   : > { %v2800_v18 = vadd.f32 %v2798_v22, %v2797_v30  ;;  %v1523_v9 = vadd.f32 %v1521_v32, %v1520_v58  ;;  %v2811_v31 = vadd.f32 %v2810_v63, %v2808_v59 }
 0x1ae   : > { %v2802_v27 = vadd.f32 %v2800_v18, %v1523_v9 }
 0x1b0   : > { %v2805_v37 = vmul.f32 1.442695, %v2802_v27 }
 0x1b2   : > { %3064 = vpow2.f32 %v2805_v37 }
 0x1b8   : > { %v3065_v42 = vpop.eup %3064 }
 0x1b9   : > { %v2809_v33 = vmul.f32 %v3065_v42, %v2807_v36 }
 0x1bb   : > { %v2812_v4 = vadd.f32 %v2810_v63, %v2809_v33 }
 0x1bd   : > { %v2815_v1 = vrot.slane %v2812_v4, 7 }
 0x1bf   : > { %v2817_v28 = vsel %vm2816_vm11, %v2811_v31, %v2815_v1 }
 0x1c0   : > { %2823 = vst.msk [vmem:[%s212_s26] sm:$0x3] %vm2821_vm15, %v2817_v28 }
 0x1c1   : > { %3155 = shalt.err (!%p3152_p1)
}
 0x1c2   : > { %3001 = dma.vmem_to_hbm [thread:$0]  (%p3284_p11), %s2838_s29, 32, %s2840_s30, %s2825_s16  }
 0x1c3 PF: > { %s2851_s5 = sand.u32 1, %s3186_s12   ;;  %p5006_p0 = scmp.ne.s32.totalorder %s4950_s25, 0 }
 0x1c4   : > { %p5007_p3 = scmp.ge.s32.totalorder %s3198_s15, 2  ;;  %s2852_s20 = scalar_lea.sflag [#allocation4], %s2851_s5 }
 0x1c6   : > { %p3008_p7 = pnand %p5007_p3, %p5006_p0 }
 0x1c8   : > { %p3009_p8 = pneg %p3008_p7 }
 0x1ca   : > { %3181 = dma.done.wait (%p3009_p8), %s2852_s20, 32  }
 0x1cb   : > { %3183 = vsyncadd (%p3009_p8), %s2852_s20, 4294967264  ;;  %p17_p4 = scmp.ge.s32.totalorder %s3257_s18, 4   ;;  %s5008_s12 = smov %s3190_s13 }
 0x1cc   : > { %s5009_s13 = smov %s3194_s14  ;;  %s5010_s14 = smov %s3269_s21 }
 0x1cd   : > { %s5011_s15 = smov %s3257_s18  ;;  %19 = sbr.rel (!%p17_p4) target bundleno = 6 (0x6), region = 82 }
 0x1d2   :  { %2858 = vsyncpa [#allocation3], 1 }
 0x1d3   :  { %2860 = vsyncpa [#allocation3 + $0x1], 1 }
 0x1d4   :  { %2861 = vsyncpa [#allocation4], 1 }
 0x1d5   :  { %2863 = vsyncpa [#allocation4 + $0x1], 1 }
 0x1d6   :  { %2864 = vsyncpa [#allocation5], 1 }
 0x1d7   :  { %2866 = vsyncpa [#allocation5 + $0x1], 1 }

</bundles_post_ra>
